<compile_context>
chip_gen: v6e
topology: v6e:2x2x1
jax: 0.10.0
libtpu: 0.0.40
codegen_flags: <defaults>
</compile_context>

<pallas_src>
import functools

import jax
import jax.numpy as jnp
from jax.experimental import pallas as pl
from jax.experimental.pallas import tpu as pltpu


def _spatial_attention_kernel(x_ref, w_ref, o_ref, s_ref, *, H, W, K, P, Nb, C):
    # x_ref: (Nb, C, H, W)         input block (VMEM, native dtype, unpadded)
    # w_ref: (2*K*K,) f32          conv weights in SMEM; index = c*K*K + dy*K + dx
    # o_ref: (1, H, Nb*Wp)         packed output block (segment i valid at cols [i*Wp, i*Wp+W))
    # s_ref: (2, H+2P, Nb*Wp+2P)   f32 scratch: packed zero-padded avg (ch 0) / max (ch 1) maps
    Wp = W + 2 * P
    Wtot = Nb * Wp
    KK = K * K

    # Zero the packed scratch (keeps every padding halo at 0); the interiors are fully
    # overwritten below.  The scratch is tiny, and per-step zeroing keeps the kernel
    # correct even when the grid axis is megacore-sharded (no "first iteration" init).
    s_ref[...] = jnp.zeros_like(s_ref)

    # Channel reduction for the whole block at once: f32 accumulate for the mean,
    # max in the native dtype; no full f32 copy of the input block is materialized.
    x = x_ref[...]
    avg_all = jnp.sum(x, axis=1, dtype=jnp.float32) * jnp.float32(1.0 / C)   # (Nb, H, W)
    max_all = jnp.max(x, axis=1).astype(jnp.float32)                         # (Nb, H, W)

    # Write each batch element's reduced maps into its own padded segment.  Each
    # segment carries a zero halo of width P on every side, so conv taps never bleed
    # across batch elements.
    for i in range(Nb):
        c0 = i * Wp + P
        s_ref[0, P:P + H, c0:c0 + W] = avg_all[i]
        s_ref[1, P:P + H, c0:c0 + W] = max_all[i]

    # KxK conv (2 in-ch -> 1 out-ch, no bias) over the packed maps.
    # Lane (dx) shifts are hoisted: one lane-offset load per (map, dx) = 2*K loads.
    # The tap loop then only does sublane-offset value slices + scalar*vector FMAs,
    # with the scalar weights coming straight from SMEM.
    acc = None
    for dx in range(K):
        sh_avg = s_ref[0, :, dx:dx + Wtot]                       # (H+2P, Wtot)
        sh_max = s_ref[1, :, dx:dx + Wtot]
        for dy in range(K):
            w_avg = w_ref[dy * K + dx]
            w_max = w_ref[KK + dy * K + dx]
            tap = w_avg * sh_avg[dy:dy + H, :] + w_max * sh_max[dy:dy + H, :]
            acc = tap if acc is None else acc + tap

    # Lane-dense store of the whole packed slab; wrapper discards the halo columns.
    o_ref[0] = jax.nn.sigmoid(acc).astype(o_ref.dtype)


def _pick_batch_tile(N, C, H, W, itemsize, P):
    """How many batch elements to pack per grid step.

    Goals (in order): keep the double-buffered input block well inside scoped VMEM,
    make the packed last dim (Nb*(W+2P)) lane-dense, and amortize the ~0.35us/step
    grid overhead.  Nb always divides N.
    """
    Wp = W + 2 * P
    vmem_budget = 8 * 1024 * 1024       # per input buffer; BlockSpec double-buffers it
    target_lanes = 256
    best = 1
    for nb in range(1, N + 1):
        if N % nb:
            continue
        if nb * C * H * W * itemsize > vmem_budget:
            break
        best = nb
        if nb * Wp >= target_lanes:
            break
    return best


def spatial_attention(x, conv_w, *, kernel_size=7):
    """x: (N, C, H, W).  conv_w: (1, 2, K, K).  Returns sigmoid attention map (N, 1, H, W)."""
    assert kernel_size in (3, 7), "kernel size must be 3 or 7"
    K = kernel_size
    P = 3 if K == 7 else 1
    N, C, H, W = x.shape
    Wp = W + 2 * P
    Hp = H + 2 * P

    itemsize = x.dtype.itemsize
    Nb = _pick_batch_tile(N, C, H, W, itemsize, P)
    G = N // Nb
    Wtot = Nb * Wp

    # Flatten the (1, 2, K, K) conv weight to (2*K*K,) f32 for SMEM scalar reads.
    w_flat = conv_w.astype(jnp.float32).reshape(2 * K * K)

    kernel = functools.partial(_spatial_attention_kernel,
                               H=H, W=W, K=K, P=P, Nb=Nb, C=C)

    # Explicit VMEM budget: double-buffered input/output blocks + scratch + headroom,
    # clamped below the smallest physical VMEM (v7x: 64 MiB).
    in_block = Nb * C * H * W * itemsize
    out_block = H * Wtot * itemsize
    scratch_bytes = 2 * Hp * (Wtot + 2 * P) * 4
    vmem_limit = int(min(64 << 20,
                         max(32 << 20, 2 * (in_block + out_block) + scratch_bytes + (4 << 20))))

    # TODO(synk): for very large C*H*W (v7x's 64 MiB VMEM) add a channel grid axis with
    # running sum/max accumulators instead of a full-channel input block.
    packed = pl.pallas_call(
        kernel,
        out_shape=jax.ShapeDtypeStruct((G, H, Wtot), x.dtype),
        grid_spec=pltpu.PrefetchScalarGridSpec(
            num_scalar_prefetch=0,
            grid=(G,),
            in_specs=[
                pl.BlockSpec((Nb, C, H, W), lambda g: (g, 0, 0, 0)),
                pl.BlockSpec(memory_space=pltpu.MemorySpace.SMEM),   # conv weights
            ],
            out_specs=pl.BlockSpec((1, H, Wtot), lambda g: (g, 0, 0)),
            scratch_shapes=[pltpu.VMEM((2, Hp, Wtot + 2 * P), jnp.float32)],
        ),
        compiler_params=pltpu.CompilerParams(
            dimension_semantics=("parallel",),   # batch-group axis (megacore-shardable)
            vmem_limit_bytes=vmem_limit,
        ),
    )(x, w_flat)

    # Un-pack the lane-dense output (pure layout plumbing on the small output):
    # (G, H, Nb*Wp) -> (G, H, Nb, Wp) -> keep the W valid cols -> (N, 1, H, W).
    out = packed.reshape(G, H, Nb, Wp)[..., :W]
    out = jnp.transpose(out, (0, 2, 1, 3)).reshape(N, 1, H, W)
    return out


def _reference(x, conv_w, kernel_size=7):
    # Pure-JAX reference mirroring the PyTorch forward.
    P = 3 if kernel_size == 7 else 1
    avg_out = jnp.mean(x, axis=1, keepdims=True)
    max_out = jnp.max(x, axis=1, keepdims=True)
    cat = jnp.concatenate([avg_out, max_out], axis=1)   # (N, 2, H, W)
    y = jax.lax.conv_general_dilated(
        cat, conv_w,
        window_strides=(1, 1),
        padding=((P, P), (P, P)),
        dimension_numbers=("NCHW", "OIHW", "NCHW"),
        precision=jax.lax.Precision.HIGHEST,
    )
    return jax.nn.sigmoid(y)


if __name__ == "__main__":
    key = jax.random.PRNGKey(0)
    kx, kw = jax.random.split(key)

    N, C, H, W = 2, 4, 16, 16
    K = 7

    x = jax.random.normal(kx, (N, C, H, W), dtype=jnp.float32)
    # Deterministic conv weight init (shape from nn.Conv2d(2, 1, 7, bias=False)).
    fan_in = 2 * K * K
    bound = 1.0 / (fan_in ** 0.5)
    conv_w = jax.random.uniform(kw, (1, 2, K, K), dtype=jnp.float32,
                                minval=-bound, maxval=bound)

    out = spatial_attention(x, conv_w, kernel_size=K)
    out = jax.block_until_ready(out)

    ref = _reference(x, conv_w, kernel_size=K)
    assert out.shape == (N, 1, H, W)
    assert jnp.allclose(out, ref, atol=1e-5, rtol=1e-5), "mismatch vs reference"

    print("KERNEL_OK")
</pallas_src>

<mosaic_0001>
module attributes {stable_mosaic.version = 11 : i64} {
  func.func @_spatial_attention_kernel(%arg0: i32, %arg1: memref<2x4x16x16xf32, #tpu.memory_space<vmem>>, %arg2: memref<98xf32, #tpu.memory_space<smem>>, %arg3: memref<1x16x44xf32, #tpu.memory_space<vmem>>, %arg4: memref<2x22x50xf32, #tpu.memory_space<vmem>>) attributes {dimension_semantics = [#tpu.dimension_semantics<parallel>], iteration_bounds = array<i64: 1>, scalar_prefetch = 0 : i64, scratch_operands = 1 : i64, tpu.core_type = #tpu.core_type<tc>, window_params = [{transform_indices = @transform_0, window_bounds = array<i64: 2, 4, 16, 16>}, {transform_indices = @transform_1, window_bounds = array<i64: 98>}, {transform_indices = @transform_2, window_bounds = array<i64: 1, 16, 44>}]} {
    %cst = arith.constant 0.000000e+00 : f32
    %0 = vector.broadcast %cst : f32 to vector<2x22x50xf32>
    %c0 = arith.constant 0 : index
    %c0_0 = arith.constant 0 : index
    %c0_1 = arith.constant 0 : index
    %1 = vector.load %arg4[%c0, %c0_0, %c0_1] : memref<2x22x50xf32, #tpu.memory_space<vmem>>, vector<2x22x50xf32>
    tpu.vector_store %arg4[%c0, %c0_0, %c0_1], %0 {strides = array<i32>} : memref<2x22x50xf32, #tpu.memory_space<vmem>>, vector<2x22x50xf32>,
    %c0_2 = arith.constant 0 : index
    %c0_3 = arith.constant 0 : index
    %c0_4 = arith.constant 0 : index
    %c0_5 = arith.constant 0 : index
    %2 = vector.load %arg1[%c0_2, %c0_3, %c0_4, %c0_5] : memref<2x4x16x16xf32, #tpu.memory_space<vmem>>, vector<2x4x16x16xf32>
    %cst_6 = arith.constant dense<0.000000e+00> : vector<2x16x16xf32>
    %3 = vector.multi_reduction <add>, %2, %cst_6 [1] : vector<2x4x16x16xf32> to vector<2x16x16xf32>
    %cst_7 = arith.constant 2.500000e-01 : f32
    %4 = vector.broadcast %cst_7 : f32 to vector<2x16x16xf32>
    %5 = arith.mulf %3, %4 : vector<2x16x16xf32>
    %cst_8 = arith.constant dense<0xFF800000> : vector<2x16x16xf32>
    %6 = vector.multi_reduction <maximumf>, %2, %cst_8 [1] : vector<2x4x16x16xf32> to vector<2x16x16xf32>
    %7 = vector.extract_strided_slice %5 {offsets = [0, 0, 0], sizes = [1, 16, 16], strides = [1, 1, 1]} : vector<2x16x16xf32> to vector<1x16x16xf32>
    %8 = vector.shape_cast %7 : vector<1x16x16xf32> to vector<16x16xf32>
    %c0_9 = arith.constant 0 : index
    %c3 = arith.constant 3 : index
    %c3_10 = arith.constant 3 : index
    %9 = vector.load %arg4[%c0_9, %c3, %c3_10] : memref<2x22x50xf32, #tpu.memory_space<vmem>>, vector<1x16x16xf32>
    %10 = vector.shape_cast %9 : vector<1x16x16xf32> to vector<16x16xf32>
    %11 = vector.shape_cast %8 : vector<16x16xf32> to vector<1x16x16xf32>
    tpu.vector_store %arg4[%c0_9, %c3, %c3_10], %11 {strides = array<i32>} : memref<2x22x50xf32, #tpu.memory_space<vmem>>, vector<1x16x16xf32>,
    %12 = vector.extract_strided_slice %6 {offsets = [0, 0, 0], sizes = [1, 16, 16], strides = [1, 1, 1]} : vector<2x16x16xf32> to vector<1x16x16xf32>
    %13 = vector.shape_cast %12 : vector<1x16x16xf32> to vector<16x16xf32>
    %c1 = arith.constant 1 : index
    %c3_11 = arith.constant 3 : index
    %c3_12 = arith.constant 3 : index
    %14 = vector.load %arg4[%c1, %c3_11, %c3_12] : memref<2x22x50xf32, #tpu.memory_space<vmem>>, vector<1x16x16xf32>
    %15 = vector.shape_cast %14 : vector<1x16x16xf32> to vector<16x16xf32>
    %16 = vector.shape_cast %13 : vector<16x16xf32> to vector<1x16x16xf32>
    tpu.vector_store %arg4[%c1, %c3_11, %c3_12], %16 {strides = array<i32>} : memref<2x22x50xf32, #tpu.memory_space<vmem>>, vector<1x16x16xf32>,
    %17 = vector.extract_strided_slice %5 {offsets = [1, 0, 0], sizes = [1, 16, 16], strides = [1, 1, 1]} : vector<2x16x16xf32> to vector<1x16x16xf32>
    %18 = vector.shape_cast %17 : vector<1x16x16xf32> to vector<16x16xf32>
    %c0_13 = arith.constant 0 : index
    %c3_14 = arith.constant 3 : index
    %c25 = arith.constant 25 : index
    %19 = vector.load %arg4[%c0_13, %c3_14, %c25] : memref<2x22x50xf32, #tpu.memory_space<vmem>>, vector<1x16x16xf32>
    %20 = vector.shape_cast %19 : vector<1x16x16xf32> to vector<16x16xf32>
    %21 = vector.shape_cast %18 : vector<16x16xf32> to vector<1x16x16xf32>
    tpu.vector_store %arg4[%c0_13, %c3_14, %c25], %21 {strides = array<i32>} : memref<2x22x50xf32, #tpu.memory_space<vmem>>, vector<1x16x16xf32>,
    %22 = vector.extract_strided_slice %6 {offsets = [1, 0, 0], sizes = [1, 16, 16], strides = [1, 1, 1]} : vector<2x16x16xf32> to vector<1x16x16xf32>
    %23 = vector.shape_cast %22 : vector<1x16x16xf32> to vector<16x16xf32>
    %c1_15 = arith.constant 1 : index
    %c3_16 = arith.constant 3 : index
    %c25_17 = arith.constant 25 : index
    %24 = vector.load %arg4[%c1_15, %c3_16, %c25_17] : memref<2x22x50xf32, #tpu.memory_space<vmem>>, vector<1x16x16xf32>
    %25 = vector.shape_cast %24 : vector<1x16x16xf32> to vector<16x16xf32>
    %26 = vector.shape_cast %23 : vector<16x16xf32> to vector<1x16x16xf32>
    tpu.vector_store %arg4[%c1_15, %c3_16, %c25_17], %26 {strides = array<i32>} : memref<2x22x50xf32, #tpu.memory_space<vmem>>, vector<1x16x16xf32>,
    %c0_18 = arith.constant 0 : index
    %c0_19 = arith.constant 0 : index
    %c0_20 = arith.constant 0 : index
    %27 = vector.load %arg4[%c0_18, %c0_19, %c0_20] : memref<2x22x50xf32, #tpu.memory_space<vmem>>, vector<1x22x44xf32>
    %28 = vector.shape_cast %27 : vector<1x22x44xf32> to vector<22x44xf32>
    %c1_21 = arith.constant 1 : index
    %c0_22 = arith.constant 0 : index
    %c0_23 = arith.constant 0 : index
    %29 = vector.load %arg4[%c1_21, %c0_22, %c0_23] : memref<2x22x50xf32, #tpu.memory_space<vmem>>, vector<1x22x44xf32>
    %30 = vector.shape_cast %29 : vector<1x22x44xf32> to vector<22x44xf32>
    %c0_24 = arith.constant 0 : index
    %31 = memref.load %arg2[%c0_24] : memref<98xf32, #tpu.memory_space<smem>>
    %c49 = arith.constant 49 : index
    %32 = memref.load %arg2[%c49] : memref<98xf32, #tpu.memory_space<smem>>
    %33 = vector.extract_strided_slice %28 {offsets = [0, 0], sizes = [16, 44], strides = [1, 1]} : vector<22x44xf32> to vector<16x44xf32>
    %34 = vector.broadcast %31 : f32 to vector<16x44xf32>
    %35 = arith.mulf %34, %33 : vector<16x44xf32>
    %36 = vector.extract_strided_slice %30 {offsets = [0, 0], sizes = [16, 44], strides = [1, 1]} : vector<22x44xf32> to vector<16x44xf32>
    %37 = vector.broadcast %32 : f32 to vector<16x44xf32>
    %38 = arith.mulf %37, %36 : vector<16x44xf32>
    %39 = arith.addf %35, %38 : vector<16x44xf32>
    %c7 = arith.constant 7 : index
    %40 = memref.load %arg2[%c7] : memref<98xf32, #tpu.memory_space<smem>>
    %c56 = arith.constant 56 : index
    %41 = memref.load %arg2[%c56] : memref<98xf32, #tpu.memory_space<smem>>
    %42 = vector.extract_strided_slice %28 {offsets = [1, 0], sizes = [16, 44], strides = [1, 1]} : vector<22x44xf32> to vector<16x44xf32>
    %43 = vector.broadcast %40 : f32 to vector<16x44xf32>
    %44 = arith.mulf %43, %42 : vector<16x44xf32>
    %45 = vector.extract_strided_slice %30 {offsets = [1, 0], sizes = [16, 44], strides = [1, 1]} : vector<22x44xf32> to vector<16x44xf32>
    %46 = vector.broadcast %41 : f32 to vector<16x44xf32>
    %47 = arith.mulf %46, %45 : vector<16x44xf32>
    %48 = arith.addf %44, %47 : vector<16x44xf32>
    %49 = arith.addf %39, %48 : vector<16x44xf32>
    %c14 = arith.constant 14 : index
    %50 = memref.load %arg2[%c14] : memref<98xf32, #tpu.memory_space<smem>>
    %c63 = arith.constant 63 : index
    %51 = memref.load %arg2[%c63] : memref<98xf32, #tpu.memory_space<smem>>
    %52 = vector.extract_strided_slice %28 {offsets = [2, 0], sizes = [16, 44], strides = [1, 1]} : vector<22x44xf32> to vector<16x44xf32>
    %53 = vector.broadcast %50 : f32 to vector<16x44xf32>
    %54 = arith.mulf %53, %52 : vector<16x44xf32>
    %55 = vector.extract_strided_slice %30 {offsets = [2, 0], sizes = [16, 44], strides = [1, 1]} : vector<22x44xf32> to vector<16x44xf32>
    %56 = vector.broadcast %51 : f32 to vector<16x44xf32>
    %57 = arith.mulf %56, %55 : vector<16x44xf32>
    %58 = arith.addf %54, %57 : vector<16x44xf32>
    %59 = arith.addf %49, %58 : vector<16x44xf32>
    %c21 = arith.constant 21 : index
    %60 = memref.load %arg2[%c21] : memref<98xf32, #tpu.memory_space<smem>>
    %c70 = arith.constant 70 : index
    %61 = memref.load %arg2[%c70] : memref<98xf32, #tpu.memory_space<smem>>
    %62 = vector.extract_strided_slice %28 {offsets = [3, 0], sizes = [16, 44], strides = [1, 1]} : vector<22x44xf32> to vector<16x44xf32>
    %63 = vector.broadcast %60 : f32 to vector<16x44xf32>
    %64 = arith.mulf %63, %62 : vector<16x44xf32>
    %65 = vector.extract_strided_slice %30 {offsets = [3, 0], sizes = [16, 44], strides = [1, 1]} : vector<22x44xf32> to vector<16x44xf32>
    %66 = vector.broadcast %61 : f32 to vector<16x44xf32>
    %67 = arith.mulf %66, %65 : vector<16x44xf32>
    %68 = arith.addf %64, %67 : vector<16x44xf32>
    %69 = arith.addf %59, %68 : vector<16x44xf32>
    %c28 = arith.constant 28 : index
    %70 = memref.load %arg2[%c28] : memref<98xf32, #tpu.memory_space<smem>>
    %c77 = arith.constant 77 : index
    %71 = memref.load %arg2[%c77] : memref<98xf32, #tpu.memory_space<smem>>
    %72 = vector.extract_strided_slice %28 {offsets = [4, 0], sizes = [16, 44], strides = [1, 1]} : vector<22x44xf32> to vector<16x44xf32>
    %73 = vector.broadcast %70 : f32 to vector<16x44xf32>
    %74 = arith.mulf %73, %72 : vector<16x44xf32>
    %75 = vector.extract_strided_slice %30 {offsets = [4, 0], sizes = [16, 44], strides = [1, 1]} : vector<22x44xf32> to vector<16x44xf32>
    %76 = vector.broadcast %71 : f32 to vector<16x44xf32>
    %77 = arith.mulf %76, %75 : vector<16x44xf32>
    %78 = arith.addf %74, %77 : vector<16x44xf32>
    %79 = arith.addf %69, %78 : vector<16x44xf32>
    %c35 = arith.constant 35 : index
    %80 = memref.load %arg2[%c35] : memref<98xf32, #tpu.memory_space<smem>>
    %c84 = arith.constant 84 : index
    %81 = memref.load %arg2[%c84] : memref<98xf32, #tpu.memory_space<smem>>
    %82 = vector.extract_strided_slice %28 {offsets = [5, 0], sizes = [16, 44], strides = [1, 1]} : vector<22x44xf32> to vector<16x44xf32>
    %83 = vector.broadcast %80 : f32 to vector<16x44xf32>
    %84 = arith.mulf %83, %82 : vector<16x44xf32>
    %85 = vector.extract_strided_slice %30 {offsets = [5, 0], sizes = [16, 44], strides = [1, 1]} : vector<22x44xf32> to vector<16x44xf32>
    %86 = vector.broadcast %81 : f32 to vector<16x44xf32>
    %87 = arith.mulf %86, %85 : vector<16x44xf32>
    %88 = arith.addf %84, %87 : vector<16x44xf32>
    %89 = arith.addf %79, %88 : vector<16x44xf32>
    %c42 = arith.constant 42 : index
    %90 = memref.load %arg2[%c42] : memref<98xf32, #tpu.memory_space<smem>>
    %c91 = arith.constant 91 : index
    %91 = memref.load %arg2[%c91] : memref<98xf32, #tpu.memory_space<smem>>
    %92 = vector.extract_strided_slice %28 {offsets = [6, 0], sizes = [16, 44], strides = [1, 1]} : vector<22x44xf32> to vector<16x44xf32>
    %93 = vector.broadcast %90 : f32 to vector<16x44xf32>
    %94 = arith.mulf %93, %92 : vector<16x44xf32>
    %95 = vector.extract_strided_slice %30 {offsets = [6, 0], sizes = [16, 44], strides = [1, 1]} : vector<22x44xf32> to vector<16x44xf32>
    %96 = vector.broadcast %91 : f32 to vector<16x44xf32>
    %97 = arith.mulf %96, %95 : vector<16x44xf32>
    %98 = arith.addf %94, %97 : vector<16x44xf32>
    %99 = arith.addf %89, %98 : vector<16x44xf32>
    %c0_25 = arith.constant 0 : index
    %c0_26 = arith.constant 0 : index
    %c1_27 = arith.constant 1 : index
    %100 = vector.load %arg4[%c0_25, %c0_26, %c1_27] : memref<2x22x50xf32, #tpu.memory_space<vmem>>, vector<1x22x44xf32>
    %101 = vector.shape_cast %100 : vector<1x22x44xf32> to vector<22x44xf32>
    %c1_28 = arith.constant 1 : index
    %c0_29 = arith.constant 0 : index
    %c1_30 = arith.constant 1 : index
    %102 = vector.load %arg4[%c1_28, %c0_29, %c1_30] : memref<2x22x50xf32, #tpu.memory_space<vmem>>, vector<1x22x44xf32>
    %103 = vector.shape_cast %102 : vector<1x22x44xf32> to vector<22x44xf32>
    %c1_31 = arith.constant 1 : index
    %104 = memref.load %arg2[%c1_31] : memref<98xf32, #tpu.memory_space<smem>>
    %c50 = arith.constant 50 : index
    %105 = memref.load %arg2[%c50] : memref<98xf32, #tpu.memory_space<smem>>
    %106 = vector.extract_strided_slice %101 {offsets = [0, 0], sizes = [16, 44], strides = [1, 1]} : vector<22x44xf32> to vector<16x44xf32>
    %107 = vector.broadcast %104 : f32 to vector<16x44xf32>
    %108 = arith.mulf %107, %106 : vector<16x44xf32>
    %109 = vector.extract_strided_slice %103 {offsets = [0, 0], sizes = [16, 44], strides = [1, 1]} : vector<22x44xf32> to vector<16x44xf32>
    %110 = vector.broadcast %105 : f32 to vector<16x44xf32>
    %111 = arith.mulf %110, %109 : vector<16x44xf32>
    %112 = arith.addf %108, %111 : vector<16x44xf32>
    %113 = arith.addf %99, %112 : vector<16x44xf32>
    %c8 = arith.constant 8 : index
    %114 = memref.load %arg2[%c8] : memref<98xf32, #tpu.memory_space<smem>>
    %c57 = arith.constant 57 : index
    %115 = memref.load %arg2[%c57] : memref<98xf32, #tpu.memory_space<smem>>
    %116 = vector.extract_strided_slice %101 {offsets = [1, 0], sizes = [16, 44], strides = [1, 1]} : vector<22x44xf32> to vector<16x44xf32>
    %117 = vector.broadcast %114 : f32 to vector<16x44xf32>
    %118 = arith.mulf %117, %116 : vector<16x44xf32>
    %119 = vector.extract_strided_slice %103 {offsets = [1, 0], sizes = [16, 44], strides = [1, 1]} : vector<22x44xf32> to vector<16x44xf32>
    %120 = vector.broadcast %115 : f32 to vector<16x44xf32>
    %121 = arith.mulf %120, %119 : vector<16x44xf32>
    %122 = arith.addf %118, %121 : vector<16x44xf32>
    %123 = arith.addf %113, %122 : vector<16x44xf32>
    %c15 = arith.constant 15 : index
    %124 = memref.load %arg2[%c15] : memref<98xf32, #tpu.memory_space<smem>>
    %c64 = arith.constant 64 : index
    %125 = memref.load %arg2[%c64] : memref<98xf32, #tpu.memory_space<smem>>
    %126 = vector.extract_strided_slice %101 {offsets = [2, 0], sizes = [16, 44], strides = [1, 1]} : vector<22x44xf32> to vector<16x44xf32>
    %127 = vector.broadcast %124 : f32 to vector<16x44xf32>
    %128 = arith.mulf %127, %126 : vector<16x44xf32>
    %129 = vector.extract_strided_slice %103 {offsets = [2, 0], sizes = [16, 44], strides = [1, 1]} : vector<22x44xf32> to vector<16x44xf32>
    %130 = vector.broadcast %125 : f32 to vector<16x44xf32>
    %131 = arith.mulf %130, %129 : vector<16x44xf32>
    %132 = arith.addf %128, %131 : vector<16x44xf32>
    %133 = arith.addf %123, %132 : vector<16x44xf32>
    %c22 = arith.constant 22 : index
    %134 = memref.load %arg2[%c22] : memref<98xf32, #tpu.memory_space<smem>>
    %c71 = arith.constant 71 : index
    %135 = memref.load %arg2[%c71] : memref<98xf32, #tpu.memory_space<smem>>
    %136 = vector.extract_strided_slice %101 {offsets = [3, 0], sizes = [16, 44], strides = [1, 1]} : vector<22x44xf32> to vector<16x44xf32>
    %137 = vector.broadcast %134 : f32 to vector<16x44xf32>
    %138 = arith.mulf %137, %136 : vector<16x44xf32>
    %139 = vector.extract_strided_slice %103 {offsets = [3, 0], sizes = [16, 44], strides = [1, 1]} : vector<22x44xf32> to vector<16x44xf32>
    %140 = vector.broadcast %135 : f32 to vector<16x44xf32>
    %141 = arith.mulf %140, %139 : vector<16x44xf32>
    %142 = arith.addf %138, %141 : vector<16x44xf32>
    %143 = arith.addf %133, %142 : vector<16x44xf32>
    %c29 = arith.constant 29 : index
    %144 = memref.load %arg2[%c29] : memref<98xf32, #tpu.memory_space<smem>>
    %c78 = arith.constant 78 : index
    %145 = memref.load %arg2[%c78] : memref<98xf32, #tpu.memory_space<smem>>
    %146 = vector.extract_strided_slice %101 {offsets = [4, 0], sizes = [16, 44], strides = [1, 1]} : vector<22x44xf32> to vector<16x44xf32>
    %147 = vector.broadcast %144 : f32 to vector<16x44xf32>
    %148 = arith.mulf %147, %146 : vector<16x44xf32>
    %149 = vector.extract_strided_slice %103 {offsets = [4, 0], sizes = [16, 44], strides = [1, 1]} : vector<22x44xf32> to vector<16x44xf32>
    %150 = vector.broadcast %145 : f32 to vector<16x44xf32>
    %151 = arith.mulf %150, %149 : vector<16x44xf32>
    %152 = arith.addf %148, %151 : vector<16x44xf32>
    %153 = arith.addf %143, %152 : vector<16x44xf32>
    %c36 = arith.constant 36 : index
    %154 = memref.load %arg2[%c36] : memref<98xf32, #tpu.memory_space<smem>>
    %c85 = arith.constant 85 : index
    %155 = memref.load %arg2[%c85] : memref<98xf32, #tpu.memory_space<smem>>
    %156 = vector.extract_strided_slice %101 {offsets = [5, 0], sizes = [16, 44], strides = [1, 1]} : vector<22x44xf32> to vector<16x44xf32>
    %157 = vector.broadcast %154 : f32 to vector<16x44xf32>
    %158 = arith.mulf %157, %156 : vector<16x44xf32>
    %159 = vector.extract_strided_slice %103 {offsets = [5, 0], sizes = [16, 44], strides = [1, 1]} : vector<22x44xf32> to vector<16x44xf32>
    %160 = vector.broadcast %155 : f32 to vector<16x44xf32>
    %161 = arith.mulf %160, %159 : vector<16x44xf32>
    %162 = arith.addf %158, %161 : vector<16x44xf32>
    %163 = arith.addf %153, %162 : vector<16x44xf32>
    %c43 = arith.constant 43 : index
    %164 = memref.load %arg2[%c43] : memref<98xf32, #tpu.memory_space<smem>>
    %c92 = arith.constant 92 : index
    %165 = memref.load %arg2[%c92] : memref<98xf32, #tpu.memory_space<smem>>
    %166 = vector.extract_strided_slice %101 {offsets = [6, 0], sizes = [16, 44], strides = [1, 1]} : vector<22x44xf32> to vector<16x44xf32>
    %167 = vector.broadcast %164 : f32 to vector<16x44xf32>
    %168 = arith.mulf %167, %166 : vector<16x44xf32>
    %169 = vector.extract_strided_slice %103 {offsets = [6, 0], sizes = [16, 44], strides = [1, 1]} : vector<22x44xf32> to vector<16x44xf32>
    %170 = vector.broadcast %165 : f32 to vector<16x44xf32>
    %171 = arith.mulf %170, %169 : vector<16x44xf32>
    %172 = arith.addf %168, %171 : vector<16x44xf32>
    %173 = arith.addf %163, %172 : vector<16x44xf32>
    %c0_32 = arith.constant 0 : index
    %c0_33 = arith.constant 0 : index
    %c2 = arith.constant 2 : index
    %174 = vector.load %arg4[%c0_32, %c0_33, %c2] : memref<2x22x50xf32, #tpu.memory_space<vmem>>, vector<1x22x44xf32>
    %175 = vector.shape_cast %174 : vector<1x22x44xf32> to vector<22x44xf32>
    %c1_34 = arith.constant 1 : index
    %c0_35 = arith.constant 0 : index
    %c2_36 = arith.constant 2 : index
    %176 = vector.load %arg4[%c1_34, %c0_35, %c2_36] : memref<2x22x50xf32, #tpu.memory_space<vmem>>, vector<1x22x44xf32>
    %177 = vector.shape_cast %176 : vector<1x22x44xf32> to vector<22x44xf32>
    %c2_37 = arith.constant 2 : index
    %178 = memref.load %arg2[%c2_37] : memref<98xf32, #tpu.memory_space<smem>>
    %c51 = arith.constant 51 : index
    %179 = memref.load %arg2[%c51] : memref<98xf32, #tpu.memory_space<smem>>
    %180 = vector.extract_strided_slice %175 {offsets = [0, 0], sizes = [16, 44], strides = [1, 1]} : vector<22x44xf32> to vector<16x44xf32>
    %181 = vector.broadcast %178 : f32 to vector<16x44xf32>
    %182 = arith.mulf %181, %180 : vector<16x44xf32>
    %183 = vector.extract_strided_slice %177 {offsets = [0, 0], sizes = [16, 44], strides = [1, 1]} : vector<22x44xf32> to vector<16x44xf32>
    %184 = vector.broadcast %179 : f32 to vector<16x44xf32>
    %185 = arith.mulf %184, %183 : vector<16x44xf32>
    %186 = arith.addf %182, %185 : vector<16x44xf32>
    %187 = arith.addf %173, %186 : vector<16x44xf32>
    %c9 = arith.constant 9 : index
    %188 = memref.load %arg2[%c9] : memref<98xf32, #tpu.memory_space<smem>>
    %c58 = arith.constant 58 : index
    %189 = memref.load %arg2[%c58] : memref<98xf32, #tpu.memory_space<smem>>
    %190 = vector.extract_strided_slice %175 {offsets = [1, 0], sizes = [16, 44], strides = [1, 1]} : vector<22x44xf32> to vector<16x44xf32>
    %191 = vector.broadcast %188 : f32 to vector<16x44xf32>
    %192 = arith.mulf %191, %190 : vector<16x44xf32>
    %193 = vector.extract_strided_slice %177 {offsets = [1, 0], sizes = [16, 44], strides = [1, 1]} : vector<22x44xf32> to vector<16x44xf32>
    %194 = vector.broadcast %189 : f32 to vector<16x44xf32>
    %195 = arith.mulf %194, %193 : vector<16x44xf32>
    %196 = arith.addf %192, %195 : vector<16x44xf32>
    %197 = arith.addf %187, %196 : vector<16x44xf32>
    %c16 = arith.constant 16 : index
    %198 = memref.load %arg2[%c16] : memref<98xf32, #tpu.memory_space<smem>>
    %c65 = arith.constant 65 : index
    %199 = memref.load %arg2[%c65] : memref<98xf32, #tpu.memory_space<smem>>
    %200 = vector.extract_strided_slice %175 {offsets = [2, 0], sizes = [16, 44], strides = [1, 1]} : vector<22x44xf32> to vector<16x44xf32>
    %201 = vector.broadcast %198 : f32 to vector<16x44xf32>
    %202 = arith.mulf %201, %200 : vector<16x44xf32>
    %203 = vector.extract_strided_slice %177 {offsets = [2, 0], sizes = [16, 44], strides = [1, 1]} : vector<22x44xf32> to vector<16x44xf32>
    %204 = vector.broadcast %199 : f32 to vector<16x44xf32>
    %205 = arith.mulf %204, %203 : vector<16x44xf32>
    %206 = arith.addf %202, %205 : vector<16x44xf32>
    %207 = arith.addf %197, %206 : vector<16x44xf32>
    %c23 = arith.constant 23 : index
    %208 = memref.load %arg2[%c23] : memref<98xf32, #tpu.memory_space<smem>>
    %c72 = arith.constant 72 : index
    %209 = memref.load %arg2[%c72] : memref<98xf32, #tpu.memory_space<smem>>
    %210 = vector.extract_strided_slice %175 {offsets = [3, 0], sizes = [16, 44], strides = [1, 1]} : vector<22x44xf32> to vector<16x44xf32>
    %211 = vector.broadcast %208 : f32 to vector<16x44xf32>
    %212 = arith.mulf %211, %210 : vector<16x44xf32>
    %213 = vector.extract_strided_slice %177 {offsets = [3, 0], sizes = [16, 44], strides = [1, 1]} : vector<22x44xf32> to vector<16x44xf32>
    %214 = vector.broadcast %209 : f32 to vector<16x44xf32>
    %215 = arith.mulf %214, %213 : vector<16x44xf32>
    %216 = arith.addf %212, %215 : vector<16x44xf32>
    %217 = arith.addf %207, %216 : vector<16x44xf32>
    %c30 = arith.constant 30 : index
    %218 = memref.load %arg2[%c30] : memref<98xf32, #tpu.memory_space<smem>>
    %c79 = arith.constant 79 : index
    %219 = memref.load %arg2[%c79] : memref<98xf32, #tpu.memory_space<smem>>
    %220 = vector.extract_strided_slice %175 {offsets = [4, 0], sizes = [16, 44], strides = [1, 1]} : vector<22x44xf32> to vector<16x44xf32>
    %221 = vector.broadcast %218 : f32 to vector<16x44xf32>
    %222 = arith.mulf %221, %220 : vector<16x44xf32>
    %223 = vector.extract_strided_slice %177 {offsets = [4, 0], sizes = [16, 44], strides = [1, 1]} : vector<22x44xf32> to vector<16x44xf32>
    %224 = vector.broadcast %219 : f32 to vector<16x44xf32>
    %225 = arith.mulf %224, %223 : vector<16x44xf32>
    %226 = arith.addf %222, %225 : vector<16x44xf32>
    %227 = arith.addf %217, %226 : vector<16x44xf32>
    %c37 = arith.constant 37 : index
    %228 = memref.load %arg2[%c37] : memref<98xf32, #tpu.memory_space<smem>>
    %c86 = arith.constant 86 : index
    %229 = memref.load %arg2[%c86] : memref<98xf32, #tpu.memory_space<smem>>
    %230 = vector.extract_strided_slice %175 {offsets = [5, 0], sizes = [16, 44], strides = [1, 1]} : vector<22x44xf32> to vector<16x44xf32>
    %231 = vector.broadcast %228 : f32 to vector<16x44xf32>
    %232 = arith.mulf %231, %230 : vector<16x44xf32>
    %233 = vector.extract_strided_slice %177 {offsets = [5, 0], sizes = [16, 44], strides = [1, 1]} : vector<22x44xf32> to vector<16x44xf32>
    %234 = vector.broadcast %229 : f32 to vector<16x44xf32>
    %235 = arith.mulf %234, %233 : vector<16x44xf32>
    %236 = arith.addf %232, %235 : vector<16x44xf32>
    %237 = arith.addf %227, %236 : vector<16x44xf32>
    %c44 = arith.constant 44 : index
    %238 = memref.load %arg2[%c44] : memref<98xf32, #tpu.memory_space<smem>>
    %c93 = arith.constant 93 : index
    %239 = memref.load %arg2[%c93] : memref<98xf32, #tpu.memory_space<smem>>
    %240 = vector.extract_strided_slice %175 {offsets = [6, 0], sizes = [16, 44], strides = [1, 1]} : vector<22x44xf32> to vector<16x44xf32>
    %241 = vector.broadcast %238 : f32 to vector<16x44xf32>
    %242 = arith.mulf %241, %240 : vector<16x44xf32>
    %243 = vector.extract_strided_slice %177 {offsets = [6, 0], sizes = [16, 44], strides = [1, 1]} : vector<22x44xf32> to vector<16x44xf32>
    %244 = vector.broadcast %239 : f32 to vector<16x44xf32>
    %245 = arith.mulf %244, %243 : vector<16x44xf32>
    %246 = arith.addf %242, %245 : vector<16x44xf32>
    %247 = arith.addf %237, %246 : vector<16x44xf32>
    %c0_38 = arith.constant 0 : index
    %c0_39 = arith.constant 0 : index
    %c3_40 = arith.constant 3 : index
    %248 = vector.load %arg4[%c0_38, %c0_39, %c3_40] : memref<2x22x50xf32, #tpu.memory_space<vmem>>, vector<1x22x44xf32>
    %249 = vector.shape_cast %248 : vector<1x22x44xf32> to vector<22x44xf32>
    %c1_41 = arith.constant 1 : index
    %c0_42 = arith.constant 0 : index
    %c3_43 = arith.constant 3 : index
    %250 = vector.load %arg4[%c1_41, %c0_42, %c3_43] : memref<2x22x50xf32, #tpu.memory_space<vmem>>, vector<1x22x44xf32>
    %251 = vector.shape_cast %250 : vector<1x22x44xf32> to vector<22x44xf32>
    %c3_44 = arith.constant 3 : index
    %252 = memref.load %arg2[%c3_44] : memref<98xf32, #tpu.memory_space<smem>>
    %c52 = arith.constant 52 : index
    %253 = memref.load %arg2[%c52] : memref<98xf32, #tpu.memory_space<smem>>
    %254 = vector.extract_strided_slice %249 {offsets = [0, 0], sizes = [16, 44], strides = [1, 1]} : vector<22x44xf32> to vector<16x44xf32>
    %255 = vector.broadcast %252 : f32 to vector<16x44xf32>
    %256 = arith.mulf %255, %254 : vector<16x44xf32>
    %257 = vector.extract_strided_slice %251 {offsets = [0, 0], sizes = [16, 44], strides = [1, 1]} : vector<22x44xf32> to vector<16x44xf32>
    %258 = vector.broadcast %253 : f32 to vector<16x44xf32>
    %259 = arith.mulf %258, %257 : vector<16x44xf32>
    %260 = arith.addf %256, %259 : vector<16x44xf32>
    %261 = arith.addf %247, %260 : vector<16x44xf32>
    %c10 = arith.constant 10 : index
    %262 = memref.load %arg2[%c10] : memref<98xf32, #tpu.memory_space<smem>>
    %c59 = arith.constant 59 : index
    %263 = memref.load %arg2[%c59] : memref<98xf32, #tpu.memory_space<smem>>
    %264 = vector.extract_strided_slice %249 {offsets = [1, 0], sizes = [16, 44], strides = [1, 1]} : vector<22x44xf32> to vector<16x44xf32>
    %265 = vector.broadcast %262 : f32 to vector<16x44xf32>
    %266 = arith.mulf %265, %264 : vector<16x44xf32>
    %267 = vector.extract_strided_slice %251 {offsets = [1, 0], sizes = [16, 44], strides = [1, 1]} : vector<22x44xf32> to vector<16x44xf32>
    %268 = vector.broadcast %263 : f32 to vector<16x44xf32>
    %269 = arith.mulf %268, %267 : vector<16x44xf32>
    %270 = arith.addf %266, %269 : vector<16x44xf32>
    %271 = arith.addf %261, %270 : vector<16x44xf32>
    %c17 = arith.constant 17 : index
    %272 = memref.load %arg2[%c17] : memref<98xf32, #tpu.memory_space<smem>>
    %c66 = arith.constant 66 : index
    %273 = memref.load %arg2[%c66] : memref<98xf32, #tpu.memory_space<smem>>
    %274 = vector.extract_strided_slice %249 {offsets = [2, 0], sizes = [16, 44], strides = [1, 1]} : vector<22x44xf32> to vector<16x44xf32>
    %275 = vector.broadcast %272 : f32 to vector<16x44xf32>
    %276 = arith.mulf %275, %274 : vector<16x44xf32>
    %277 = vector.extract_strided_slice %251 {offsets = [2, 0], sizes = [16, 44], strides = [1, 1]} : vector<22x44xf32> to vector<16x44xf32>
    %278 = vector.broadcast %273 : f32 to vector<16x44xf32>
    %279 = arith.mulf %278, %277 : vector<16x44xf32>
    %280 = arith.addf %276, %279 : vector<16x44xf32>
    %281 = arith.addf %271, %280 : vector<16x44xf32>
    %c24 = arith.constant 24 : index
    %282 = memref.load %arg2[%c24] : memref<98xf32, #tpu.memory_space<smem>>
    %c73 = arith.constant 73 : index
    %283 = memref.load %arg2[%c73] : memref<98xf32, #tpu.memory_space<smem>>
    %284 = vector.extract_strided_slice %249 {offsets = [3, 0], sizes = [16, 44], strides = [1, 1]} : vector<22x44xf32> to vector<16x44xf32>
    %285 = vector.broadcast %282 : f32 to vector<16x44xf32>
    %286 = arith.mulf %285, %284 : vector<16x44xf32>
    %287 = vector.extract_strided_slice %251 {offsets = [3, 0], sizes = [16, 44], strides = [1, 1]} : vector<22x44xf32> to vector<16x44xf32>
    %288 = vector.broadcast %283 : f32 to vector<16x44xf32>
    %289 = arith.mulf %288, %287 : vector<16x44xf32>
    %290 = arith.addf %286, %289 : vector<16x44xf32>
    %291 = arith.addf %281, %290 : vector<16x44xf32>
    %c31 = arith.constant 31 : index
    %292 = memref.load %arg2[%c31] : memref<98xf32, #tpu.memory_space<smem>>
    %c80 = arith.constant 80 : index
    %293 = memref.load %arg2[%c80] : memref<98xf32, #tpu.memory_space<smem>>
    %294 = vector.extract_strided_slice %249 {offsets = [4, 0], sizes = [16, 44], strides = [1, 1]} : vector<22x44xf32> to vector<16x44xf32>
    %295 = vector.broadcast %292 : f32 to vector<16x44xf32>
    %296 = arith.mulf %295, %294 : vector<16x44xf32>
    %297 = vector.extract_strided_slice %251 {offsets = [4, 0], sizes = [16, 44], strides = [1, 1]} : vector<22x44xf32> to vector<16x44xf32>
    %298 = vector.broadcast %293 : f32 to vector<16x44xf32>
    %299 = arith.mulf %298, %297 : vector<16x44xf32>
    %300 = arith.addf %296, %299 : vector<16x44xf32>
    %301 = arith.addf %291, %300 : vector<16x44xf32>
    %c38 = arith.constant 38 : index
    %302 = memref.load %arg2[%c38] : memref<98xf32, #tpu.memory_space<smem>>
    %c87 = arith.constant 87 : index
    %303 = memref.load %arg2[%c87] : memref<98xf32, #tpu.memory_space<smem>>
    %304 = vector.extract_strided_slice %249 {offsets = [5, 0], sizes = [16, 44], strides = [1, 1]} : vector<22x44xf32> to vector<16x44xf32>
    %305 = vector.broadcast %302 : f32 to vector<16x44xf32>
    %306 = arith.mulf %305, %304 : vector<16x44xf32>
    %307 = vector.extract_strided_slice %251 {offsets = [5, 0], sizes = [16, 44], strides = [1, 1]} : vector<22x44xf32> to vector<16x44xf32>
    %308 = vector.broadcast %303 : f32 to vector<16x44xf32>
    %309 = arith.mulf %308, %307 : vector<16x44xf32>
    %310 = arith.addf %306, %309 : vector<16x44xf32>
    %311 = arith.addf %301, %310 : vector<16x44xf32>
    %c45 = arith.constant 45 : index
    %312 = memref.load %arg2[%c45] : memref<98xf32, #tpu.memory_space<smem>>
    %c94 = arith.constant 94 : index
    %313 = memref.load %arg2[%c94] : memref<98xf32, #tpu.memory_space<smem>>
    %314 = vector.extract_strided_slice %249 {offsets = [6, 0], sizes = [16, 44], strides = [1, 1]} : vector<22x44xf32> to vector<16x44xf32>
    %315 = vector.broadcast %312 : f32 to vector<16x44xf32>
    %316 = arith.mulf %315, %314 : vector<16x44xf32>
    %317 = vector.extract_strided_slice %251 {offsets = [6, 0], sizes = [16, 44], strides = [1, 1]} : vector<22x44xf32> to vector<16x44xf32>
    %318 = vector.broadcast %313 : f32 to vector<16x44xf32>
    %319 = arith.mulf %318, %317 : vector<16x44xf32>
    %320 = arith.addf %316, %319 : vector<16x44xf32>
    %321 = arith.addf %311, %320 : vector<16x44xf32>
    %c0_45 = arith.constant 0 : index
    %c0_46 = arith.constant 0 : index
    %c4 = arith.constant 4 : index
    %322 = vector.load %arg4[%c0_45, %c0_46, %c4] : memref<2x22x50xf32, #tpu.memory_space<vmem>>, vector<1x22x44xf32>
    %323 = vector.shape_cast %322 : vector<1x22x44xf32> to vector<22x44xf32>
    %c1_47 = arith.constant 1 : index
    %c0_48 = arith.constant 0 : index
    %c4_49 = arith.constant 4 : index
    %324 = vector.load %arg4[%c1_47, %c0_48, %c4_49] : memref<2x22x50xf32, #tpu.memory_space<vmem>>, vector<1x22x44xf32>
    %325 = vector.shape_cast %324 : vector<1x22x44xf32> to vector<22x44xf32>
    %c4_50 = arith.constant 4 : index
    %326 = memref.load %arg2[%c4_50] : memref<98xf32, #tpu.memory_space<smem>>
    %c53 = arith.constant 53 : index
    %327 = memref.load %arg2[%c53] : memref<98xf32, #tpu.memory_space<smem>>
    %328 = vector.extract_strided_slice %323 {offsets = [0, 0], sizes = [16, 44], strides = [1, 1]} : vector<22x44xf32> to vector<16x44xf32>
    %329 = vector.broadcast %326 : f32 to vector<16x44xf32>
    %330 = arith.mulf %329, %328 : vector<16x44xf32>
    %331 = vector.extract_strided_slice %325 {offsets = [0, 0], sizes = [16, 44], strides = [1, 1]} : vector<22x44xf32> to vector<16x44xf32>
    %332 = vector.broadcast %327 : f32 to vector<16x44xf32>
    %333 = arith.mulf %332, %331 : vector<16x44xf32>
    %334 = arith.addf %330, %333 : vector<16x44xf32>
    %335 = arith.addf %321, %334 : vector<16x44xf32>
    %c11 = arith.constant 11 : index
    %336 = memref.load %arg2[%c11] : memref<98xf32, #tpu.memory_space<smem>>
    %c60 = arith.constant 60 : index
    %337 = memref.load %arg2[%c60] : memref<98xf32, #tpu.memory_space<smem>>
    %338 = vector.extract_strided_slice %323 {offsets = [1, 0], sizes = [16, 44], strides = [1, 1]} : vector<22x44xf32> to vector<16x44xf32>
    %339 = vector.broadcast %336 : f32 to vector<16x44xf32>
    %340 = arith.mulf %339, %338 : vector<16x44xf32>
    %341 = vector.extract_strided_slice %325 {offsets = [1, 0], sizes = [16, 44], strides = [1, 1]} : vector<22x44xf32> to vector<16x44xf32>
    %342 = vector.broadcast %337 : f32 to vector<16x44xf32>
    %343 = arith.mulf %342, %341 : vector<16x44xf32>
    %344 = arith.addf %340, %343 : vector<16x44xf32>
    %345 = arith.addf %335, %344 : vector<16x44xf32>
    %c18 = arith.constant 18 : index
    %346 = memref.load %arg2[%c18] : memref<98xf32, #tpu.memory_space<smem>>
    %c67 = arith.constant 67 : index
    %347 = memref.load %arg2[%c67] : memref<98xf32, #tpu.memory_space<smem>>
    %348 = vector.extract_strided_slice %323 {offsets = [2, 0], sizes = [16, 44], strides = [1, 1]} : vector<22x44xf32> to vector<16x44xf32>
    %349 = vector.broadcast %346 : f32 to vector<16x44xf32>
    %350 = arith.mulf %349, %348 : vector<16x44xf32>
    %351 = vector.extract_strided_slice %325 {offsets = [2, 0], sizes = [16, 44], strides = [1, 1]} : vector<22x44xf32> to vector<16x44xf32>
    %352 = vector.broadcast %347 : f32 to vector<16x44xf32>
    %353 = arith.mulf %352, %351 : vector<16x44xf32>
    %354 = arith.addf %350, %353 : vector<16x44xf32>
    %355 = arith.addf %345, %354 : vector<16x44xf32>
    %c25_51 = arith.constant 25 : index
    %356 = memref.load %arg2[%c25_51] : memref<98xf32, #tpu.memory_space<smem>>
    %c74 = arith.constant 74 : index
    %357 = memref.load %arg2[%c74] : memref<98xf32, #tpu.memory_space<smem>>
    %358 = vector.extract_strided_slice %323 {offsets = [3, 0], sizes = [16, 44], strides = [1, 1]} : vector<22x44xf32> to vector<16x44xf32>
    %359 = vector.broadcast %356 : f32 to vector<16x44xf32>
    %360 = arith.mulf %359, %358 : vector<16x44xf32>
    %361 = vector.extract_strided_slice %325 {offsets = [3, 0], sizes = [16, 44], strides = [1, 1]} : vector<22x44xf32> to vector<16x44xf32>
    %362 = vector.broadcast %357 : f32 to vector<16x44xf32>
    %363 = arith.mulf %362, %361 : vector<16x44xf32>
    %364 = arith.addf %360, %363 : vector<16x44xf32>
    %365 = arith.addf %355, %364 : vector<16x44xf32>
    %c32 = arith.constant 32 : index
    %366 = memref.load %arg2[%c32] : memref<98xf32, #tpu.memory_space<smem>>
    %c81 = arith.constant 81 : index
    %367 = memref.load %arg2[%c81] : memref<98xf32, #tpu.memory_space<smem>>
    %368 = vector.extract_strided_slice %323 {offsets = [4, 0], sizes = [16, 44], strides = [1, 1]} : vector<22x44xf32> to vector<16x44xf32>
    %369 = vector.broadcast %366 : f32 to vector<16x44xf32>
    %370 = arith.mulf %369, %368 : vector<16x44xf32>
    %371 = vector.extract_strided_slice %325 {offsets = [4, 0], sizes = [16, 44], strides = [1, 1]} : vector<22x44xf32> to vector<16x44xf32>
    %372 = vector.broadcast %367 : f32 to vector<16x44xf32>
    %373 = arith.mulf %372, %371 : vector<16x44xf32>
    %374 = arith.addf %370, %373 : vector<16x44xf32>
    %375 = arith.addf %365, %374 : vector<16x44xf32>
    %c39 = arith.constant 39 : index
    %376 = memref.load %arg2[%c39] : memref<98xf32, #tpu.memory_space<smem>>
    %c88 = arith.constant 88 : index
    %377 = memref.load %arg2[%c88] : memref<98xf32, #tpu.memory_space<smem>>
    %378 = vector.extract_strided_slice %323 {offsets = [5, 0], sizes = [16, 44], strides = [1, 1]} : vector<22x44xf32> to vector<16x44xf32>
    %379 = vector.broadcast %376 : f32 to vector<16x44xf32>
    %380 = arith.mulf %379, %378 : vector<16x44xf32>
    %381 = vector.extract_strided_slice %325 {offsets = [5, 0], sizes = [16, 44], strides = [1, 1]} : vector<22x44xf32> to vector<16x44xf32>
    %382 = vector.broadcast %377 : f32 to vector<16x44xf32>
    %383 = arith.mulf %382, %381 : vector<16x44xf32>
    %384 = arith.addf %380, %383 : vector<16x44xf32>
    %385 = arith.addf %375, %384 : vector<16x44xf32>
    %c46 = arith.constant 46 : index
    %386 = memref.load %arg2[%c46] : memref<98xf32, #tpu.memory_space<smem>>
    %c95 = arith.constant 95 : index
    %387 = memref.load %arg2[%c95] : memref<98xf32, #tpu.memory_space<smem>>
    %388 = vector.extract_strided_slice %323 {offsets = [6, 0], sizes = [16, 44], strides = [1, 1]} : vector<22x44xf32> to vector<16x44xf32>
    %389 = vector.broadcast %386 : f32 to vector<16x44xf32>
    %390 = arith.mulf %389, %388 : vector<16x44xf32>
    %391 = vector.extract_strided_slice %325 {offsets = [6, 0], sizes = [16, 44], strides = [1, 1]} : vector<22x44xf32> to vector<16x44xf32>
    %392 = vector.broadcast %387 : f32 to vector<16x44xf32>
    %393 = arith.mulf %392, %391 : vector<16x44xf32>
    %394 = arith.addf %390, %393 : vector<16x44xf32>
    %395 = arith.addf %385, %394 : vector<16x44xf32>
    %c0_52 = arith.constant 0 : index
    %c0_53 = arith.constant 0 : index
    %c5 = arith.constant 5 : index
    %396 = vector.load %arg4[%c0_52, %c0_53, %c5] : memref<2x22x50xf32, #tpu.memory_space<vmem>>, vector<1x22x44xf32>
    %397 = vector.shape_cast %396 : vector<1x22x44xf32> to vector<22x44xf32>
    %c1_54 = arith.constant 1 : index
    %c0_55 = arith.constant 0 : index
    %c5_56 = arith.constant 5 : index
    %398 = vector.load %arg4[%c1_54, %c0_55, %c5_56] : memref<2x22x50xf32, #tpu.memory_space<vmem>>, vector<1x22x44xf32>
    %399 = vector.shape_cast %398 : vector<1x22x44xf32> to vector<22x44xf32>
    %c5_57 = arith.constant 5 : index
    %400 = memref.load %arg2[%c5_57] : memref<98xf32, #tpu.memory_space<smem>>
    %c54 = arith.constant 54 : index
    %401 = memref.load %arg2[%c54] : memref<98xf32, #tpu.memory_space<smem>>
    %402 = vector.extract_strided_slice %397 {offsets = [0, 0], sizes = [16, 44], strides = [1, 1]} : vector<22x44xf32> to vector<16x44xf32>
    %403 = vector.broadcast %400 : f32 to vector<16x44xf32>
    %404 = arith.mulf %403, %402 : vector<16x44xf32>
    %405 = vector.extract_strided_slice %399 {offsets = [0, 0], sizes = [16, 44], strides = [1, 1]} : vector<22x44xf32> to vector<16x44xf32>
    %406 = vector.broadcast %401 : f32 to vector<16x44xf32>
    %407 = arith.mulf %406, %405 : vector<16x44xf32>
    %408 = arith.addf %404, %407 : vector<16x44xf32>
    %409 = arith.addf %395, %408 : vector<16x44xf32>
    %c12 = arith.constant 12 : index
    %410 = memref.load %arg2[%c12] : memref<98xf32, #tpu.memory_space<smem>>
    %c61 = arith.constant 61 : index
    %411 = memref.load %arg2[%c61] : memref<98xf32, #tpu.memory_space<smem>>
    %412 = vector.extract_strided_slice %397 {offsets = [1, 0], sizes = [16, 44], strides = [1, 1]} : vector<22x44xf32> to vector<16x44xf32>
    %413 = vector.broadcast %410 : f32 to vector<16x44xf32>
    %414 = arith.mulf %413, %412 : vector<16x44xf32>
    %415 = vector.extract_strided_slice %399 {offsets = [1, 0], sizes = [16, 44], strides = [1, 1]} : vector<22x44xf32> to vector<16x44xf32>
    %416 = vector.broadcast %411 : f32 to vector<16x44xf32>
    %417 = arith.mulf %416, %415 : vector<16x44xf32>
    %418 = arith.addf %414, %417 : vector<16x44xf32>
    %419 = arith.addf %409, %418 : vector<16x44xf32>
    %c19 = arith.constant 19 : index
    %420 = memref.load %arg2[%c19] : memref<98xf32, #tpu.memory_space<smem>>
    %c68 = arith.constant 68 : index
    %421 = memref.load %arg2[%c68] : memref<98xf32, #tpu.memory_space<smem>>
    %422 = vector.extract_strided_slice %397 {offsets = [2, 0], sizes = [16, 44], strides = [1, 1]} : vector<22x44xf32> to vector<16x44xf32>
    %423 = vector.broadcast %420 : f32 to vector<16x44xf32>
    %424 = arith.mulf %423, %422 : vector<16x44xf32>
    %425 = vector.extract_strided_slice %399 {offsets = [2, 0], sizes = [16, 44], strides = [1, 1]} : vector<22x44xf32> to vector<16x44xf32>
    %426 = vector.broadcast %421 : f32 to vector<16x44xf32>
    %427 = arith.mulf %426, %425 : vector<16x44xf32>
    %428 = arith.addf %424, %427 : vector<16x44xf32>
    %429 = arith.addf %419, %428 : vector<16x44xf32>
    %c26 = arith.constant 26 : index
    %430 = memref.load %arg2[%c26] : memref<98xf32, #tpu.memory_space<smem>>
    %c75 = arith.constant 75 : index
    %431 = memref.load %arg2[%c75] : memref<98xf32, #tpu.memory_space<smem>>
    %432 = vector.extract_strided_slice %397 {offsets = [3, 0], sizes = [16, 44], strides = [1, 1]} : vector<22x44xf32> to vector<16x44xf32>
    %433 = vector.broadcast %430 : f32 to vector<16x44xf32>
    %434 = arith.mulf %433, %432 : vector<16x44xf32>
    %435 = vector.extract_strided_slice %399 {offsets = [3, 0], sizes = [16, 44], strides = [1, 1]} : vector<22x44xf32> to vector<16x44xf32>
    %436 = vector.broadcast %431 : f32 to vector<16x44xf32>
    %437 = arith.mulf %436, %435 : vector<16x44xf32>
    %438 = arith.addf %434, %437 : vector<16x44xf32>
    %439 = arith.addf %429, %438 : vector<16x44xf32>
    %c33 = arith.constant 33 : index
    %440 = memref.load %arg2[%c33] : memref<98xf32, #tpu.memory_space<smem>>
    %c82 = arith.constant 82 : index
    %441 = memref.load %arg2[%c82] : memref<98xf32, #tpu.memory_space<smem>>
    %442 = vector.extract_strided_slice %397 {offsets = [4, 0], sizes = [16, 44], strides = [1, 1]} : vector<22x44xf32> to vector<16x44xf32>
    %443 = vector.broadcast %440 : f32 to vector<16x44xf32>
    %444 = arith.mulf %443, %442 : vector<16x44xf32>
    %445 = vector.extract_strided_slice %399 {offsets = [4, 0], sizes = [16, 44], strides = [1, 1]} : vector<22x44xf32> to vector<16x44xf32>
    %446 = vector.broadcast %441 : f32 to vector<16x44xf32>
    %447 = arith.mulf %446, %445 : vector<16x44xf32>
    %448 = arith.addf %444, %447 : vector<16x44xf32>
    %449 = arith.addf %439, %448 : vector<16x44xf32>
    %c40 = arith.constant 40 : index
    %450 = memref.load %arg2[%c40] : memref<98xf32, #tpu.memory_space<smem>>
    %c89 = arith.constant 89 : index
    %451 = memref.load %arg2[%c89] : memref<98xf32, #tpu.memory_space<smem>>
    %452 = vector.extract_strided_slice %397 {offsets = [5, 0], sizes = [16, 44], strides = [1, 1]} : vector<22x44xf32> to vector<16x44xf32>
    %453 = vector.broadcast %450 : f32 to vector<16x44xf32>
    %454 = arith.mulf %453, %452 : vector<16x44xf32>
    %455 = vector.extract_strided_slice %399 {offsets = [5, 0], sizes = [16, 44], strides = [1, 1]} : vector<22x44xf32> to vector<16x44xf32>
    %456 = vector.broadcast %451 : f32 to vector<16x44xf32>
    %457 = arith.mulf %456, %455 : vector<16x44xf32>
    %458 = arith.addf %454, %457 : vector<16x44xf32>
    %459 = arith.addf %449, %458 : vector<16x44xf32>
    %c47 = arith.constant 47 : index
    %460 = memref.load %arg2[%c47] : memref<98xf32, #tpu.memory_space<smem>>
    %c96 = arith.constant 96 : index
    %461 = memref.load %arg2[%c96] : memref<98xf32, #tpu.memory_space<smem>>
    %462 = vector.extract_strided_slice %397 {offsets = [6, 0], sizes = [16, 44], strides = [1, 1]} : vector<22x44xf32> to vector<16x44xf32>
    %463 = vector.broadcast %460 : f32 to vector<16x44xf32>
    %464 = arith.mulf %463, %462 : vector<16x44xf32>
    %465 = vector.extract_strided_slice %399 {offsets = [6, 0], sizes = [16, 44], strides = [1, 1]} : vector<22x44xf32> to vector<16x44xf32>
    %466 = vector.broadcast %461 : f32 to vector<16x44xf32>
    %467 = arith.mulf %466, %465 : vector<16x44xf32>
    %468 = arith.addf %464, %467 : vector<16x44xf32>
    %469 = arith.addf %459, %468 : vector<16x44xf32>
    %c0_58 = arith.constant 0 : index
    %c0_59 = arith.constant 0 : index
    %c6 = arith.constant 6 : index
    %470 = vector.load %arg4[%c0_58, %c0_59, %c6] : memref<2x22x50xf32, #tpu.memory_space<vmem>>, vector<1x22x44xf32>
    %471 = vector.shape_cast %470 : vector<1x22x44xf32> to vector<22x44xf32>
    %c1_60 = arith.constant 1 : index
    %c0_61 = arith.constant 0 : index
    %c6_62 = arith.constant 6 : index
    %472 = vector.load %arg4[%c1_60, %c0_61, %c6_62] : memref<2x22x50xf32, #tpu.memory_space<vmem>>, vector<1x22x44xf32>
    %473 = vector.shape_cast %472 : vector<1x22x44xf32> to vector<22x44xf32>
    %c6_63 = arith.constant 6 : index
    %474 = memref.load %arg2[%c6_63] : memref<98xf32, #tpu.memory_space<smem>>
    %c55 = arith.constant 55 : index
    %475 = memref.load %arg2[%c55] : memref<98xf32, #tpu.memory_space<smem>>
    %476 = vector.extract_strided_slice %471 {offsets = [0, 0], sizes = [16, 44], strides = [1, 1]} : vector<22x44xf32> to vector<16x44xf32>
    %477 = vector.broadcast %474 : f32 to vector<16x44xf32>
    %478 = arith.mulf %477, %476 : vector<16x44xf32>
    %479 = vector.extract_strided_slice %473 {offsets = [0, 0], sizes = [16, 44], strides = [1, 1]} : vector<22x44xf32> to vector<16x44xf32>
    %480 = vector.broadcast %475 : f32 to vector<16x44xf32>
    %481 = arith.mulf %480, %479 : vector<16x44xf32>
    %482 = arith.addf %478, %481 : vector<16x44xf32>
    %483 = arith.addf %469, %482 : vector<16x44xf32>
    %c13 = arith.constant 13 : index
    %484 = memref.load %arg2[%c13] : memref<98xf32, #tpu.memory_space<smem>>
    %c62 = arith.constant 62 : index
    %485 = memref.load %arg2[%c62] : memref<98xf32, #tpu.memory_space<smem>>
    %486 = vector.extract_strided_slice %471 {offsets = [1, 0], sizes = [16, 44], strides = [1, 1]} : vector<22x44xf32> to vector<16x44xf32>
    %487 = vector.broadcast %484 : f32 to vector<16x44xf32>
    %488 = arith.mulf %487, %486 : vector<16x44xf32>
    %489 = vector.extract_strided_slice %473 {offsets = [1, 0], sizes = [16, 44], strides = [1, 1]} : vector<22x44xf32> to vector<16x44xf32>
    %490 = vector.broadcast %485 : f32 to vector<16x44xf32>
    %491 = arith.mulf %490, %489 : vector<16x44xf32>
    %492 = arith.addf %488, %491 : vector<16x44xf32>
    %493 = arith.addf %483, %492 : vector<16x44xf32>
    %c20 = arith.constant 20 : index
    %494 = memref.load %arg2[%c20] : memref<98xf32, #tpu.memory_space<smem>>
    %c69 = arith.constant 69 : index
    %495 = memref.load %arg2[%c69] : memref<98xf32, #tpu.memory_space<smem>>
    %496 = vector.extract_strided_slice %471 {offsets = [2, 0], sizes = [16, 44], strides = [1, 1]} : vector<22x44xf32> to vector<16x44xf32>
    %497 = vector.broadcast %494 : f32 to vector<16x44xf32>
    %498 = arith.mulf %497, %496 : vector<16x44xf32>
    %499 = vector.extract_strided_slice %473 {offsets = [2, 0], sizes = [16, 44], strides = [1, 1]} : vector<22x44xf32> to vector<16x44xf32>
    %500 = vector.broadcast %495 : f32 to vector<16x44xf32>
    %501 = arith.mulf %500, %499 : vector<16x44xf32>
    %502 = arith.addf %498, %501 : vector<16x44xf32>
    %503 = arith.addf %493, %502 : vector<16x44xf32>
    %c27 = arith.constant 27 : index
    %504 = memref.load %arg2[%c27] : memref<98xf32, #tpu.memory_space<smem>>
    %c76 = arith.constant 76 : index
    %505 = memref.load %arg2[%c76] : memref<98xf32, #tpu.memory_space<smem>>
    %506 = vector.extract_strided_slice %471 {offsets = [3, 0], sizes = [16, 44], strides = [1, 1]} : vector<22x44xf32> to vector<16x44xf32>
    %507 = vector.broadcast %504 : f32 to vector<16x44xf32>
    %508 = arith.mulf %507, %506 : vector<16x44xf32>
    %509 = vector.extract_strided_slice %473 {offsets = [3, 0], sizes = [16, 44], strides = [1, 1]} : vector<22x44xf32> to vector<16x44xf32>
    %510 = vector.broadcast %505 : f32 to vector<16x44xf32>
    %511 = arith.mulf %510, %509 : vector<16x44xf32>
    %512 = arith.addf %508, %511 : vector<16x44xf32>
    %513 = arith.addf %503, %512 : vector<16x44xf32>
    %c34 = arith.constant 34 : index
    %514 = memref.load %arg2[%c34] : memref<98xf32, #tpu.memory_space<smem>>
    %c83 = arith.constant 83 : index
    %515 = memref.load %arg2[%c83] : memref<98xf32, #tpu.memory_space<smem>>
    %516 = vector.extract_strided_slice %471 {offsets = [4, 0], sizes = [16, 44], strides = [1, 1]} : vector<22x44xf32> to vector<16x44xf32>
    %517 = vector.broadcast %514 : f32 to vector<16x44xf32>
    %518 = arith.mulf %517, %516 : vector<16x44xf32>
    %519 = vector.extract_strided_slice %473 {offsets = [4, 0], sizes = [16, 44], strides = [1, 1]} : vector<22x44xf32> to vector<16x44xf32>
    %520 = vector.broadcast %515 : f32 to vector<16x44xf32>
    %521 = arith.mulf %520, %519 : vector<16x44xf32>
    %522 = arith.addf %518, %521 : vector<16x44xf32>
    %523 = arith.addf %513, %522 : vector<16x44xf32>
    %c41 = arith.constant 41 : index
    %524 = memref.load %arg2[%c41] : memref<98xf32, #tpu.memory_space<smem>>
    %c90 = arith.constant 90 : index
    %525 = memref.load %arg2[%c90] : memref<98xf32, #tpu.memory_space<smem>>
    %526 = vector.extract_strided_slice %471 {offsets = [5, 0], sizes = [16, 44], strides = [1, 1]} : vector<22x44xf32> to vector<16x44xf32>
    %527 = vector.broadcast %524 : f32 to vector<16x44xf32>
    %528 = arith.mulf %527, %526 : vector<16x44xf32>
    %529 = vector.extract_strided_slice %473 {offsets = [5, 0], sizes = [16, 44], strides = [1, 1]} : vector<22x44xf32> to vector<16x44xf32>
    %530 = vector.broadcast %525 : f32 to vector<16x44xf32>
    %531 = arith.mulf %530, %529 : vector<16x44xf32>
    %532 = arith.addf %528, %531 : vector<16x44xf32>
    %533 = arith.addf %523, %532 : vector<16x44xf32>
    %c48 = arith.constant 48 : index
    %534 = memref.load %arg2[%c48] : memref<98xf32, #tpu.memory_space<smem>>
    %c97 = arith.constant 97 : index
    %535 = memref.load %arg2[%c97] : memref<98xf32, #tpu.memory_space<smem>>
    %536 = vector.extract_strided_slice %471 {offsets = [6, 0], sizes = [16, 44], strides = [1, 1]} : vector<22x44xf32> to vector<16x44xf32>
    %537 = vector.broadcast %534 : f32 to vector<16x44xf32>
    %538 = arith.mulf %537, %536 : vector<16x44xf32>
    %539 = vector.extract_strided_slice %473 {offsets = [6, 0], sizes = [16, 44], strides = [1, 1]} : vector<22x44xf32> to vector<16x44xf32>
    %540 = vector.broadcast %535 : f32 to vector<16x44xf32>
    %541 = arith.mulf %540, %539 : vector<16x44xf32>
    %542 = arith.addf %538, %541 : vector<16x44xf32>
    %543 = arith.addf %533, %542 : vector<16x44xf32>
    %544 = arith.negf %543 : vector<16x44xf32>
    %545 = math.exp %544 : vector<16x44xf32>
    %cst_64 = arith.constant 1.000000e+00 : f32
    %546 = vector.broadcast %cst_64 : f32 to vector<16x44xf32>
    %547 = arith.addf %546, %545 : vector<16x44xf32>
    %548 = arith.divf %546, %547 : vector<16x44xf32>
    %c0_65 = arith.constant 0 : index
    %c0_66 = arith.constant 0 : index
    %c0_67 = arith.constant 0 : index
    %549 = vector.load %arg3[%c0_65, %c0_66, %c0_67] : memref<1x16x44xf32, #tpu.memory_space<vmem>>, vector<1x16x44xf32>
    %550 = vector.shape_cast %549 : vector<1x16x44xf32> to vector<16x44xf32>
    %551 = vector.shape_cast %548 : vector<16x44xf32> to vector<1x16x44xf32>
    tpu.vector_store %arg3[%c0_65, %c0_66, %c0_67], %551 {strides = array<i32>} : memref<1x16x44xf32, #tpu.memory_space<vmem>>, vector<1x16x44xf32>,
    return
  }
  func.func @transform_0(%arg0: i32) -> (i32, i32, i32, i32) {
    %c0_i32 = arith.constant 0 : i32
    %c0_i32_0 = arith.constant 0 : i32
    %c0_i32_1 = arith.constant 0 : i32
    %c0_i32_2 = arith.constant 0 : i32
    return %arg0, %c0_i32, %c0_i32_0, %c0_i32_1 : i32, i32, i32, i32
  }
  func.func @transform_1(%arg0: i32) -> i32 {
    %c0_i32 = arith.constant 0 : i32
    %c0_i32_0 = arith.constant 0 : i32
    return %c0_i32 : i32
  }
  func.func @transform_2(%arg0: i32) -> (i32, i32, i32) {
    %c0_i32 = arith.constant 0 : i32
    %c0_i32_0 = arith.constant 0 : i32
    %c0_i32_1 = arith.constant 0 : i32
    return %arg0, %c0_i32, %c0_i32_0 : i32, i32, i32
  }
}

</mosaic_0001>

<bundles_post_ra>
// kernel: tpu_custom_call.1
= control target key start
LH: loop header
LB: loop body
LE: loop exit
PB: predicated region body
PF: predicated region fallthrough
CT: control target
= control target key end

     0   :  { %s3259_s0 = inlined_call_operand.hbm [shape: f32[2,4,16,16], index: 0, kind: input, shape index: {}]   ;;  %s3260_s1 = inlined_call_operand.vmem [shape: f32[98], index: 1, kind: input, shape index: {}]   ;;  %s3261_s2 = inlined_call_operand.hbm [shape: f32[1,16,44], index: 2, kind: output, shape index: {}]  }
   0x1   :  { %3331 = sst [smem:[#allocation106_spill]] %s3261_s2 }
   0x2   :  { %7 = vsyncpa [#allocation4], 0 }
   0x3   :  { %8 = vsyncpa [#allocation6], 0 }
   0x4   :  { %9 = vsyncpa [#allocation5], 0  ;;  %s1721_s9 = smov [#allocation3]   ;;  %s28_s13 = sshll.u32 %s3260_s1, 4  ;;  %s29_s13 = int_to_ptr.vmem [resolvable:$true] %s28_s13 }
   0x5   :  { %s15_s10 = sshll.u32 %s1721_s9, 4  ;;  %s16_s10 = int_to_ptr.vmem [resolvable:$true] %s15_s10 }
   0x6   :  { %s1671_s14 = scalar_lea.vmem %s16_s10, 2048  ;;  %p1676_p1 = scmp.lt.s32.totalorder %s16_s10, %s16_s10 }
   0x7   :  { %p1672_p0 = scmp.ne.s32.totalorder %s16_s10, %s1671_s14  ;;  %p1677_p2 = scmp.lt.s32.totalorder %s1671_s14, %s1671_s14 }
   0x9   :  { %p1678_p3 = por %p1677_p2, %p1676_p1 }
   0xb   :  { %p1679_p4 = pnand %p1678_p3, %p1672_p0 }
   0xd   :  { %1682 = shalt.err (!%p1679_p4)
}
   0xe   :  { %s3262_s15 = smov 128   ;;  %s3263_s16 = smov 8  }
   0xf   :  { %21 = dma.hbm_to_vmem [thread:$0]  %s3259_s0, 2048, %s16_s10, [#allocation4], %s3262_s15, %s3262_s15, %s3263_s16  }
  0x10   :  { %s1683_s19 = scalar_lea.vmem %s29_s13, 16  ;;  %p1688_p6 = scmp.lt.s32.totalorder %s29_s13, %s29_s13 }
  0x11   :  { %p1684_p5 = scmp.ne.s32.totalorder %s29_s13, %s1683_s19  ;;  %p1689_p7 = scmp.lt.s32.totalorder %s1683_s19, %s1683_s19 }
  0x13   :  { %p1690_p8 = por %p1689_p7, %p1688_p6 }
  0x15   :  { %p1691_p9 = pnand %p1690_p8, %p1684_p5 }
  0x17   :  { %1694 = shalt.err (!%p1691_p9)
}
  0x18   :  { %s1724_s1 = smov [#allocation7]  }
  0x19   :  { %31 = dma.vmem_to_smem %s29_s13, 16, %s1724_s1, [#allocation6]  }
  0x1a   :  { %1715 = dma.done.wait [#allocation4], 2048  }
  0x1b   :  { %1716 = vsyncadd [#allocation4], 4294965248 }
  0x1c   :  { %1717 = dma.done.wait [#allocation6], 16  }
  0x1d   :  { %1718 = vsyncadd [#allocation6], 4294967280 }
  0x1e   :  { %38 = sfence }
  0x1f   :  { %v47_v0 = vld [vmem:[#allocation3] sm:$0xff]  ;;  %v49_v1 = vld [vmem:[#allocation3 + $0x10] sm:$0xff]  ;;  %vm63_vm0 = vcmask 130048   ;;  %v48_v8 = vld [vmem:[#allocation3 + $0x8] sm:$0xff]  ;;  %s1725_s0 = smov 3   ;;  %vm39_vm1 = vcmask 408576  }
  0x20   :  { %v51_v2 = vld [vmem:[#allocation3 + $0x20] sm:$0xff]  ;;  %v53_v3 = vld [vmem:[#allocation3 + $0x30] sm:$0xff]  ;;  %v96_v4 = vsel %vm63_vm0, %v47_v0, -inf  ;;  %v97_v5 = vsel %vm63_vm0, %v49_v1, -inf  ;;  %v64_v7 = vsel %vm63_vm0, %v47_v0, 0.0  ;;  %v65_v11 = vsel %vm63_vm0, %v49_v1, 0.0 }
  0x21   :  { %v99_v6 = vsel %vm63_vm0, %v51_v2, -inf  ;;  %v98_v9 = vmax.f32 %v96_v4, %v97_v5  ;;  %v101_v10 = vsel %vm63_vm0, %v53_v3, -inf  ;;  %v67_v12 = vsel %vm63_vm0, %v51_v2, 0.0  ;;  %v50_v13 = vld [vmem:[#allocation3 + $0x18] sm:$0xff]  ;;  %v52_v14 = vld [vmem:[#allocation3 + $0x28] sm:$0xff]  ;;  %v55_v36 = vld [vmem:[#allocation3 + $0x40] sm:$0xff] }
  0x22   :  { %v54_v15 = vld [vmem:[#allocation3 + $0x38] sm:$0xff]  ;;  %v66_v16 = vadd.f32 %v65_v11, %v64_v7  ;;  %v69_v17 = vsel %vm63_vm0, %v53_v3, 0.0  ;;  %v103_v18 = vsel %vm63_vm0, %v48_v8, -inf  ;;  %v104_v19 = vsel %vm63_vm0, %v50_v13, -inf  ;;  %v56_v24 = vld [vmem:[#allocation3 + $0x48] sm:$0xff]  ;;  %v57_v37 = vld [vmem:[#allocation3 + $0x50] sm:$0xff] }
  0x23   :  { %v100_v20 = vmax.f32 %v98_v9, %v99_v6  ;;  %v105_v21 = vmax.f32 %v103_v18, %v104_v19  ;;  %v106_v22 = vsel %vm63_vm0, %v52_v14, -inf  ;;  %v108_v23 = vsel %vm63_vm0, %v54_v15, -inf  ;;  %v58_v25 = vld [vmem:[#allocation3 + $0x58] sm:$0xff]  ;;  %v60_v26 = vld [vmem:[#allocation3 + $0x68] sm:$0xff]  ;;  %v59_v38 = vld [vmem:[#allocation3 + $0x60] sm:$0xff]  ;;  %s1726_s20 = smov 25  }
  0x24   :  { %v68_v27 = vadd.f32 %v67_v12, %v66_v16  ;;  %v71_v28 = vsel %vm63_vm0, %v48_v8, 0.0  ;;  %v72_v29 = vsel %vm63_vm0, %v50_v13, 0.0  ;;  %v74_v30 = vsel %vm63_vm0, %v52_v14, 0.0  ;;  %v62_v31 = vld [vmem:[#allocation3 + $0x78] sm:$0xff]  ;;  %v61_v47 = vld [vmem:[#allocation3 + $0x70] sm:$0xff]  ;;  %s1795_s21 = sld [smem:[#allocation7 + $0x1]] }
  0x25   :  { %v102_v32 = vmax.f32 %v100_v20, %v101_v10  ;;  %v107_v33 = vmax.f32 %v105_v21, %v106_v22  ;;  %v73_v34 = vadd.f32 %v72_v29, %v71_v28  ;;  %v76_v35 = vsel %vm63_vm0, %v54_v15, 0.0  ;;  %s1797_s22 = sld [smem:[#allocation7 + $0x2]] }
  0x26   :  { %v70_v39 = vadd.f32 %v69_v17, %v68_v27  ;;  %v85_v40 = vsel %vm63_vm0, %v56_v24, 0.0  ;;  %v86_v41 = vsel %vm63_vm0, %v58_v25, 0.0  ;;  %v88_v42 = vsel %vm63_vm0, %v60_v26, 0.0  ;;  %s1799_s23 = sld [smem:[#allocation7 + $0x3]] }
  0x27   :  { %137 = vrot.lane.b32.xlu1 %v102_v32, %s1725_s0  ;;  %v109_v43 = vmax.f32 %v107_v33, %v108_v23  ;;  %v75_v44 = vadd.f32 %v74_v30, %v73_v34  ;;  %v87_v45 = vadd.f32 %v86_v41, %v85_v40  ;;  %v90_v46 = vsel %vm63_vm0, %v62_v31, 0.0  ;;  %s1801_s24 = sld [smem:[#allocation7 + $0x4]] }
  0x28   :  { %v92_v48 = vmul.f32 0.25, %v70_v39  ;;  %v78_v49 = vsel %vm63_vm0, %v55_v36, 0.0  ;;  %v79_v50 = vsel %vm63_vm0, %v57_v37, 0.0  ;;  %v81_v51 = vsel %vm63_vm0, %v59_v38, 0.0  ;;  %s1803_s25 = sld [smem:[#allocation7 + $0x32]] }
  0x29   :  { %v77_v52 = vadd.f32 %v76_v35, %v75_v44  ;;  %v89_v53 = vadd.f32 %v88_v42, %v87_v45  ;;  %v80_v54 = vadd.f32 %v79_v50, %v78_v49  ;;  %v83_v55 = vsel %vm63_vm0, %v61_v47, 0.0  ;;  %s1805_s26 = sld [smem:[#allocation7 + $0x33]] }
  0x2a   :  { %126 = vrot.lane.b32.xlu0 %v92_v48, %s1725_s0  ;;  %v117_v56 = vsel %vm63_vm0, %v56_v24, -inf  ;;  %v118_v57 = vsel %vm63_vm0, %v58_v25, -inf  ;;  %v120_v58 = vsel %vm63_vm0, %v60_v26, -inf  ;;  %v122_v63 = vsel %vm63_vm0, %v62_v31, -inf  ;;  %3332 = sst [smem:[#allocation12_spill]] %s1795_s21 }
  0x2b   :  { %139 = vrot.lane.b32.xlu1 %v109_v43, %s1725_s0  ;;  %v93_v59 = vmul.f32 0.25, %v77_v52  ;;  %v91_v60 = vadd.f32 %v90_v46, %v89_v53  ;;  %v82_v61 = vadd.f32 %v81_v51, %v80_v54  ;;  %v119_v62 = vmax.f32 %v117_v56, %v118_v57  ;;  %3333 = sst [smem:[#allocation13_spill]] %s1797_s22 }
  0x2c   :  { %v110_v0 = vsel %vm63_vm0, %v55_v36, -inf  ;;  %v111_v1 = vsel %vm63_vm0, %v57_v37, -inf  ;;  %v113_v2 = vsel %vm63_vm0, %v59_v38, -inf  ;;  %vm42_vm2 = vcmask 406528   ;;  %3334 = sst [smem:[#allocation14_spill]] %s1799_s23 }
  0x2d   :  { %v95_v3 = vmul.f32 0.25, %v91_v60  ;;  %v84_v4 = vadd.f32 %v83_v55, %v82_v61  ;;  %v121_v5 = vmax.f32 %v119_v62, %v120_v58  ;;  %v112_v6 = vmax.f32 %v110_v0, %v111_v1  ;;  %3335 = sst [smem:[#allocation15_spill]] %s1801_s24 }
  0x2e   :  { %128 = vrot.lane.b32.xlu0 %v93_v59, %s1725_s0  ;;  %v115_v10 = vsel %vm63_vm0, %v61_v47, -inf  ;;  %v1727_v11 = vmov 0.0   ;;  %3336 = sst [smem:[#allocation16_spill]] %s1803_s25  ;;  %vm132_vm3 = vcmask 154648   ;;  %vm154_vm4 = vcmask 335048  }
  0x2f   :  { %150 = vrot.lane.b32.xlu1 %v95_v3, %s1726_s20  ;;  %v94_v7 = vmul.f32 0.25, %v84_v4  ;;  %v123_v8 = vmax.f32 %v121_v5, %v122_v63  ;;  %v114_v9 = vmax.f32 %v112_v6, %v113_v2  ;;  %44 = vst.msk [vmem:[#allocation2 + $0x18] sm:$0xff] %vm39_vm1, %v1727_v11  ;;  %45 = vst.msk [vmem:[#allocation2 + $0x20] sm:$0xff] %vm39_vm1, %v1727_v11  ;;  %3337 = sst [smem:[#allocation17_spill]] %s1805_s26  ;;  %vm199_vm5 = vcmask 1046528  }
  0x30   :  { %40 = vst.msk [vmem:[#allocation2] sm:$0xff] %vm39_vm1, %v1727_v11  ;;  %41 = vst.msk [vmem:[#allocation2 + $0x8] sm:$0xff] %vm39_vm1, %v1727_v11  ;;  %s1807_s27 = sld [smem:[#allocation7 + $0x34]]  ;;  %vm225_vm6 = vcmask 1045504   ;;  %vm251_vm7 = vcmask 1044480   ;;  %vm277_vm8 = vcmask 1043456  }
  0x31   :  { %46 = vst.msk [vmem:[#allocation2 + $0x28] sm:$0x3f] %vm42_vm2, %v1727_v11  ;;  %43 = vst.msk [vmem:[#allocation2 + $0x10] sm:$0x3f] %vm42_vm2, %v1727_v11  ;;  %v116_v12 = vmax.f32 %v114_v9, %v115_v10  ;;  %s1809_s28 = sld [smem:[#allocation7 + $0x35]]  ;;  %vm303_vm9 = vcmask 1042432  }
  0x32   :  { %148 = vrot.lane.b32.xlu0 %v94_v7, %s1726_s20  ;;  %s1811_s29 = sld [smem:[#allocation7 + $0x5]]  ;;  %vm329_vm10 = vcmask 1041408   ;;  %vm1515_vm11 = vcmask 359424  }
  0x33   :  { %161 = vrot.lane.b32.xlu1 %v123_v8, %s1726_s20  ;;  %s1813_s30 = sld [smem:[#allocation7 + $0x36]] }
  0x34   :  { %s1815_s3 = sld [smem:[#allocation7 + $0x8]] }
  0x35   :  { %s1817_s4 = sld [smem:[#allocation7 + $0x39]] }
  0x36   :  { %159 = vrot.lane.b32.xlu0 %v116_v12, %s1726_s20  ;;  %3338 = sst [smem:[#allocation18_spill]] %s1807_s27 }
  0x37   :  { %3339 = sst [smem:[#allocation19_spill]] %s1809_s28 }
  0x38   :  { %3340 = sst [smem:[#allocation20_spill]] %s1811_s29 }
  0x39   :  { %3341 = sst [smem:[#allocation21_spill]] %s1813_s30 }
  0x3a   :  { %s1819_s5 = sld [smem:[#allocation7 + $0xf]]  ;;  %v1943_v24 = vstv %s1815_s3 }
  0x3b   :  { %s1821_s6 = sld [smem:[#allocation7 + $0x40]]  ;;  %v1946_v25 = vstv %s1817_s4 }
  0x3c   :  { %s1823_s7 = sld [smem:[#allocation7 + $0x16]] }
  0x3d   :  { %s1825_s8 = sld [smem:[#allocation7 + $0x47]] }
  0x3e   :  { %s1827_s9 = sld [smem:[#allocation7 + $0x1d]] }
  0x3f   :  { %s1829_s10 = sld [smem:[#allocation7 + $0x4e]] }
  0x40   :  { %s1831_s11 = sld [smem:[#allocation7 + $0x24]]  ;;  %v1949_v26 = vstv %s1819_s5 }
  0x41   :  { %s1833_s12 = sld [smem:[#allocation7 + $0x55]]  ;;  %v1954_v27 = vstv %s1821_s6 }
  0x42   :  { %s1835_s13 = sld [smem:[#allocation7 + $0x2b]]  ;;  %v1957_v28 = vstv %s1823_s7 }
  0x43   :  { %s1837_s14 = sld [smem:[#allocation7 + $0x5c]]  ;;  %v1960_v29 = vstv %s1825_s8 }
  0x44   :  { %s1839_s17 = sld [smem:[#allocation7 + $0x9]]  ;;  %v1963_v30 = vstv %s1827_s9 }
  0x45   :  { %s1841_s18 = sld [smem:[#allocation7 + $0x3a]]  ;;  %v1968_v32 = vstv %s1829_s10 }
  0x46   :  { %s1843_s19 = sld [smem:[#allocation7 + $0x10]]  ;;  %v1971_v33 = vstv %s1831_s11 }
  0x47   :  { %s1845_s1 = sld [smem:[#allocation7 + $0x41]]  ;;  %v1974_v34 = vstv %s1833_s12 }
  0x48   :  { %3342 = sst [smem:[#allocation22_spill]] %s1835_s13 }
  0x49   :  { %3343 = sst [smem:[#allocation23_spill]] %s1837_s14 }
  0x4a   :  { %3344 = sst [smem:[#allocation24_spill]] %s1839_s17 }
  0x4b   :  { %3345 = sst [smem:[#allocation25_spill]] %s1841_s18 }
  0x4c   :  { %3346 = sst [smem:[#allocation26_spill]] %s1843_s19 }
  0x4d   :  { %3347 = sst [smem:[#allocation27_spill]] %s1845_s1 }
  0x4e   :  { %s1847_s0 = sld [smem:[#allocation7 + $0x17]] }
  0x4f   :  { %s1849_s20 = sld [smem:[#allocation7 + $0x48]] }
  0x50   :  { %s1851_s15 = sld [smem:[#allocation7 + $0x1e]] }
  0x51   :  { %s1853_s16 = sld [smem:[#allocation7 + $0x4f]] }
  0x52   :  { %s1855_s2 = sld [smem:[#allocation7 + $0x25]] }
  0x53   :  { %s1857_s13 = sld [smem:[#allocation7 + $0x56]] }
  0x54   :  { %3348 = sst [smem:[#allocation28_spill]] %s1847_s0 }
  0x55   :  { %3349 = sst [smem:[#allocation29_spill]] %s1849_s20 }
  0x56   :  { %3350 = sst [smem:[#allocation30_spill]] %s1851_s15 }
  0x57   :  { %3351 = sst [smem:[#allocation31_spill]] %s1853_s16 }
  0x58   :  { %3352 = sst [smem:[#allocation32_spill]] %s1855_s2 }
  0x59   :  { %3353 = sst [smem:[#allocation33_spill]] %s1857_s13 }
  0x5a   :  { %s1859_s14 = sld [smem:[#allocation7 + $0x2c]] }
  0x5b   :  { %s1861_s17 = sld [smem:[#allocation7 + $0x5d]] }
  0x5c   :  { %s1863_s18 = sld [smem:[#allocation7 + $0xa]] }
  0x5d   :  { %s1865_s19 = sld [smem:[#allocation7 + $0x3b]] }
  0x5e   :  { %s1867_s1 = sld [smem:[#allocation7 + $0x11]] }
  0x5f   :  { %s1869_s0 = sld [smem:[#allocation7 + $0x42]] }
  0x60   :  { %3354 = sst [smem:[#allocation34_spill]] %s1859_s14 }
  0x61   :  { %3355 = sst [smem:[#allocation35_spill]] %s1861_s17 }
  0x62   :  { %3356 = sst [smem:[#allocation36_spill]] %s1863_s18 }
  0x63   :  { %3357 = sst [smem:[#allocation37_spill]] %s1865_s19 }
  0x64   :  { %3358 = sst [smem:[#allocation38_spill]] %s1867_s1 }
  0x65   :  { %3359 = sst [smem:[#allocation39_spill]] %s1869_s0 }
  0x66   :  { %s1871_s20 = sld [smem:[#allocation7 + $0x18]] }
  0x67   :  { %s1873_s15 = sld [smem:[#allocation7 + $0x49]] }
  0x68   :  { %s1875_s16 = sld [smem:[#allocation7 + $0x1f]] }
  0x69   :  { %s1877_s2 = sld [smem:[#allocation7 + $0x50]] }
  0x6a   :  { %s1879_s13 = sld [smem:[#allocation7 + $0x26]] }
  0x6b   :  { %s1881_s14 = sld [smem:[#allocation7 + $0x57]] }
  0x6c   :  { %3360 = sst [smem:[#allocation40_spill]] %s1871_s20 }
  0x6d   :  { %3361 = sst [smem:[#allocation41_spill]] %s1873_s15 }
  0x6e   :  { %3362 = sst [smem:[#allocation42_spill]] %s1875_s16 }
  0x6f   :  { %s1883_s17 = sld [smem:[#allocation7 + $0x2d]]  ;;  %v2056_v59 = vstv %s1877_s2 }
  0x70   :  { %3363 = sst [smem:[#allocation43_spill]] %s1879_s13  ;;  %3422 = vst [vmem:[#allocation68_spill] sm:$0xff] %v2056_v59 }
  0x71   :  { %3364 = sst [smem:[#allocation44_spill]] %s1881_s14 }
  0x72   :  { %s1885_s18 = sld [smem:[#allocation7 + $0x5e]] }
  0x73   :  { %s1887_s19 = sld [smem:[#allocation7 + $0xb]] }
  0x74   :  { %s1889_s1 = sld [smem:[#allocation7 + $0x3c]] }
  0x75   :  { %3365 = sst [smem:[#allocation45_spill]] %s1883_s17 }
  0x76   :  { %s1891_s0 = sld [smem:[#allocation7 + $0x12]] }
  0x77   :  { %s1893_s20 = sld [smem:[#allocation7 + $0x43]] }
  0x78   :  { %s1895_s15 = sld [smem:[#allocation7 + $0x19]]  ;;  %v2070_v63 = vstv %s1885_s18 }
  0x79   :  { %3366 = sst [smem:[#allocation46_spill]] %s1887_s19  ;;  %3430 = vst [vmem:[#allocation72_spill] sm:$0xff] %v2070_v63 }
  0x7a   :  { %3367 = sst [smem:[#allocation47_spill]] %s1889_s1 }
  0x7b   :  { %s1897_s16 = sld [smem:[#allocation7 + $0x4a]] }
  0x7c   :  { %s1899_s13 = sld [smem:[#allocation7 + $0x20]]  ;;  %v2079_v2 = vstv %s1891_s0 }
  0x7d   :  { %3368 = sst [smem:[#allocation48_spill]] %s1893_s20  ;;  %3434 = vst [vmem:[#allocation75_spill] sm:$0xff] %v2079_v2 }
  0x7e   :  { %3369 = sst [smem:[#allocation49_spill]] %s1895_s15 }
  0x7f   :  { %s1901_s14 = sld [smem:[#allocation7 + $0x51]] }
  0x80   :  { %s1903_s17 = sld [smem:[#allocation7 + $0x27]] }
  0x81   :  { %3370 = sst [smem:[#allocation50_spill]] %s1897_s16 }
  0x82   :  { %3371 = sst [smem:[#allocation51_spill]] %s1899_s13 }
  0x83   :  { %s1905_s19 = sld [smem:[#allocation7 + $0x58]] }
  0x84   :  { %s1907_s1 = sld [smem:[#allocation7 + $0x2e]] }
  0x85   :  { %3372 = sst [smem:[#allocation52_spill]] %s1901_s14 }
  0x86   :  { %3373 = sst [smem:[#allocation53_spill]] %s1903_s17 }
  0x87   :  { %s1909_s20 = sld [smem:[#allocation7 + $0x5f]] }
  0x88   :  { %s1911_s15 = sld [smem:[#allocation7]] }
  0x89   :  { %3374 = sst [smem:[#allocation54_spill]] %s1905_s19 }
  0x8a   :  { %3375 = sst [smem:[#allocation55_spill]] %s1907_s1 }
  0x8b   :  { %s1913_s16 = sld [smem:[#allocation7 + $0x7]] }
  0x8c   :  { %s1915_s13 = sld [smem:[#allocation7 + $0x38]] }
  0x8d   :  { %s1917_s14 = sld [smem:[#allocation7 + $0xe]] }
  0x8e   :  { %s1919_s17 = sld [smem:[#allocation7 + $0x31]] }
  0x8f   :  { %s1921_s19 = sld [smem:[#allocation7 + $0x3f]] }
  0x90   :  { %s1923_s1 = sld [smem:[#allocation7 + $0x15]] }
  0x91   :  { %3376 = sst [smem:[#allocation56_spill]] %s1913_s16 }
  0x92   :  { %s1926_s16 = sld [smem:[#allocation7 + $0x46]] }
  0x93   :  { %3377 = sst [smem:[#allocation57_spill]] %s1917_s14 }
  0x94   :  { %s1932_s14 = sld [smem:[#allocation7 + $0x1c]] }
  0x95   :  { %s1938_s21 = sld [smem:[#allocation7 + $0x4d]]  ;;  %v2122_v23 = vstv %s1921_s19 }
  0x96   :  { %s3378_s25 = sld [smem:[#allocation22_spill]]  ;;  %3452 = vst [vmem:[#allocation88_spill] sm:$0xff] %v2122_v23 }
  0x97   :  { %s3379_s26 = sld [smem:[#allocation23_spill]] }
  0x98   :  { %s3380_s27 = sld [smem:[#allocation24_spill]]  ;;  %v2128_v19 = vstv %s1926_s16 }
  0x99   :  { %v138_v18 = vpop.permute.xlu1 %137  ;;  %s1951_s24 = sld [smem:[#allocation7 + $0x23]]  ;;  %3454 = vst [vmem:[#allocation90_spill] sm:$0xff] %v2128_v19 }
  0x9a   :  { %144 = vst.msk [vmem:[#allocation2 + $0x1b] sm:$0xff] %vm132_vm3, %v138_v18  ;;  %s3381_s28 = sld [smem:[#allocation25_spill]]  ;;  %v2108_v18 = vstv %s1909_s20 }
  0x9b   :  { %s3382_s29 = sld [smem:[#allocation26_spill]]  ;;  %3445 = vst [vmem:[#allocation84_spill] sm:$0xff] %v2108_v18  ;;  %v2134_v16 = vstv %s1938_s21 }
  0x9c   :  { %s3383_s3 = sld [smem:[#allocation27_spill]]  ;;  %v127_v31 = vpop.permute.xlu0 %126  ;;  %v1977_v35 = vstv %s3378_s25  ;;  %3456 = vst [vmem:[#allocation92_spill] sm:$0xff] %v2134_v16 }
  0x9d   :  { %s1965_s30 = sld [smem:[#allocation7 + $0x54]]  ;;  %133 = vst.msk [vmem:[#allocation2 + $0x3] sm:$0xff] %vm132_vm3, %v127_v31  ;;  %v140_v36 = vpop.permute.xlu1 %139  ;;  %v1983_v37 = vstv %s3379_s26  ;;  %v2131_v31 = vstv %s1932_s14 }
  0x9e   :  { %s3385_s4 = sld [smem:[#allocation28_spill]]  ;;  %v1986_v38 = vstv %s3380_s27  ;;  %145 = vst.msk [vmem:[#allocation2 + $0x23] sm:$0xff] %vm132_vm3, %v140_v36  ;;  %3455 = vst [vmem:[#allocation91_spill] sm:$0xff] %v2131_v31 }
  0x9f   :  { %s3386_s5 = sld [smem:[#allocation29_spill]]  ;;  %v2137_v14 = vstv %s1951_s24 }
  0xa0   :  { %s3387_s23 = sld [smem:[#allocation30_spill]]  ;;  %v1989_v39 = vstv %s3381_s28  ;;  %v129_v49 = vpop.permute.xlu0 %128  ;;  %3457 = vst [vmem:[#allocation93_spill] sm:$0xff] %v2137_v14 }
  0xa1   :  { %s3388_s6 = sld [smem:[#allocation31_spill]]  ;;  %v1992_v40 = vstv %s3382_s29  ;;  %134 = vst.msk [vmem:[#allocation2 + $0xb] sm:$0xff] %vm132_vm3, %v129_v49  ;;  %v151_v54 = vpop.permute.xlu1 %150  ;;  %v2115_v49 = vstv %s1915_s13 }
  0xa2   :  { %s3389_s7 = sld [smem:[#allocation32_spill]]  ;;  %v1998_v41 = vstv %s3383_s3  ;;  %156 = vst.msk [vmem:[#allocation2 + $0xb] sm:$0xff] %vm154_vm4, %v151_v54  ;;  %3448 = vst [vmem:[#allocation86_spill] sm:$0xff] %v2115_v49 }
  0xa3   :  { %3384 = sst [smem:[#allocation22_spill]] %s1965_s30 }
  0xa4   :  { %s1979_s8 = sld [smem:[#allocation7 + $0x2a]]  ;;  %v2001_v42 = vstv %s3385_s4  ;;  %v149_v3 = vpop.permute.xlu0 %148 }
  0xa5   :  { %s3391_s9 = sld [smem:[#allocation33_spill]]  ;;  %v2004_v43 = vstv %s3386_s5  ;;  %155 = vst.msk [vmem:[#allocation2 + $0x3] sm:$0xff] %vm154_vm4, %v149_v3  ;;  %v162_v8 = vpop.permute.xlu1 %161 }
  0xa6   :  { %s3392_s22 = sld [smem:[#allocation34_spill]]  ;;  %v2007_v44 = vstv %s3387_s23  ;;  %166 = vst.msk [vmem:[#allocation2 + $0x23] sm:$0xff] %vm154_vm4, %v162_v8  ;;  %v2125_v8 = vstv %s1923_s1 }
  0xa7   :  { %s3393_s10 = sld [smem:[#allocation35_spill]]  ;;  %v2012_v45 = vstv %s3388_s6  ;;  %3453 = vst [vmem:[#allocation89_spill] sm:$0xff] %v2125_v8 }
  0xa8   :  { %s3394_s11 = sld [smem:[#allocation36_spill]]  ;;  %v2015_v46 = vstv %s3389_s7  ;;  %v160_v21 = vpop.permute.xlu0 %159 }
  0xa9   :  { %s3395_s25 = sld [smem:[#allocation37_spill]]  ;;  %v2139_v22 = vld [vmem:[#allocation2 + $0x10] sm:$0x3f]  ;;  %165 = vst.msk [vmem:[#allocation2 + $0x1b] sm:$0xff] %vm154_vm4, %v160_v21 }
  0xaa   :  { %3390 = sst [smem:[#allocation23_spill]] %s1979_s8  ;;  %3458 = vst [vmem:[#allocation94_spill] sm:$0xff] %v2139_v22  ;;  %v364_v14 = vmul.f32 %v1943_v24, %v2139_v22  ;;  %v2170_v21 = vmul.f32 %v1949_v26, %v2139_v22  ;;  %v2208_v23 = vmul.f32 %v2007_v44, %v2139_v22  ;;  %v2212_v49 = vmul.f32 %v2015_v46, %v2139_v22 }
  0xab   :  { %s1994_s12 = sld [smem:[#allocation7 + $0x5b]]  ;;  %v2018_v47 = vstv %s3391_s9 }
  0xac   :  { %s3396_s8 = sld [smem:[#allocation38_spill]]  ;;  %3401 = vst [vmem:[#allocation58_spill] sm:$0xff] %v2018_v47  ;;  %v2021_v48 = vstv %s3392_s22  ;;  %3472 = vst [vmem:[#allocation103_spill] sm:$0xff] %v2208_v23 }
  0xad   :  { %s3397_s26 = sld [smem:[#allocation39_spill]]  ;;  %3402 = vst [vmem:[#allocation59_spill] sm:$0xff] %v2021_v48  ;;  %v2026_v50 = vstv %s3393_s10  ;;  %v2200_v19 = vld [vmem:[#allocation2 + $0x28] sm:$0x3f]  ;;  %3473 = vst [vmem:[#allocation104_spill] sm:$0xff] %v2212_v49 }
  0xae   :  { %s3398_s27 = sld [smem:[#allocation40_spill]]  ;;  %3406 = vst [vmem:[#allocation60_spill] sm:$0xff] %v2026_v50  ;;  %v2029_v51 = vstv %s3394_s11 }
  0xaf   :  { %s2009_s28 = sld [smem:[#allocation7 + $0xc]]  ;;  %3408 = vst [vmem:[#allocation61_spill] sm:$0xff] %v2029_v51  ;;  %v2032_v52 = vstv %s3395_s25 }
  0xb0   :  { %s3399_s29 = sld [smem:[#allocation41_spill]]  ;;  %3409 = vst [vmem:[#allocation62_spill] sm:$0xff] %v2032_v52 }
  0xb1   :  { %s3400_s30 = sld [smem:[#allocation42_spill]]  ;;  %v2149_v17 = vstv %s1994_s12 }
  0xb2   :  { %s2023_s3 = sld [smem:[#allocation7 + $0x3d]]  ;;  %v2035_v53 = vstv %s3396_s8  ;;  %3461 = vst [vmem:[#allocation97_spill] sm:$0xff] %v2149_v17  ;;  %v2194_v17 = vmul.f32 %v1986_v38, %v2139_v22 }
  0xb3   :  { %s3404_s4 = sld [smem:[#allocation43_spill]]  ;;  %3410 = vst [vmem:[#allocation63_spill] sm:$0xff] %v2035_v53  ;;  %v2041_v55 = vstv %s3397_s26 }
  0xb4   :  { %s3405_s23 = sld [smem:[#allocation44_spill]]  ;;  %3414 = vst [vmem:[#allocation64_spill] sm:$0xff] %v2041_v55  ;;  %v2044_v56 = vstv %s3398_s27 }
  0xb5   :  { %s3407_s5 = sld [smem:[#allocation45_spill]]  ;;  %3416 = vst [vmem:[#allocation65_spill] sm:$0xff] %v2044_v56  ;;  %v2152_v15 = vstv %s2009_s28 }
  0xb6   :  { %s3411_s6 = sld [smem:[#allocation46_spill]]  ;;  %v2047_v57 = vstv %s3399_s29  ;;  %3462 = vst [vmem:[#allocation98_spill] sm:$0xff] %v2152_v15  ;;  %v2174_v15 = vmul.f32 %v1957_v28, %v2139_v22 }
  0xb7   :  { %s2037_s7 = sld [smem:[#allocation7 + $0x13]]  ;;  %3418 = vst [vmem:[#allocation66_spill] sm:$0xff] %v2047_v57  ;;  %v2050_v58 = vstv %s3400_s30 }
  0xb8   :  { %3403 = sst [smem:[#allocation24_spill]] %s2023_s3  ;;  %3420 = vst [vmem:[#allocation67_spill] sm:$0xff] %v2050_v58 }
  0xb9   :  { %s3413_s22 = sld [smem:[#allocation47_spill]]  ;;  %v2059_v60 = vstv %s3404_s4 }
  0xba   :  { %s3415_s9 = sld [smem:[#allocation48_spill]]  ;;  %3424 = vst [vmem:[#allocation69_spill] sm:$0xff] %v2059_v60  ;;  %v2062_v61 = vstv %s3405_s23 }
  0xbb   :  { %s3417_s10 = sld [smem:[#allocation49_spill]]  ;;  %3426 = vst [vmem:[#allocation70_spill] sm:$0xff] %v2062_v61  ;;  %v2065_v62 = vstv %s3407_s5  ;;  %v2244_v61 = vld [vmem:[#allocation2 + $0x18] sm:$0xff] }
  0xbc   :  { %s3419_s11 = sld [smem:[#allocation50_spill]]  ;;  %3428 = vst [vmem:[#allocation71_spill] sm:$0xff] %v2065_v62  ;;  %v2073_v0 = vstv %s3411_s6  ;;  %s1728_s6 = smov 127  }
  0xbd   :  { %3412 = sst [smem:[#allocation25_spill]] %s2037_s7  ;;  %3431 = vst [vmem:[#allocation73_spill] sm:$0xff] %v2073_v0 }
  0xbe   :  { %s3421_s8 = sld [smem:[#allocation51_spill]] }
  0xbf   :  { %s2052_s25 = sld [smem:[#allocation7 + $0x44]]  ;;  %v2076_v1 = vstv %s3413_s22  ;;  %s1730_s22 = smov 125  }
  0xc0   :  { %s3423_s7 = sld [smem:[#allocation52_spill]]  ;;  %3432 = vst [vmem:[#allocation74_spill] sm:$0xff] %v2076_v1  ;;  %v2082_v4 = vstv %s3415_s9  ;;  %s1731_s9 = smov 124  }
  0xc1   :  { %s3425_s26 = sld [smem:[#allocation53_spill]]  ;;  %3435 = vst [vmem:[#allocation76_spill] sm:$0xff] %v2082_v4  ;;  %v2085_v5 = vstv %s3417_s10 }
  0xc2   :  { %s3427_s27 = sld [smem:[#allocation54_spill]]  ;;  %3437 = vst [vmem:[#allocation77_spill] sm:$0xff] %v2085_v5  ;;  %v2088_v6 = vstv %s3419_s11 }
  0xc3   :  { %s3429_s29 = sld [smem:[#allocation55_spill]]  ;;  %3438 = vst [vmem:[#allocation78_spill] sm:$0xff] %v2088_v6 }
  0xc4   :  { %s2067_s3 = sld [smem:[#allocation7 + $0x1a]]  ;;  %v2091_v7 = vstv %s3421_s8  ;;  %s1732_s8 = smov 123  }
  0xc5   :  { %s3433_s2 = sld [smem:[#allocation56_spill]]  ;;  %3439 = vst [vmem:[#allocation79_spill] sm:$0xff] %v2091_v7  ;;  %v2161_v31 = vstv %s2052_s25 }
  0xc6   :  { %s3436_s30 = sld [smem:[#allocation57_spill]]  ;;  %v2095_v9 = vstv %s3423_s7  ;;  %3465 = vst [vmem:[#allocation101_spill] sm:$0xff] %v2161_v31  ;;  %v2182_v31 = vld [vmem:[#allocation2 + $0x8] sm:$0xff]  ;;  %s1729_s7 = smov 126  }
  0xc7   :  { %3440 = vst [vmem:[#allocation80_spill] sm:$0xff] %v2095_v9  ;;  %v2098_v10 = vstv %s3425_s26  ;;  %s3444_s18 = sld [smem:[#allocation22_spill]] }
  0xc8   :  { %3441 = vst [vmem:[#allocation81_spill] sm:$0xff] %v2098_v10  ;;  %v2101_v11 = vstv %s3427_s27  ;;  %s3446_s0 = sld [smem:[#allocation23_spill]] }
  0xc9   :  { %3442 = vst [vmem:[#allocation82_spill] sm:$0xff] %v2101_v11  ;;  %v2104_v12 = vstv %s3429_s29  ;;  %s3449_s4 = sld [smem:[#allocation24_spill]] }
  0xca   :  { %3443 = vst [vmem:[#allocation83_spill] sm:$0xff] %v2104_v12  ;;  %s3450_s23 = sld [smem:[#allocation25_spill]]  ;;  %v2164_v16 = vstv %s2067_s3 }
  0xcb   :  { %v2112_v36 = vstv %s3433_s2  ;;  %3466 = vst [vmem:[#allocation102_spill] sm:$0xff] %v2164_v16  ;;  %s3467_s16 = sld [smem:[#allocation12_spill]]  ;;  %v2180_v16 = vld [vmem:[#allocation2] sm:$0xff] }
  0xcc   :  { %3447 = vst [vmem:[#allocation85_spill] sm:$0xff] %v2112_v36  ;;  %v2119_v3 = vstv %s3436_s30  ;;  %s3468_s21 = sld [smem:[#allocation13_spill]]  ;;  %v2216_v36 = vmul.f32 %v2021_v48, %v2139_v22  ;;  %v362_v49 = vmul.f32 %v1943_v24, %v2180_v16  ;;  %v397_v48 = vmul.f32 %v1954_v27, %v2200_v19 }
  0xcd   :  { %3451 = vst [vmem:[#allocation87_spill] sm:$0xff] %v2119_v3  ;;  %v2143_v54 = vstv %s3444_s18  ;;  %s3469_s24 = sld [smem:[#allocation14_spill]]  ;;  %v2204_v3 = vmul.f32 %v2001_v42, %v2139_v22 }
  0xce   :  { %3459 = vst [vmem:[#allocation95_spill] sm:$0xff] %v2143_v54  ;;  %v2146_v20 = vstv %s3446_s0  ;;  %s3470_s13 = sld [smem:[#allocation15_spill]]  ;;  %v2198_v54 = vmul.f32 %v1992_v40, %v2139_v22  ;;  %3474 = vst [vmem:[#allocation105_spill] sm:$0xff] %v2216_v36 }
  0xcf   :  { %3460 = vst [vmem:[#allocation96_spill] sm:$0xff] %v2146_v20  ;;  %v2155_v13 = vstv %s3449_s4  ;;  %v2190_v20 = vmul.f32 %v1977_v35, %v2139_v22  ;;  %s3471_s14 = sld [smem:[#allocation20_spill]] }
  0xd0   :  { %3463 = vst [vmem:[#allocation99_spill] sm:$0xff] %v2155_v13  ;;  %v2158_v8 = vstv %s3450_s23  ;;  %v2186_v13 = vmul.f32 %v1971_v33, %v2139_v22  ;;  %s2218_s19 = sld [smem:[#allocation7 + $0x21]] }
  0xd1   :  { %3464 = vst [vmem:[#allocation100_spill] sm:$0xff] %v2158_v8  ;;  %v2178_v8 = vmul.f32 %v1963_v30, %v2139_v22  ;;  %v3475_v18 = vstv %s3467_s16  ;;  %s3476_s1 = sld [smem:[#allocation16_spill]] }
  0xd2   :  { %v343_v12 = vmul.f32 %v3475_v18, %v2182_v31  ;;  %v3477_v11 = vmov %v3475_v18  ;;  %v3478_v9 = vstv %s3468_s21  ;;  %s3479_s20 = sld [smem:[#allocation17_spill]] }
  0xd3   :  { %v342_v10 = vmul.f32 %v3477_v11, %v2180_v16  ;;  %v537_v7 = vmul.f32 %v3478_v9, %v2182_v31  ;;  %v3480_v5 = vmov %v3478_v9  ;;  %v3481_v4 = vstv %s3469_s24  ;;  %s3483_s12 = sld [smem:[#allocation18_spill]]  ;;  %v2246_v9 = vld [vmem:[#allocation2 + $0x20] sm:$0xff]  ;;  %s1733_s24 = smov 122  }
  0xd4   :  { %v536_v6 = vmul.f32 %v3480_v5, %v2180_v16  ;;  %v731_v2 = vmul.f32 %v3481_v4, %v2182_v31  ;;  %v3482_v1 = vmov %v3481_v4  ;;  %v3484_v18 = vstv %s3470_s13  ;;  %s3488_s28 = sld [smem:[#allocation19_spill]] }
  0xd5   :  { %v730_v0 = vmul.f32 %v3482_v1, %v2180_v16  ;;  %v925_v63 = vmul.f32 %v3484_v18, %v2182_v31  ;;  %v3485_v11 = vmov %v3484_v18  ;;  %v3486_v5 = vstv %s3471_s14  ;;  %s2258_s3 = sld [smem:[#allocation7 + $0x4b]] }
  0xd6   :  { %v924_v62 = vmul.f32 %v3485_v11, %v2180_v16  ;;  %v1119_v60 = vmul.f32 %v3486_v5, %v2182_v31  ;;  %v3487_v4 = vmov %v3486_v5  ;;  %v363_v1 = vmul.f32 %v1943_v24, %v2182_v31  ;;  %s3495_s5 = sld [smem:[#allocation21_spill]] }
  0xd7   :  { %v1118_v59 = vmul.f32 %v3487_v4, %v2180_v16  ;;  %v368_v18 = vmul.f32 %v1946_v25, %v2200_v19  ;;  %v3489_v11 = vstv %s3476_s1  ;;  %v391_v24 = vmul.f32 %v1949_v26, %v2180_v16  ;;  %s2359_s10 = sld [smem:[#allocation7 + $0x52]]  ;;  %s1734_s1 = smov [#allocation8]  }
  0xd8   :  { %v346_v58 = vmul.f32 %v3489_v11, %v2246_v9  ;;  %v3490_v57 = vmov %v3489_v11  ;;  %v3491_v5 = vstv %s3479_s20  ;;  %s2371_s11 = sld [smem:[#allocation7 + $0x28]]  ;;  %s1523_s20 = sshll.u32 %s1734_s1, 4  ;;  %s1524_s20 = int_to_ptr.vmem [resolvable:$true] %s1523_s20 }
  0xd9   :  { %v345_v56 = vmul.f32 %v3490_v57, %v2244_v61  ;;  %v540_v53 = vmul.f32 %v3491_v5, %v2246_v9  ;;  %v3492_v4 = vmov %v3491_v5  ;;  %v3493_v22 = vstv %s3483_s12  ;;  %s2406_s25 = sld [smem:[#allocation7 + $0x59]]  ;;  %s1695_s12 = scalar_lea.vmem %s1524_s20, 256 }
  0xda   :  { %v539_v55 = vmul.f32 %v3492_v4, %v2244_v61  ;;  %v734_v52 = vmul.f32 %v3493_v22, %v2246_v9  ;;  %v3494_v51 = vmov %v3493_v22  ;;  %v392_v57 = vmul.f32 %v1949_v26, %v2182_v31  ;;  %s2424_s26 = sld [smem:[#allocation7 + $0x2f]]  ;;  %p1696_p10 = scmp.ne.s32.totalorder %s1524_s20, %s1695_s12 }
  0xdb   :  { %v733_v36 = vmul.f32 %v3494_v51, %v2244_v61  ;;  %v348_v11 = vadd.f32 %v346_v58, %v343_v12  ;;  %v347_v5 = vadd.f32 %v345_v56, %v342_v10  ;;  %v3496_v50 = vstv %s3488_s28  ;;  %s2468_s27 = sld [smem:[#allocation7 + $0x60]]  ;;  %p1700_p11 = scmp.lt.s32.totalorder %s1524_s20, %s1524_s20 }
  0xdc   :  { %v928_v4 = vmul.f32 %v3496_v50, %v2246_v9  ;;  %v542_v22 = vadd.f32 %v540_v53, %v537_v7  ;;  %v541_v23 = vadd.f32 %v539_v55, %v536_v6  ;;  %v3497_v51 = vmov %v3496_v50  ;;  %s2481_s29 = sld [smem:[#allocation7 + $0x6]]  ;;  %p1701_p12 = scmp.lt.s32.totalorder %s1695_s12, %s1695_s12 }
  0xdd   :  { %v927_v47 = vmul.f32 %v3497_v51, %v2244_v61  ;;  %353 = vrot.lane.b32.xlu1 %v348_v11, %s1728_s6  ;;  %351 = vrot.lane.b32.xlu0 %v347_v5, %s1728_s6  ;;  %v736_v56 = vadd.f32 %v734_v52, %v731_v2  ;;  %v735_v58 = vadd.f32 %v733_v36, %v730_v0  ;;  %v2297_v53 = vstv %s2218_s19  ;;  %s2507_s2 = sld [smem:[#allocation7 + $0x37]] }
  0xde   :  { %v367_v50 = vmul.f32 %v1946_v25, %v2246_v9  ;;  %v3498_v55 = vstv %s3495_s5  ;;  %v371_v7 = vadd.f32 %v368_v18, %v364_v14  ;;  %v366_v26 = vmul.f32 %v1946_v25, %v2244_v61  ;;  %s2598_s30 = sld [smem:[#allocation7 + $0xd]]  ;;  %p1702_p13 = por %p1701_p12, %p1700_p11 }
  0xdf   :  { %v1122_v6 = vmul.f32 %v3498_v55, %v2246_v9  ;;  %v396_v10 = vmul.f32 %v1954_v27, %v2246_v9  ;;  %v930_v12 = vadd.f32 %v928_v4, %v925_v63  ;;  %v3499_v52 = vmov %v3498_v55  ;;  %s2635_s18 = sld [smem:[#allocation7 + $0x3e]] }
  0xe0   :  { %v1121_v0 = vmul.f32 %v3499_v52, %v2244_v61  ;;  %v370_v2 = vadd.f32 %v367_v50, %v363_v1  ;;  %v395_v36 = vmul.f32 %v1954_v27, %v2244_v61  ;;  %v929_v11 = vadd.f32 %v927_v47, %v924_v62  ;;  %s2655_s0 = sld [smem:[#allocation7 + $0x14]]  ;;  %p1703_p0 = pnand %p1702_p13, %p1696_p10 }
  0xe1   :  { %v369_v5 = vadd.f32 %v366_v26, %v362_v49  ;;  %v400_v51 = vadd.f32 %v397_v48, %v2170_v21  ;;  %v2313_v14 = vstv %s2258_s3  ;;  %547 = vrot.lane.b32.xlu1 %v542_v22, %s1729_s7  ;;  %545 = vrot.lane.b32.xlu0 %v541_v23, %s1729_s7  ;;  %v399_v63 = vadd.f32 %v396_v10, %v392_v57  ;;  %s2704_s4 = sld [smem:[#allocation7 + $0x45]] }
  0xe2   :  { %v376_v25 = vrot.slane %v370_v2, 1  ;;  %v421_v1 = vmul.f32 %v1957_v28, %v2182_v31  ;;  %v425_v27 = vmul.f32 %v1960_v29, %v2246_v9  ;;  %v1124_v47 = vadd.f32 %v1122_v6, %v1119_v60  ;;  %s2923_s23 = sld [smem:[#allocation7 + $0x1b]] }
  0xe3   :  { %v378_v62 = vrot.slane %v371_v7, 1  ;;  %v398_v49 = vadd.f32 %v395_v36, %v391_v24  ;;  %v426_v48 = vmul.f32 %v1960_v29, %v2200_v19  ;;  %v1123_v21 = vadd.f32 %v1121_v0, %v1118_v59  ;;  %s3134_s16 = sld [smem:[#allocation7 + $0x53]] }
  0xe4   :  { %v428_v18 = vadd.f32 %v425_v27, %v421_v1  ;;  %v420_v4 = vmul.f32 %v1957_v28, %v2180_v16  ;;  %v424_v23 = vmul.f32 %v1960_v29, %v2244_v61  ;;  %v375_v22 = vrot.slane %v369_v5, 1  ;;  %s3173_s21 = sld [smem:[#allocation7 + $0x29]] }
  0xe5   :  { %v2328_v57 = vsel %vm199_vm5, %v376_v25, %v378_v62  ;;  %v407_v50 = vrot.slane %v400_v51, 2  ;;  %v429_v60 = vadd.f32 %v426_v48, %v2174_v15  ;;  %741 = vrot.lane.b32.xlu1 %v736_v56, %s1730_s22  ;;  %739 = vrot.lane.b32.xlu0 %v735_v58, %s1730_s22  ;;  %v405_v59 = vrot.slane %v399_v63, 2  ;;  %s3188_s13 = sld [smem:[#allocation7 + $0x5a]] }
  0xe6   :  { %v427_v24 = vadd.f32 %v424_v23, %v420_v4  ;;  %v450_v28 = vmul.f32 %v1963_v30, %v2182_v31  ;;  %v454_v29 = vmul.f32 %v1968_v32, %v2246_v9  ;;  %v404_v55 = vrot.slane %v398_v49, 2  ;;  %s3194_s14 = sld [smem:[#allocation7 + $0x30]] }
  0xe7   :  { %v455_v6 = vmul.f32 %v1968_v32, %v2200_v19  ;;  %v449_v15 = vmul.f32 %v1963_v30, %v2180_v16  ;;  %v453_v56 = vmul.f32 %v1968_v32, %v2244_v61  ;;  %v434_v7 = vrot.slane %v428_v18, 3  ;;  %s3209_s19 = sld [smem:[#allocation7 + $0x61]] }
  0xe8   :  { %v457_v58 = vadd.f32 %v454_v29, %v450_v28  ;;  %v479_v26 = vmul.f32 %v1971_v33, %v2182_v31  ;;  %v483_v10 = vmul.f32 %v1974_v34, %v2246_v9  ;;  %v377_v52 = vsel %vm199_vm5, %v375_v22, %v376_v25 }
  0xe9   :  { %v433_v0 = vrot.slane %v427_v24, 3  ;;  %v458_v2 = vadd.f32 %v455_v6, %v2178_v8  ;;  %v456_v36 = vadd.f32 %v453_v56, %v449_v15  ;;  %935 = vrot.lane.b32.xlu1 %v930_v12, %s1731_s9  ;;  %933 = vrot.lane.b32.xlu0 %v929_v11, %s1731_s9  ;;  %v408_v30 = vsel %vm225_vm6, %v405_v59, %v407_v50 }
  0xea   :  { %v436_v32 = vrot.slane %v429_v60, 3  ;;  %v484_v5 = vmul.f32 %v1974_v34, %v2200_v19  ;;  %v486_v51 = vadd.f32 %v483_v10, %v479_v26  ;;  %v406_v25 = vsel %vm225_vm6, %v404_v55, %v405_v59 }
  0xeb   :  { %v463_v63 = vrot.slane %v457_v58, 4  ;;  %v478_v8 = vmul.f32 %v1971_v33, %v2180_v16  ;;  %v482_v1 = vmul.f32 %v1974_v34, %v2244_v61  ;;  %v508_v11 = vmul.f32 %v1977_v35, %v2182_v31 }
  0xec   :  { %v2362_v12 = vsel %vm251_vm7, %v434_v7, %v436_v32  ;;  %v512_v27 = vmul.f32 %v1983_v37, %v2246_v9  ;;  %v513_v62 = vmul.f32 %v1983_v37, %v2200_v19  ;;  %v435_v49 = vsel %vm251_vm7, %v433_v0, %v434_v7 }
  0xed   :  { %v465_v33 = vrot.slane %v458_v2, 4  ;;  %v462_v48 = vrot.slane %v456_v36, 4  ;;  %v485_v18 = vadd.f32 %v482_v1, %v478_v8  ;;  %1129 = vrot.lane.b32.xlu1 %v1124_v47, %s1732_s8  ;;  %1127 = vrot.lane.b32.xlu0 %v1123_v21, %s1732_s8  ;;  %v487_v34 = vadd.f32 %v484_v5, %v2186_v13 }
  0xee   :  { %v492_v4 = vrot.slane %v486_v51, 5  ;;  %v515_v23 = vadd.f32 %v512_v27, %v508_v11  ;;  %v516_v22 = vadd.f32 %v513_v62, %v2190_v20  ;;  %v507_v59 = vmul.f32 %v1977_v35, %v2180_v16 }
  0xef   :  { %v2378_v50 = vsel %vm277_vm8, %v463_v63, %v465_v33  ;;  %v491_v60 = vrot.slane %v485_v18, 5  ;;  %v511_v24 = vmul.f32 %v1983_v37, %v2244_v61  ;;  %v557_v47 = vmul.f32 %v1986_v38, %v2182_v31 }
  0xf0   :  { %v521_v28 = vrot.slane %v515_v23, 6  ;;  %v561_v13 = vmul.f32 %v1989_v39, %v2246_v9  ;;  %v562_v20 = vmul.f32 %v1989_v39, %v2200_v19  ;;  %v464_v21 = vsel %vm277_vm8, %v462_v48, %v463_v63 }
  0xf1   :  { %v514_v29 = vadd.f32 %v511_v24, %v507_v59  ;;  %v556_v35 = vmul.f32 %v1986_v38, %v2180_v16  ;;  %v560_v37 = vmul.f32 %v1989_v39, %v2244_v61  ;;  %382 = vrot.lane.b32.xlu1 %v2328_v57, %s1728_s6  ;;  %380 = vrot.lane.b32.xlu0 %v377_v52, %s1728_s6  ;;  %v494_v55 = vrot.slane %v487_v34, 5 }
  0xf2   :  { %v523_v6 = vrot.slane %v516_v22, 6  ;;  %v564_v15 = vadd.f32 %v561_v13, %v557_v47  ;;  %v565_v56 = vadd.f32 %v562_v20, %v2194_v17  ;;  %v586_v58 = vmul.f32 %v1992_v40, %v2182_v31  ;;  %v3500_v47 = vld [vmem:[#allocation58_spill] sm:$0xff] }
  0xf3   :  { %v563_v7 = vadd.f32 %v560_v37, %v556_v35  ;;  %v590_v38 = vmul.f32 %v1998_v41, %v2246_v9  ;;  %v2404_v26 = vstv %s2359_s10  ;;  %v2409_v39 = vsel %vm303_vm9, %v492_v4, %v494_v55  ;;  %v3501_v35 = vld [vmem:[#allocation103_spill] sm:$0xff] }
  0xf4   :  { %v2412_v57 = vsel %vm303_vm9, %v491_v60, %v492_v4  ;;  %v2415_v10 = vsel %vm329_vm10, %v521_v28, %v523_v6  ;;  %v591_v17 = vmul.f32 %v1998_v41, %v2200_v19  ;;  %v520_v52 = vrot.slane %v514_v29, 6 }
  0xf5   :  { %v593_v0 = vadd.f32 %v590_v38, %v586_v58  ;;  %v589_v2 = vmul.f32 %v1998_v41, %v2244_v61  ;;  %v2422_v36 = vstv %s2371_s11  ;;  %411 = vrot.lane.b32.xlu1 %v408_v30, %s1728_s6  ;;  %409 = vrot.lane.b32.xlu0 %v406_v25, %s1728_s6  ;;  %v570_v32 = vrot.slane %v564_v15, 1  ;;  %v3503_v38 = vld [vmem:[#allocation60_spill] sm:$0xff] }
  0xf6   :  { %v572_v5 = vrot.slane %v565_v56, 1  ;;  %v594_v51 = vadd.f32 %v591_v17, %v2198_v54  ;;  %v585_v63 = vmul.f32 %v1992_v40, %v2180_v16  ;;  %v569_v8 = vrot.slane %v563_v7, 1 }
  0xf7   :  { %v599_v1 = vrot.slane %v593_v0, 2  ;;  %v615_v41 = vmul.f32 %v2001_v42, %v2182_v31  ;;  %v619_v11 = vmul.f32 %v2004_v43, %v2246_v9  ;;  %v620_v30 = vmul.f32 %v2004_v43, %v2200_v19 }
  0xf8   :  { %v592_v27 = vadd.f32 %v589_v2, %v585_v63  ;;  %v614_v25 = vmul.f32 %v2001_v42, %v2180_v16  ;;  %v618_v54 = vmul.f32 %v2004_v43, %v2244_v61  ;;  %v522_v40 = vsel %vm329_vm10, %v520_v52, %v521_v28  ;;  %v3504_v2 = vld [vmem:[#allocation104_spill] sm:$0xff] }
  0xf9   :  { %v622_v62 = vadd.f32 %v619_v11, %v615_v41  ;;  %v644_v33 = vmul.f32 %v2007_v44, %v2182_v31  ;;  %v648_v48 = vmul.f32 %v2012_v45, %v2246_v9  ;;  %440 = vrot.lane.b32.xlu1 %v2362_v12, %s1728_s6  ;;  %438 = vrot.lane.b32.xlu0 %v435_v49, %s1728_s6  ;;  %v601_v42 = vrot.slane %v594_v51, 2  ;;  %v3505_v41 = vld [vmem:[#allocation105_spill] sm:$0xff] }
  0xfa   :  { %v2450_v18 = vsel %vm199_vm5, %v570_v32, %v572_v5  ;;  %v623_v43 = vadd.f32 %v620_v30, %v2204_v3  ;;  %v621_v34 = vadd.f32 %v618_v54, %v614_v25  ;;  %v2454_v4 = vsel %vm199_vm5, %v569_v8, %v570_v32 }
  0xfb   :  { %v649_v23 = vmul.f32 %v2012_v45, %v2200_v19  ;;  %v651_v22 = vadd.f32 %v648_v48, %v644_v33  ;;  %v2459_v60 = vstv %s2406_s25  ;;  %v2462_v12 = vsel %vm225_vm6, %v599_v1, %v601_v42  ;;  %v3506_v48 = vld [vmem:[#allocation61_spill] sm:$0xff] }
  0xfc   :  { %v598_v49 = vrot.slane %v592_v27, 2  ;;  %v643_v59 = vmul.f32 %v2007_v44, %v2180_v16  ;;  %v647_v3 = vmul.f32 %v2012_v45, %v2244_v61  ;;  %v628_v24 = vrot.slane %v622_v62, 3 }
  0xfd   :  { %v673_v28 = vmul.f32 %v2015_v46, %v2182_v31  ;;  %v677_v13 = vmul.f32 %v3500_v47, %v2246_v9  ;;  %v2475_v20 = vstv %s2424_s26  ;;  %469 = vrot.lane.b32.xlu1 %v2378_v50, %s1728_s6  ;;  %467 = vrot.lane.b32.xlu0 %v464_v21, %s1728_s6  ;;  %v630_v44 = vrot.slane %v623_v43, 3  ;;  %v3502_v21 = vld [vmem:[#allocation59_spill] sm:$0xff]  ;;  %v3507_v43 = vld [vmem:[#allocation62_spill] sm:$0xff] }
  0xfe   :  { %v627_v29 = vrot.slane %v621_v34, 3  ;;  %v652_v45 = vadd.f32 %v649_v23, %v3501_v35  ;;  %v650_v37 = vadd.f32 %v647_v3, %v643_v59  ;;  %v657_v55 = vrot.slane %v651_v22, 4  ;;  %v3508_v22 = vld [vmem:[#allocation94_spill] sm:$0xff] }
  0xff   :  { %v678_v6 = vmul.f32 %v3500_v47, %v2200_v19  ;;  %v680_v15 = vadd.f32 %v677_v13, %v673_v28  ;;  %v672_v56 = vmul.f32 %v2015_v46, %v2180_v16  ;;  %v676_v50 = vmul.f32 %v3500_v47, %v2244_v61 }
 0x100   :  { %v656_v7 = vrot.slane %v650_v37, 4  ;;  %v702_v58 = vmul.f32 %v3502_v21, %v2182_v31  ;;  %v706_v17 = vmul.f32 %v3503_v38, %v2246_v9  ;;  %v600_v52 = vsel %vm225_vm6, %v598_v49, %v599_v1 }
 0x101   :  { %v2495_v0 = vsel %vm251_vm7, %v628_v24, %v630_v44  ;;  %v681_v32 = vadd.f32 %v678_v6, %v3504_v2  ;;  %v707_v46 = vmul.f32 %v3503_v38, %v2200_v19  ;;  %498 = vrot.lane.b32.xlu1 %v2409_v39, %s1728_s6  ;;  %496 = vrot.lane.b32.xlu0 %v2412_v57, %s1728_s6  ;;  %v659_v51 = vrot.slane %v652_v45, 4 }
 0x102   :  { %v2505_v5 = vsel %vm251_vm7, %v627_v29, %v628_v24  ;;  %v679_v63 = vadd.f32 %v676_v50, %v672_v56  ;;  %v709_v8 = vadd.f32 %v706_v17, %v702_v58  ;;  %v686_v1 = vrot.slane %v680_v15, 5  ;;  %v3509_v29 = vld [vmem:[#allocation64_spill] sm:$0xff] }
 0x103   :  { %v710_v11 = vadd.f32 %v707_v46, %v3505_v41  ;;  %v701_v27 = vmul.f32 %v3502_v21, %v2180_v16  ;;  %v705_v39 = vmul.f32 %v3503_v38, %v2244_v61  ;;  %v2515_v57 = vsel %vm277_vm8, %v657_v55, %v659_v51  ;;  %v3512_v51 = vld [vmem:[#allocation66_spill] sm:$0xff] }
 0x104   :  { %v2518_v30 = vsel %vm277_vm8, %v656_v7, %v657_v55  ;;  %v688_v25 = vrot.slane %v681_v32, 5  ;;  %v2521_v54 = vstv %s2468_s27  ;;  %v685_v62 = vrot.slane %v679_v63, 5  ;;  %v3510_v55 = vld [vmem:[#allocation63_spill] sm:$0xff]  ;;  %v3511_v32 = vld [vmem:[#allocation65_spill] sm:$0xff] }
 0x105   :  { %v708_v33 = vadd.f32 %v705_v39, %v701_v27  ;;  %v751_v42 = vmul.f32 %v3506_v48, %v2182_v31  ;;  %v755_v34 = vmul.f32 %v3507_v43, %v2246_v9  ;;  %527 = vrot.lane.b32.xlu1 %v2415_v10, %s1728_s6  ;;  %525 = vrot.lane.b32.xlu0 %v522_v40, %s1728_s6  ;;  %v715_v23 = vrot.slane %v709_v8, 6 }
 0x106   :  { %v752_v49 = vmul.f32 %v3506_v48, %v3508_v22  ;;  %v756_v59 = vmul.f32 %v3507_v43, %v2200_v19  ;;  %v2536_v24 = vsel %vm303_vm9, %v686_v1, %v688_v25  ;;  %v717_v28 = vrot.slane %v710_v11, 6 }
 0x107   :  { %v758_v47 = vadd.f32 %v755_v34, %v751_v42  ;;  %v754_v13 = vmul.f32 %v3507_v43, %v2244_v61  ;;  %v714_v10 = vrot.slane %v708_v33, 6  ;;  %v750_v40 = vmul.f32 %v3506_v48, %v2180_v16  ;;  %v3513_v42 = vld [vmem:[#allocation67_spill] sm:$0xff]  ;;  %v3514_v34 = vld [vmem:[#allocation68_spill] sm:$0xff] }
 0x108   :  { %v759_v44 = vadd.f32 %v756_v59, %v752_v49  ;;  %v784_v35 = vmul.f32 %v3509_v29, %v2246_v9  ;;  %v2545_v45 = vsel %vm303_vm9, %v685_v62, %v686_v1  ;;  %v780_v6 = vmul.f32 %v3510_v55, %v2182_v31 }
 0x109   :  { %v764_v37 = vrot.slane %v758_v47, 1  ;;  %v785_v15 = vmul.f32 %v3509_v29, %v2200_v19  ;;  %576 = vrot.lane.b32.xlu1 %v2450_v18, %s1729_s7  ;;  %574 = vrot.lane.b32.xlu0 %v2454_v4, %s1729_s7  ;;  %v757_v56 = vadd.f32 %v754_v13, %v750_v40  ;;  %v779_v7 = vmul.f32 %v3510_v55, %v2180_v16 }
 0x10a   :  { %v783_v50 = vmul.f32 %v3509_v29, %v2244_v61  ;;  %v2561_v58 = vsel %vm329_vm10, %v715_v23, %v717_v28  ;;  %v766_v38 = vrot.slane %v759_v44, 1  ;;  %v781_v17 = vmul.f32 %v3510_v55, %v3508_v22 }
 0x10b   :  { %v787_v2 = vadd.f32 %v784_v35, %v780_v6  ;;  %v2566_v18 = vsel %vm329_vm10, %v714_v10, %v715_v23  ;;  %v809_v46 = vmul.f32 %v3511_v32, %v2182_v31  ;;  %v813_v63 = vmul.f32 %v3512_v51, %v2246_v9 }
 0x10c   :  { %v786_v4 = vadd.f32 %v783_v50, %v779_v7  ;;  %v2573_v8 = vsel %vm199_vm5, %v764_v37, %v766_v38  ;;  %v788_v1 = vadd.f32 %v785_v15, %v781_v17  ;;  %v810_v41 = vmul.f32 %v3511_v32, %v3508_v22  ;;  %v3515_v15 = vld [vmem:[#allocation69_spill] sm:$0xff]  ;;  %v3516_v7 = vld [vmem:[#allocation70_spill] sm:$0xff] }
 0x10d   :  { %v814_v11 = vmul.f32 %v3512_v51, %v2200_v19  ;;  %605 = vrot.lane.b32.xlu1 %v2462_v12, %s1729_s7  ;;  %603 = vrot.lane.b32.xlu0 %v600_v52, %s1729_s7  ;;  %v763_v27 = vrot.slane %v757_v56, 1  ;;  %v816_v39 = vadd.f32 %v813_v63, %v809_v46  ;;  %v808_v25 = vmul.f32 %v3511_v32, %v2180_v16 }
 0x10e   :  { %v812_v62 = vmul.f32 %v3512_v51, %v2244_v61  ;;  %v793_v33 = vrot.slane %v787_v2, 2  ;;  %v792_v48 = vrot.slane %v786_v4, 2  ;;  %v838_v43 = vmul.f32 %v3513_v42, %v2182_v31 }
 0x10f   :  { %v842_v23 = vmul.f32 %v3514_v34, %v2246_v9  ;;  %v817_v49 = vadd.f32 %v814_v11, %v810_v41  ;;  %v839_v52 = vmul.f32 %v3513_v42, %v3508_v22  ;;  %v843_v59 = vmul.f32 %v3514_v34, %v2200_v19 }
 0x110   :  { %v815_v12 = vadd.f32 %v812_v62, %v808_v25  ;;  %v795_v28 = vrot.slane %v788_v1, 2  ;;  %v837_v13 = vmul.f32 %v3513_v42, %v2180_v16  ;;  %v841_v10 = vmul.f32 %v3514_v34, %v2244_v61 }
 0x111   :  { %v845_v47 = vadd.f32 %v842_v23, %v838_v43  ;;  %634 = vrot.lane.b32.xlu1 %v2495_v0, %s1729_s7  ;;  %632 = vrot.lane.b32.xlu0 %v2505_v5, %s1729_s7  ;;  %v2605_v44 = vsel %vm199_vm5, %v763_v27, %v764_v37  ;;  %v822_v40 = vrot.slane %v816_v39, 3  ;;  %v846_v35 = vadd.f32 %v843_v59, %v839_v52  ;;  %v3517_v27 = vld [vmem:[#allocation71_spill] sm:$0xff] }
 0x112   :  { %v821_v29 = vrot.slane %v815_v12, 3  ;;  %v2608_v55 = vsel %vm225_vm6, %v793_v33, %v795_v28  ;;  %v844_v6 = vadd.f32 %v841_v10, %v837_v13  ;;  %v867_v56 = vmul.f32 %v3515_v15, %v2182_v31  ;;  %v3519_v28 = vld [vmem:[#allocation73_spill] sm:$0xff]  ;;  %v3520_v10 = vld [vmem:[#allocation74_spill] sm:$0xff] }
 0x113   :  { %v871_v50 = vmul.f32 %v3516_v7, %v2246_v9  ;;  %v2615_v0 = vsel %vm225_vm6, %v792_v48, %v793_v33  ;;  %v824_v5 = vrot.slane %v817_v49, 3  ;;  %v868_v37 = vmul.f32 %v3515_v15, %v3508_v22 }
 0x114   :  { %v872_v38 = vmul.f32 %v3516_v7, %v2200_v19  ;;  %v851_v17 = vrot.slane %v845_v47, 4  ;;  %v866_v4 = vmul.f32 %v3515_v15, %v2180_v16  ;;  %v870_v32 = vmul.f32 %v3516_v7, %v2244_v61 }
 0x115   :  { %v874_v2 = vadd.f32 %v871_v50, %v867_v56  ;;  %663 = vrot.lane.b32.xlu1 %v2515_v57, %s1729_s7  ;;  %661 = vrot.lane.b32.xlu0 %v2518_v30, %s1729_s7  ;;  %v2630_v46 = vsel %vm251_vm7, %v822_v40, %v824_v5  ;;  %v2633_v51 = vsel %vm251_vm7, %v821_v29, %v822_v40  ;;  %v853_v63 = vrot.slane %v846_v35, 4  ;;  %v3518_v57 = vld [vmem:[#allocation72_spill] sm:$0xff] }
 0x116   :  { %v875_v1 = vadd.f32 %v872_v38, %v868_v37  ;;  %v850_v41 = vrot.slane %v844_v6, 4  ;;  %v873_v11 = vadd.f32 %v870_v32, %v866_v4  ;;  %v896_v39 = vmul.f32 %v3517_v27, %v2182_v31  ;;  %v3521_v4 = vld [vmem:[#allocation75_spill] sm:$0xff] }
 0x117   :  { %v900_v25 = vmul.f32 %v3518_v57, %v2246_v9  ;;  %v897_v30 = vmul.f32 %v3517_v27, %v3508_v22  ;;  %v901_v62 = vmul.f32 %v3518_v57, %v2200_v19  ;;  %v895_v33 = vmul.f32 %v3517_v27, %v2180_v16 }
 0x118   :  { %v899_v48 = vmul.f32 %v3518_v57, %v2244_v61  ;;  %v2650_v42 = vsel %vm277_vm8, %v851_v17, %v853_v63  ;;  %v880_v43 = vrot.slane %v874_v2, 5  ;;  %v2653_v23 = vstv %s2598_s30  ;;  %v3522_v63 = vld [vmem:[#allocation76_spill] sm:$0xff] }
 0x119   :  { %v903_v34 = vadd.f32 %v900_v25, %v896_v39  ;;  %692 = vrot.lane.b32.xlu1 %v2536_v24, %s1729_s7  ;;  %690 = vrot.lane.b32.xlu0 %v2545_v45, %s1729_s7  ;;  %v882_v49 = vrot.slane %v875_v1, 5  ;;  %v879_v12 = vrot.slane %v873_v11, 5  ;;  %v904_v52 = vadd.f32 %v901_v62, %v897_v30 }
 0x11a   :  { %v902_v59 = vadd.f32 %v899_v48, %v895_v33  ;;  %v945_v47 = vmul.f32 %v3519_v28, %v2182_v31  ;;  %v946_v13 = vmul.f32 %v3519_v28, %v3508_v22  ;;  %v949_v40 = vmul.f32 %v3520_v10, %v2246_v9 }
 0x11b   :  { %v950_v24 = vmul.f32 %v3520_v10, %v2200_v19  ;;  %v2670_v29 = vsel %vm277_vm8, %v850_v41, %v851_v17  ;;  %v909_v45 = vrot.slane %v903_v34, 6  ;;  %v944_v35 = vmul.f32 %v3519_v28, %v2180_v16 }
 0x11c   :  { %v948_v6 = vmul.f32 %v3520_v10, %v2244_v61  ;;  %v2677_v15 = vsel %vm303_vm9, %v880_v43, %v882_v49  ;;  %v908_v56 = vrot.slane %v902_v59, 6  ;;  %v952_v7 = vadd.f32 %v949_v40, %v945_v47 }
 0x11d   :  { %v953_v50 = vadd.f32 %v950_v24, %v946_v13  ;;  %721 = vrot.lane.b32.xlu1 %v2561_v58, %s1729_s7  ;;  %719 = vrot.lane.b32.xlu0 %v2566_v18, %s1729_s7  ;;  %v2684_v5 = vsel %vm303_vm9, %v879_v12, %v880_v43  ;;  %v911_v37 = vrot.slane %v904_v52, 6  ;;  %v2687_v17 = vstv %s2635_s18  ;;  %v3523_v43 = vld [vmem:[#allocation78_spill] sm:$0xff]  ;;  %v3524_v12 = vld [vmem:[#allocation77_spill] sm:$0xff]  ;;  %v3525_v24 = vld [vmem:[#allocation79_spill] sm:$0xff] }
 0x11e   :  { %v951_v38 = vadd.f32 %v948_v6, %v944_v35  ;;  %v958_v2 = vrot.slane %v952_v7, 1  ;;  %v974_v32 = vmul.f32 %v3521_v4, %v2182_v31  ;;  %v978_v1 = vmul.f32 %v3522_v63, %v2246_v9  ;;  %v3526_v35 = vld [vmem:[#allocation80_spill] sm:$0xff] }
 0x11f   :  { %v979_v58 = vmul.f32 %v3522_v63, %v2200_v19  ;;  %v2696_v18 = vsel %vm329_vm10, %v909_v45, %v911_v37  ;;  %v975_v41 = vmul.f32 %v3521_v4, %v3508_v22  ;;  %v973_v11 = vmul.f32 %v3521_v4, %v2180_v16 }
 0x120   :  { %v977_v27 = vmul.f32 %v3522_v63, %v2244_v61  ;;  %v2707_v39 = vsel %vm329_vm10, %v908_v56, %v909_v45  ;;  %v960_v57 = vrot.slane %v953_v50, 1  ;;  %v981_v25 = vadd.f32 %v978_v1, %v974_v32 }
 0x121   :  { %v2710_v30 = vstv %s2655_s0  ;;  %770 = vrot.lane.b32.xlu1 %v2573_v8, %s1730_s22  ;;  %768 = vrot.lane.b32.xlu0 %v2605_v44, %s1730_s22  ;;  %v957_v62 = vrot.slane %v951_v38, 1  ;;  %v982_v33 = vadd.f32 %v979_v58, %v975_v41  ;;  %v1007_v34 = vmul.f32 %v3523_v43, %v2246_v9 }
 0x122   :  { %v980_v48 = vadd.f32 %v977_v27, %v973_v11  ;;  %v2719_v49 = vsel %vm199_vm5, %v958_v2, %v960_v57  ;;  %v1003_v52 = vmul.f32 %v3524_v12, %v2182_v31  ;;  %v1004_v59 = vmul.f32 %v3524_v12, %v3508_v22  ;;  %v3528_v57 = vld [vmem:[#allocation82_spill] sm:$0xff] }
 0x123   :  { %v1008_v8 = vmul.f32 %v3523_v43, %v2200_v19  ;;  %v987_v28 = vrot.slane %v981_v25, 2  ;;  %v1002_v47 = vmul.f32 %v3524_v12, %v2180_v16  ;;  %v1006_v13 = vmul.f32 %v3523_v43, %v2244_v61 }
 0x124   :  { %v986_v44 = vrot.slane %v980_v48, 2  ;;  %v1010_v10 = vadd.f32 %v1007_v34, %v1003_v52  ;;  %v1032_v45 = vmul.f32 %v3525_v24, %v2182_v31  ;;  %v1036_v6 = vmul.f32 %v3526_v35, %v2246_v9 }
 0x125   :  { %v1011_v40 = vadd.f32 %v1008_v8, %v1004_v59  ;;  %799 = vrot.lane.b32.xlu1 %v2608_v55, %s1730_s22  ;;  %797 = vrot.lane.b32.xlu0 %v2615_v0, %s1730_s22  ;;  %v989_v56 = vrot.slane %v982_v33, 2  ;;  %v1009_v7 = vadd.f32 %v1006_v13, %v1002_v47  ;;  %v1033_v50 = vmul.f32 %v3525_v24, %v3508_v22 }
 0x126   :  { %v1037_v37 = vmul.f32 %v3526_v35, %v2200_v19  ;;  %v2744_v38 = vsel %vm199_vm5, %v957_v62, %v958_v2  ;;  %v1039_v4 = vadd.f32 %v1036_v6, %v1032_v45  ;;  %v1031_v32 = vmul.f32 %v3525_v24, %v2180_v16  ;;  %v3527_v2 = vld [vmem:[#allocation81_spill] sm:$0xff] }
 0x127   :  { %v1035_v55 = vmul.f32 %v3526_v35, %v2244_v61  ;;  %v2751_v0 = vsel %vm225_vm6, %v987_v28, %v989_v56  ;;  %v2754_v63 = vsel %vm225_vm6, %v986_v44, %v987_v28  ;;  %v2757_v58 = vstv %s2704_s4  ;;  %v3530_v44 = vld [vmem:[#allocation84_spill] sm:$0xff] }
 0x128   :  { %v1040_v1 = vadd.f32 %v1037_v37, %v1033_v50  ;;  %v1016_v41 = vrot.slane %v1010_v10, 3  ;;  %v1061_v27 = vmul.f32 %v3527_v2, %v2182_v31  ;;  %v1065_v25 = vmul.f32 %v3528_v57, %v2246_v9 }
 0x129   :  { %v1038_v11 = vadd.f32 %v1035_v55, %v1031_v32  ;;  %828 = vrot.lane.b32.xlu1 %v2630_v46, %s1730_s22  ;;  %826 = vrot.lane.b32.xlu0 %v2633_v51, %s1730_s22  ;;  %v1018_v62 = vrot.slane %v1011_v40, 3  ;;  %v1015_v33 = vrot.slane %v1009_v7, 3  ;;  %v1062_v48 = vmul.f32 %v3527_v2, %v3508_v22  ;;  %v3529_v51 = vld [vmem:[#allocation83_spill] sm:$0xff] }
 0x12a   :  { %v1066_v43 = vmul.f32 %v3528_v57, %v2200_v19  ;;  %v1045_v34 = vrot.slane %v1039_v4, 4  ;;  %v1068_v12 = vadd.f32 %v1065_v25, %v1061_v27  ;;  %v1060_v52 = vmul.f32 %v3527_v2, %v2180_v16  ;;  %v3532_v2 = vld [vmem:[#allocation85_spill] sm:$0xff] }
 0x12b   :  { %v1064_v59 = vmul.f32 %v3528_v57, %v2244_v61  ;;  %v1047_v46 = vrot.slane %v1040_v1, 4  ;;  %v1090_v28 = vmul.f32 %v3529_v51, %v2182_v31  ;;  %v1094_v47 = vmul.f32 %v3530_v44, %v2246_v9 }
 0x12c   :  { %v1069_v8 = vadd.f32 %v1066_v43, %v1062_v48  ;;  %v1044_v13 = vrot.slane %v1038_v11, 4  ;;  %v1091_v40 = vmul.f32 %v3529_v51, %v3508_v22  ;;  %v1095_v24 = vmul.f32 %v3530_v44, %v2200_v19  ;;  %v3534_v48 = vld [vmem:[#allocation88_spill] sm:$0xff] }
 0x12d   :  { %v1067_v10 = vadd.f32 %v1064_v59, %v1060_v52  ;;  %857 = vrot.lane.b32.xlu1 %v2650_v42, %s1730_s22  ;;  %855 = vrot.lane.b32.xlu0 %v2670_v29, %s1730_s22  ;;  %v1074_v45 = vrot.slane %v1068_v12, 5  ;;  %v1097_v35 = vadd.f32 %v1094_v47, %v1090_v28  ;;  %v1089_v6 = vmul.f32 %v3529_v51, %v2180_v16  ;;  %v3535_v52 = vld [vmem:[#allocation87_spill] sm:$0xff]  ;;  %v3537_v28 = vld [vmem:[#allocation89_spill] sm:$0xff] }
 0x12e   :  { %v1093_v56 = vmul.f32 %v3530_v44, %v2244_v61  ;;  %v2792_v7 = vsel %vm251_vm7, %v1016_v41, %v1018_v62  ;;  %v2795_v50 = vsel %vm251_vm7, %v1015_v33, %v1016_v41  ;;  %v2798_v37 = vsel %vm277_vm8, %v1045_v34, %v1047_v46  ;;  %v3533_v41 = vld [vmem:[#allocation86_spill] sm:$0xff] }
 0x12f   :  { %v1098_v42 = vadd.f32 %v1095_v24, %v1091_v40  ;;  %v1076_v4 = vrot.slane %v1069_v8, 5  ;;  %v1073_v29 = vrot.slane %v1067_v10, 5  ;;  %v1103_v32 = vrot.slane %v1097_v35, 6  ;;  %v3538_v40 = vld [vmem:[#allocation92_spill] sm:$0xff]  ;;  %v3539_v35 = vld [vmem:[#allocation91_spill] sm:$0xff] }
 0x130   :  { %v1096_v55 = vadd.f32 %v1093_v56, %v1089_v6  ;;  %v2801_v1 = vsel %vm277_vm8, %v1044_v13, %v1045_v34  ;;  %v3531_v16 = vstv %s1919_s17  ;;  %v188_v27 = vmul.f32 %v3532_v2, %v3508_v22 }
 0x131   :  { %v180_v11 = vmul.f32 %v3531_v16, %v2246_v9  ;;  %v192_v57 = vmul.f32 %v3533_v41, %v2200_v19  ;;  %886 = vrot.lane.b32.xlu1 %v2677_v15, %s1730_s22  ;;  %884 = vrot.lane.b32.xlu0 %v2684_v5, %s1730_s22  ;;  %v2815_v25 = vsel %vm303_vm9, %v1074_v45, %v1076_v4  ;;  %v1105_v62 = vrot.slane %v1098_v42, 6  ;;  %v3536_v15 = vld [vmem:[#allocation90_spill] sm:$0xff]  ;;  %v3540_v42 = vld [vmem:[#allocation95_spill] sm:$0xff] }
 0x132   :  { %v1102_v33 = vrot.slane %v1096_v55, 6  ;;  %v218_v43 = vmul.f32 %v3534_v48, %v2200_v19  ;;  %v191_v34 = vmul.f32 %v3533_v41, %v2246_v9  ;;  %v214_v59 = vmul.f32 %v3535_v52, %v3508_v22 }
 0x133   :  { %v195_v12 = vadd.f32 %v192_v57, %v188_v27  ;;  %v244_v46 = vmul.f32 %v3536_v15, %v2200_v19  ;;  %v2826_v5 = vsel %vm303_vm9, %v1073_v29, %v1074_v45  ;;  %v2829_v8 = vsel %vm329_vm10, %v1103_v32, %v1105_v62  ;;  %v3543_v57 = vld [vmem:[#allocation96_spill] sm:$0xff] }
 0x134   :  { %v217_v51 = vmul.f32 %v3534_v48, %v2246_v9  ;;  %v240_v44 = vmul.f32 %v3537_v28, %v3508_v22  ;;  %v2836_v47 = vsel %vm329_vm10, %v1102_v33, %v1103_v32  ;;  %v221_v13 = vadd.f32 %v218_v43, %v214_v59  ;;  %v3541_v32 = vld [vmem:[#allocation93_spill] sm:$0xff] }
 0x135   :  { %v243_v10 = vmul.f32 %v3536_v15, %v2246_v9  ;;  %v270_v24 = vmul.f32 %v3538_v40, %v2200_v19  ;;  %915 = vrot.lane.b32.xlu1 %v2696_v18, %s1730_s22  ;;  %913 = vrot.lane.b32.xlu0 %v2707_v39, %s1730_s22  ;;  %v203_v45 = vrot.slane %v195_v12, 1  ;;  %v266_v6 = vmul.f32 %v3539_v35, %v3508_v22  ;;  %v3542_v39 = vld [vmem:[#allocation97_spill] sm:$0xff] }
 0x136   :  { %v269_v56 = vmul.f32 %v3538_v40, %v2246_v9  ;;  %v296_v4 = vmul.f32 %v3540_v42, %v2200_v19  ;;  %v247_v29 = vadd.f32 %v244_v46, %v240_v44  ;;  %v292_v55 = vmul.f32 %v3541_v32, %v3508_v22 }
 0x137   :  { %v295_v18 = vmul.f32 %v3540_v42, %v2246_v9  ;;  %v322_v16 = vmul.f32 %v3542_v39, %v2200_v19  ;;  %v273_v27 = vadd.f32 %v270_v24, %v266_v6  ;;  %v318_v62 = vmul.f32 %v3543_v57, %v3508_v22 }
 0x138   :  { %v187_v33 = vmul.f32 %v3532_v2, %v2182_v31  ;;  %v213_v43 = vmul.f32 %v3535_v52, %v2182_v31  ;;  %v2864_v12 = vadd.f32 %v296_v4, %v292_v55  ;;  %v321_v59 = vmul.f32 %v3542_v39, %v2246_v9 }
 0x139   :  { %v239_v46 = vmul.f32 %v3537_v28, %v2182_v31  ;;  %v265_v19 = vmul.f32 %v3539_v35, %v2182_v31  ;;  %964 = vrot.lane.b32.xlu1 %v2719_v49, %s1731_s9  ;;  %962 = vrot.lane.b32.xlu0 %v2744_v38, %s1731_s9  ;;  %v229_v22 = vrot.slane %v221_v13, 2  ;;  %v3544_v44 = vstv %s1911_s15 }
 0x13a   :  { %v177_v24 = vmul.f32 %v3544_v44, %v2182_v31  ;;  %v2879_v6 = vadd.f32 %v191_v34, %v187_v33  ;;  %v2881_v4 = vadd.f32 %v217_v51, %v213_v43  ;;  %v2883_v9 = vadd.f32 %v322_v16, %v318_v62 }
 0x13b   :  { %v2885_v55 = vadd.f32 %v243_v10, %v239_v46  ;;  %v2887_v21 = vadd.f32 %v269_v56, %v265_v19  ;;  %v291_v49 = vmul.f32 %v3541_v32, %v2182_v31  ;;  %v255_v3 = vrot.slane %v247_v29, 3 }
 0x13c   :  { %v201_v38 = vrot.slane %v2879_v6, 1  ;;  %v227_v13 = vrot.slane %v2881_v4, 2  ;;  %v317_v34 = vmul.f32 %v3543_v57, %v2182_v31  ;;  %v182_v51 = vadd.f32 %v180_v11, %v177_v24  ;;  %v2940_v24 = vld [vmem:[#allocation2] sm:$0xff] }
 0x13d   :  { %v253_v16 = vrot.slane %v2885_v55, 3  ;;  %v279_v10 = vrot.slane %v2887_v21, 4  ;;  %v2897_v62 = vadd.f32 %v295_v18, %v291_v49  ;;  %993 = vrot.lane.b32.xlu1 %v2751_v0, %s1731_s9  ;;  %991 = vrot.lane.b32.xlu0 %v2754_v63, %s1731_s9  ;;  %v281_v56 = vrot.slane %v273_v27, 4 }
 0x13e   :  { %v307_v29 = vrot.slane %v2864_v12, 5  ;;  %v204_v33 = vsel %vm199_vm5, %v201_v38, %v203_v45  ;;  %v2905_v43 = vadd.f32 %v321_v59, %v317_v34  ;;  %v333_v31 = vrot.slane %v2883_v9, 6 }
 0x13f   :  { %v208_v11 = vadd.f32 %v204_v33, %v182_v51  ;;  %v3545_v46 = vstv %s1919_s17  ;;  %v190_v19 = vmul.f32 %v3533_v41, %v2244_v61  ;;  %v230_v0 = vsel %vm225_vm6, %v227_v13, %v229_v22  ;;  %s3075_s17 = sld [smem:[#allocation7 + $0x22]] }
 0x140   :  { %v179_v18 = vmul.f32 %v3545_v46, %v2244_v61  ;;  %v256_v63 = vsel %vm251_vm7, %v253_v16, %v255_v3  ;;  %v282_v45 = vsel %vm277_vm8, %v279_v10, %v281_v56  ;;  %v305_v27 = vrot.slane %v2897_v62, 5 }
 0x141   :  { %v234_v12 = vadd.f32 %v230_v0, %v208_v11  ;;  %v216_v41 = vmul.f32 %v3534_v48, %v2244_v61  ;;  %v242_v59 = vmul.f32 %v3536_v15, %v2244_v61  ;;  %v268_v22 = vmul.f32 %v3538_v40, %v2244_v61  ;;  %1022 = vrot.lane.b32.xlu1 %v2792_v7, %s1731_s9  ;;  %v3547_v0 = vld [vmem:[#allocation98_spill] sm:$0xff] }
 0x142   :  { %1020 = vrot.lane.b32.xlu0 %v2795_v50, %s1731_s9  ;;  %v331_v3 = vrot.slane %v2905_v43, 6  ;;  %v294_v44 = vmul.f32 %v3540_v42, %v2244_v61  ;;  %v320_v48 = vmul.f32 %v3542_v39, %v2244_v61  ;;  %v186_v15 = vmul.f32 %v2940_v24, %v3532_v2 }
 0x143   :  { %v260_v40 = vadd.f32 %v256_v63, %v234_v12  ;;  %v212_v7 = vmul.f32 %v2940_v24, %v3535_v52  ;;  %v238_v50 = vmul.f32 %v2940_v24, %v3537_v28  ;;  %v264_v6 = vmul.f32 %v2940_v24, %v3539_v35 }
 0x144   :  { %v3546_v9 = vstv %s1911_s15  ;;  %v193_v49 = vadd.f32 %v190_v19, %v186_v15  ;;  %v290_v61 = vmul.f32 %v2940_v24, %v3541_v32  ;;  %v316_v2 = vmul.f32 %v2940_v24, %v3543_v57  ;;  %s2964_s15 = sld [smem:[#allocation7 + $0x4c]]  ;;  %v2993_v15 = vld [vmem:[#allocation2 + $0x20] sm:$0xff] }
 0x145   :  { %v176_v42 = vmul.f32 %v2940_v24, %v3546_v9  ;;  %v286_v39 = vadd.f32 %v282_v45, %v260_v40  ;;  %v219_v34 = vadd.f32 %v216_v41, %v212_v7  ;;  %v245_v51 = vadd.f32 %v242_v59, %v238_v50  ;;  %1051 = vrot.lane.b32.xlu1 %v2798_v37, %s1731_s9  ;;  %v2977_v59 = vld [vmem:[#allocation2 + $0x10] sm:$0x3f]  ;;  %v3548_v40 = vld [vmem:[#allocation99_spill] sm:$0xff]  ;;  %v3550_v9 = vld [vmem:[#allocation101_spill] sm:$0xff] }
 0x146   :  { %v271_v52 = vadd.f32 %v268_v22, %v264_v6  ;;  %1049 = vrot.lane.b32.xlu0 %v2801_v1, %s1731_s9  ;;  %v308_v28 = vsel %vm303_vm9, %v305_v27, %v307_v29  ;;  %v200_v35 = vrot.slane %v193_v49, 1  ;;  %v297_v32 = vadd.f32 %v294_v44, %v290_v61  ;;  %v2970_v1 = vld [vmem:[#allocation2 + $0x8] sm:$0xff] }
 0x147   :  { %v323_v56 = vadd.f32 %v320_v48, %v316_v2  ;;  %v312_v57 = vadd.f32 %v308_v28, %v286_v39  ;;  %v181_v33 = vadd.f32 %v179_v18, %v176_v42  ;;  %v226_v11 = vrot.slane %v219_v34, 2  ;;  %v2997_v7 = vld [vmem:[#allocation2 + $0x28] sm:$0x3f] }
 0x148   :  { %v252_v46 = vrot.slane %v245_v51, 3  ;;  %v334_v37 = vsel %vm329_vm10, %v331_v3, %v333_v31  ;;  %v202_v19 = vsel %vm199_vm5, %v200_v35, %v201_v38  ;;  %v1139_v29 = vmul.f32 %v2970_v1, %v3547_v0 }
 0x149   :  { %v2975_v63 = vstv %s2923_s23  ;;  %v207_v45 = vadd.f32 %v202_v19, %v181_v33  ;;  %v278_v12 = vrot.slane %v271_v52, 4  ;;  %v304_v41 = vrot.slane %v297_v32, 5  ;;  %1080 = vrot.lane.b32.xlu1 %v2815_v25, %s1731_s9 }
 0x14a   :  { %v1140_v18 = vmul.f32 %v2977_v59, %v3547_v0  ;;  %1078 = vrot.lane.b32.xlu0 %v2826_v5, %s1731_s9  ;;  %v2985_v38 = vadd.f32 %v334_v37, %v312_v57  ;;  %v228_v31 = vsel %vm225_vm6, %v226_v11, %v227_v13  ;;  %v254_v22 = vsel %vm251_vm7, %v252_v46, %v253_v16  ;;  %v3003_v13 = vld [vmem:[#allocation2 + $0x18] sm:$0xff]  ;;  %v3549_v16 = vld [vmem:[#allocation100_spill] sm:$0xff] }
 0x14b   :  { %v330_v44 = vrot.slane %v323_v56, 6  ;;  %v233_v48 = vadd.f32 %v228_v31, %v207_v45  ;;  %v1143_v25 = vmul.f32 %v2993_v15, %v3548_v40  ;;  %v1144_v5 = vmul.f32 %v2997_v7, %v3548_v40 }
 0x14c   :  { %v1138_v4 = vmul.f32 %v2940_v24, %v3547_v0  ;;  %v1142_v55 = vmul.f32 %v3003_v13, %v3548_v40  ;;  %v1168_v50 = vmul.f32 %v2970_v1, %v3549_v16  ;;  %v1169_v6 = vmul.f32 %v2977_v59, %v3549_v16 }
 0x14d   :  { %v1172_v42 = vmul.f32 %v2993_v15, %v3550_v9  ;;  %v259_v49 = vadd.f32 %v254_v22, %v233_v48  ;;  %v1146_v61 = vadd.f32 %v1143_v25, %v1139_v29  ;;  %v1147_v2 = vadd.f32 %v1144_v5, %v1140_v18  ;;  %1109 = vrot.lane.b32.xlu1 %v2829_v8, %s1731_s9 }
 0x14e   :  { %v1173_v39 = vmul.f32 %v2997_v7, %v3550_v9  ;;  %1107 = vrot.lane.b32.xlu0 %v2836_v47, %s1731_s9  ;;  %v280_v34 = vsel %vm277_vm8, %v278_v12, %v279_v10  ;;  %v1145_v51 = vadd.f32 %v1142_v55, %v1138_v4  ;;  %v3023_v28 = vstv %s2964_s15  ;;  %v3551_v12 = vld [vmem:[#allocation102_spill] sm:$0xff] }
 0x14f   :  { %v1175_v52 = vadd.f32 %v1172_v42, %v1168_v50  ;;  %v285_v35 = vadd.f32 %v280_v34, %v259_v49  ;;  %v1152_v32 = vrot.slane %v1146_v61, 1  ;;  %v1154_v56 = vrot.slane %v1147_v2, 1  ;;  %v3025_v33 = vpop.permute.xlu1 %353  ;;  %v3027_v11 = vpop.permute.xlu0 %351 }
 0x150   :  { %v1176_v57 = vadd.f32 %v1173_v39, %v1169_v6  ;;  %v1151_v8 = vrot.slane %v1145_v51, 1  ;;  %v1167_v47 = vmul.f32 %v2940_v24, %v3549_v16  ;;  %v1171_v21 = vmul.f32 %v3003_v13, %v3550_v9 }
 0x151   :  { %v1181_v46 = vrot.slane %v1175_v52, 2  ;;  %v306_v10 = vsel %vm303_vm9, %v304_v41, %v305_v27  ;;  %v332_v37 = vsel %vm329_vm10, %v330_v44, %v331_v3  ;;  %v1155_v19 = vsel %vm199_vm5, %v1152_v32, %v1154_v56 }
 0x152   :  { %v1183_v0 = vrot.slane %v1176_v57, 2  ;;  %1158 = vrot.lane.b32.xlu1 %v1155_v19, %s1732_s8  ;;  %v1153_v29 = vsel %vm199_vm5, %v1151_v8, %v1152_v32  ;;  %v1174_v45 = vadd.f32 %v1171_v21, %v1167_v47  ;;  %v1197_v18 = vmul.f32 %v2970_v1, %v3551_v12 }
 0x153   :  { %v1201_v62 = vmul.f32 %v2993_v15, %v2313_v14  ;;  %v311_v31 = vadd.f32 %v306_v10, %v285_v35  ;;  %1156 = vrot.lane.b32.xlu0 %v1153_v29, %s1732_s8  ;;  %v1198_v27 = vmul.f32 %v2977_v59, %v3551_v12  ;;  %v1202_v3 = vmul.f32 %v2997_v7, %v2313_v14  ;;  %v3052_v41 = vpop.permute.xlu1 %547  ;;  %v3054_v22 = vpop.permute.xlu0 %545 }
 0x154   :  { %v1184_v43 = vsel %vm225_vm6, %v1181_v46, %v1183_v0  ;;  %v1180_v44 = vrot.slane %v1174_v45, 2  ;;  %v1196_v40 = vmul.f32 %v2940_v24, %v3551_v12  ;;  %v1200_v25 = vmul.f32 %v3003_v13, %v2313_v14 }
 0x155   :  { %v1204_v48 = vadd.f32 %v1201_v62, %v1197_v18  ;;  %v1205_v5 = vadd.f32 %v1202_v3, %v1198_v27  ;;  %v1226_v4 = vmul.f32 %v2970_v1, %v2297_v53  ;;  %v1227_v55 = vmul.f32 %v2977_v59, %v2297_v53 }
 0x156   :  { %v1230_v16 = vmul.f32 %v2993_v15, %v2404_v26  ;;  %1187 = vrot.lane.b32.xlu1 %v1184_v43, %s1732_s8  ;;  %v1182_v50 = vsel %vm225_vm6, %v1180_v44, %v1181_v46  ;;  %v1203_v9 = vadd.f32 %v1200_v25, %v1196_v40  ;;  %v1231_v42 = vmul.f32 %v2997_v7, %v2404_v26 }
 0x157   :  { %v1210_v6 = vrot.slane %v1204_v48, 3  ;;  %1185 = vrot.lane.b32.xlu0 %v1182_v50, %s1732_s8  ;;  %v1212_v14 = vrot.slane %v1205_v5, 3  ;;  %v1225_v61 = vmul.f32 %v2940_v24, %v2297_v53  ;;  %v1229_v2 = vmul.f32 %v3003_v13, %v2404_v26  ;;  %v3077_v34 = vpop.permute.xlu1 %741  ;;  %v3079_v51 = vpop.permute.xlu0 %739 }
 0x158   :  { %v1233_v49 = vadd.f32 %v1230_v16, %v1226_v4  ;;  %v337_v39 = vadd.f32 %v332_v37, %v311_v31  ;;  %v1209_v52 = vrot.slane %v1203_v9, 3  ;;  %v1234_v35 = vadd.f32 %v1231_v42, %v1227_v55 }
 0x159   :  { %v1255_v32 = vmul.f32 %v2970_v1, %v2422_v36  ;;  %v1213_v56 = vsel %vm251_vm7, %v1210_v6, %v1212_v14  ;;  %v1232_v8 = vadd.f32 %v1229_v2, %v1225_v61  ;;  %v1259_v53 = vmul.f32 %v2993_v15, %v2459_v60 }
 0x15a   :  { %v1239_v57 = vrot.slane %v1233_v49, 4  ;;  %1216 = vrot.lane.b32.xlu1 %v1213_v56, %s1732_s8  ;;  %v1211_v26 = vsel %vm251_vm7, %v1209_v52, %v1210_v6  ;;  %v1241_v46 = vrot.slane %v1234_v35, 4  ;;  %v1256_v47 = vmul.f32 %v2977_v59, %v2422_v36 }
 0x15b   :  { %v1260_v21 = vmul.f32 %v2997_v7, %v2459_v60  ;;  %1214 = vrot.lane.b32.xlu0 %v1211_v26, %s1732_s8  ;;  %v1238_v10 = vrot.slane %v1232_v8, 4  ;;  %v1262_v37 = vadd.f32 %v1259_v53, %v1255_v32  ;;  %v1254_v19 = vmul.f32 %v2940_v24, %v2422_v36  ;;  %v3097_v29 = vpop.permute.xlu1 %935  ;;  %v3099_v45 = vpop.permute.xlu0 %933 }
 0x15c   :  { %v1258_v0 = vmul.f32 %v3003_v13, %v2459_v60  ;;  %v1242_v12 = vsel %vm277_vm8, %v1239_v57, %v1241_v46  ;;  %v1284_v62 = vmul.f32 %v2970_v1, %v2475_v20  ;;  %v1288_v31 = vmul.f32 %v2993_v15, %v2521_v54 }
 0x15d   :  { %v1263_v18 = vadd.f32 %v1260_v21, %v1256_v47  ;;  %v1268_v43 = vrot.slane %v1262_v37, 5  ;;  %v1285_v36 = vmul.f32 %v2977_v59, %v2475_v20  ;;  %v1289_v60 = vmul.f32 %v2997_v7, %v2521_v54 }
 0x15e   :  { %v1261_v27 = vadd.f32 %v1258_v0, %v1254_v19  ;;  %1245 = vrot.lane.b32.xlu1 %v1242_v12, %s1732_s8  ;;  %v1240_v3 = vsel %vm277_vm8, %v1238_v10, %v1239_v57  ;;  %v1291_v44 = vadd.f32 %v1288_v31, %v1284_v62  ;;  %v1283_v48 = vmul.f32 %v2940_v24, %v2475_v20 }
 0x15f   :  { %v1287_v40 = vmul.f32 %v3003_v13, %v2521_v54  ;;  %1243 = vrot.lane.b32.xlu0 %v1240_v3, %s1732_s8  ;;  %v1270_v25 = vrot.slane %v1263_v18, 5  ;;  %v1292_v4 = vadd.f32 %v1289_v60, %v1285_v36  ;;  %v3118_v55 = vstv %s3075_s17  ;;  %v3123_v6 = vpop.permute.xlu1 %1129  ;;  %v3125_v20 = vpop.permute.xlu0 %1127 }
 0x160   :  { %v1267_v5 = vrot.slane %v1261_v27, 5  ;;  %v358_v16 = vadd.f32 %v3025_v33, %v2985_v38  ;;  %v357_v50 = vadd.f32 %v3027_v11, %v337_v39  ;;  %v1297_v9 = vrot.slane %v1291_v44, 6 }
 0x161   :  { %v1290_v42 = vadd.f32 %v1287_v40, %v1283_v48  ;;  %v1271_v54 = vsel %vm303_vm9, %v1268_v43, %v1270_v25  ;;  %v1299_v14 = vrot.slane %v1292_v4, 6  ;;  %v3552_v49 = vstv %s2481_s29 }
 0x162   :  { %v1313_v61 = vmul.f32 %v2970_v1, %v3552_v49  ;;  %v3553_v2 = vstv %s2507_s2  ;;  %1274 = vrot.lane.b32.xlu1 %v1271_v54, %s1732_s8  ;;  %v1269_v38 = vsel %vm303_vm9, %v1267_v5, %v1268_v43  ;;  %v1333_v11 = vmul.f32 %v2970_v1, %v2653_v23 }
 0x163   :  { %v1316_v52 = vmul.f32 %v2993_v15, %v3553_v2  ;;  %v1296_v33 = vrot.slane %v1290_v42, 6  ;;  %v1337_v39 = vmul.f32 %v2993_v15, %v2687_v17  ;;  %1272 = vrot.lane.b32.xlu0 %v1269_v38, %s1732_s8  ;;  %v1300_v35 = vsel %vm329_vm10, %v1297_v9, %v1299_v14  ;;  %v383_v53 = vpop.permute.xlu1 %382  ;;  %v381_v26 = vpop.permute.xlu0 %380 }
 0x164   :  { %v3554_v32 = vmov %v3553_v2  ;;  %v1334_v57 = vmul.f32 %v2977_v59, %v2653_v23  ;;  %v1338_v8 = vmul.f32 %v2997_v7, %v2687_v17  ;;  %v1332_v21 = vmul.f32 %v2940_v24, %v2653_v23 }
 0x165   :  { %v1315_v56 = vmul.f32 %v3003_v13, %v3554_v32  ;;  %v1298_v46 = vsel %vm329_vm10, %v1296_v33, %v1297_v9  ;;  %v1340_v47 = vadd.f32 %v1337_v39, %v1333_v11  ;;  %v1336_v10 = vmul.f32 %v3003_v13, %v2687_v17 }
 0x166   :  { %v387_v37 = vadd.f32 %v383_v53, %v358_v16  ;;  %v386_v19 = vadd.f32 %v381_v26, %v357_v50  ;;  %v1341_v0 = vadd.f32 %v1338_v8, %v1334_v57  ;;  %v1362_v12 = vmul.f32 %v2970_v1, %v2710_v30  ;;  %1303 = vrot.lane.b32.xlu1 %v1300_v35, %s1732_s8 }
 0x167   :  { %v1339_v18 = vadd.f32 %v1336_v10, %v1332_v21  ;;  %v1363_v62 = vmul.f32 %v2977_v59, %v2710_v30  ;;  %v1366_v31 = vmul.f32 %v2993_v15, %v2757_v58  ;;  %v1367_v23 = vmul.f32 %v2997_v7, %v2757_v58  ;;  %1301 = vrot.lane.b32.xlu0 %v1298_v46, %s1732_s8  ;;  %v412_v3 = vpop.permute.xlu1 %411  ;;  %v410_v44 = vpop.permute.xlu0 %409 }
 0x168   :  { %v1318_v17 = vadd.f32 %v1316_v52, %v1313_v61  ;;  %v3555_v43 = vmov %v3552_v49  ;;  %v1361_v36 = vmul.f32 %v2940_v24, %v2710_v30  ;;  %v1365_v60 = vmul.f32 %v3003_v13, %v2757_v58 }
 0x169   :  { %v1312_v27 = vmul.f32 %v2940_v24, %v3555_v43  ;;  %v1346_v48 = vrot.slane %v1340_v47, 1  ;;  %v1345_v40 = vrot.slane %v1339_v18, 1  ;;  %v1369_v25 = vadd.f32 %v1366_v31, %v1362_v12 }
 0x16a   :  { %v1370_v5 = vadd.f32 %v1367_v23, %v1363_v62  ;;  %v1348_v16 = vrot.slane %v1341_v0, 1  ;;  %v1368_v50 = vadd.f32 %v1365_v60, %v1361_v36  ;;  %v1422_v9 = vstv %s3134_s16  ;;  %1323 = vrot.lane.b32.xlu1 %v1318_v17, %s1733_s24 }
 0x16b   :  { %v1317_v4 = vadd.f32 %v1315_v56, %v1312_v27  ;;  %v416_v42 = vadd.f32 %v412_v3, %v387_v37  ;;  %v1391_v30 = vmul.f32 %v2970_v1, %v2975_v63  ;;  %v1392_v58 = vmul.f32 %v2977_v59, %v2975_v63  ;;  %v441_v52 = vpop.permute.xlu1 %440  ;;  %v439_v38 = vpop.permute.xlu0 %438 }
 0x16c   :  { %v1395_v54 = vmul.f32 %v2993_v15, %v3023_v28  ;;  %v415_v14 = vadd.f32 %v410_v44, %v386_v19  ;;  %v1375_v49 = vrot.slane %v1369_v25, 2  ;;  %v1396_v61 = vmul.f32 %v2997_v7, %v3023_v28 }
 0x16d   :  { %1321 = vrot.lane.b32.xlu0 %v1317_v4, %s1733_s24  ;;  %v1394_v2 = vmul.f32 %v3003_v13, %v3023_v28  ;;  %v1349_v33 = vsel %vm199_vm5, %v1346_v48, %v1348_v16  ;;  %v1347_v11 = vsel %vm199_vm5, %v1345_v40, %v1346_v48  ;;  %v1377_v39 = vrot.slane %v1370_v5, 2 }
 0x16e   :  { %v1390_v35 = vmul.f32 %v2940_v24, %v2975_v63  ;;  %v1374_v32 = vrot.slane %v1368_v50, 2  ;;  %v1398_v56 = vadd.f32 %v1395_v54, %v1391_v30  ;;  %v1420_v28 = vmul.f32 %v2970_v1, %v3118_v55  ;;  %1352 = vrot.lane.b32.xlu1 %v1349_v33, %s1733_s24 }
 0x16f   :  { %v1421_v57 = vmul.f32 %v2977_v59, %v3118_v55  ;;  %v1399_v8 = vadd.f32 %v1396_v61, %v1392_v58  ;;  %v1424_v26 = vmul.f32 %v2993_v15, %v1422_v9  ;;  %v1425_v46 = vmul.f32 %v2997_v7, %v1422_v9  ;;  %v470_v0 = vpop.permute.xlu1 %469  ;;  %v468_v12 = vpop.permute.xlu0 %467 }
 0x170   :  { %v1397_v53 = vadd.f32 %v1394_v2, %v1390_v35  ;;  %v1378_v63 = vsel %vm225_vm6, %v1375_v49, %v1377_v39  ;;  %v1419_v47 = vmul.f32 %v2940_v24, %v3118_v55  ;;  %v1423_v21 = vmul.f32 %v3003_v13, %v1422_v9 }
 0x171   :  { %1350 = vrot.lane.b32.xlu0 %v1347_v11, %s1733_s24  ;;  %v1447_v10 = vstv %s3173_s21  ;;  %v445_v37 = vadd.f32 %v441_v52, %v416_v42  ;;  %v444_v19 = vadd.f32 %v439_v38, %v415_v14  ;;  %v1427_v18 = vadd.f32 %v1424_v26, %v1420_v28 }
 0x172   :  { %v1428_v62 = vadd.f32 %v1425_v46, %v1421_v57  ;;  %v1376_v31 = vsel %vm225_vm6, %v1374_v32, %v1375_v49  ;;  %v1404_v23 = vrot.slane %v1398_v56, 3  ;;  %v1403_v17 = vrot.slane %v1397_v53, 3  ;;  %1381 = vrot.lane.b32.xlu1 %v1378_v63, %s1733_s24 }
 0x173   :  { %v1426_v43 = vadd.f32 %v1423_v21, %v1419_v47  ;;  %v474_v27 = vadd.f32 %v470_v0, %v445_v37  ;;  %v1406_v55 = vrot.slane %v1399_v8, 3  ;;  %v1433_v36 = vrot.slane %v1427_v18, 4  ;;  %v499_v25 = vpop.permute.xlu1 %498  ;;  %v497_v5 = vpop.permute.xlu0 %496 }
 0x174   :  { %v1449_v60 = vmul.f32 %v2970_v1, %v1447_v10  ;;  %v1435_v3 = vrot.slane %v1428_v62, 4  ;;  %v1450_v44 = vmul.f32 %v2977_v59, %v1447_v10  ;;  %v1451_v48 = vstv %s3188_s13 }
 0x175   :  { %1379 = vrot.lane.b32.xlu0 %v1376_v31, %s1733_s24  ;;  %v1448_v40 = vmul.f32 %v2940_v24, %v1447_v10  ;;  %v1453_v4 = vmul.f32 %v2993_v15, %v1451_v48  ;;  %v1454_v16 = vmul.f32 %v2997_v7, %v1451_v48  ;;  %v1452_v50 = vmul.f32 %v3003_v13, %v1451_v48 }
 0x176   :  { %v1476_v9 = vstv %s3194_s14  ;;  %v473_v42 = vadd.f32 %v468_v12, %v444_v19  ;;  %v1407_v30 = vsel %vm251_vm7, %v1404_v23, %v1406_v55  ;;  %v1405_v58 = vsel %vm251_vm7, %v1403_v17, %v1404_v23 }
 0x177   :  { %v1432_v54 = vrot.slane %v1426_v43, 4  ;;  %1410 = vrot.lane.b32.xlu1 %v1407_v30, %s1733_s24  ;;  %v1436_v14 = vsel %vm277_vm8, %v1433_v36, %v1435_v3  ;;  %v1456_v49 = vadd.f32 %v1453_v4, %v1449_v60  ;;  %v1457_v61 = vadd.f32 %v1454_v16, %v1450_v44  ;;  %v528_v39 = vpop.permute.xlu1 %527  ;;  %v526_v35 = vpop.permute.xlu0 %525 }
 0x178   :  { %v1455_v2 = vadd.f32 %v1452_v50, %v1448_v40  ;;  %v503_v52 = vadd.f32 %v499_v25, %v474_v27  ;;  %v502_v38 = vadd.f32 %v497_v5, %v473_v42  ;;  %v1478_v33 = vmul.f32 %v2970_v1, %v1476_v9 }
 0x179   :  { %1408 = vrot.lane.b32.xlu0 %v1405_v58, %s1733_s24  ;;  %v1480_v11 = vstv %s3209_s19  ;;  %v1462_v32 = vrot.slane %v1456_v49, 5  ;;  %v1479_v56 = vmul.f32 %v2977_v59, %v1476_v9  ;;  %v1477_v57 = vmul.f32 %v2940_v24, %v1476_v9 }
 0x17a   :  { %v1482_v28 = vmul.f32 %v2993_v15, %v1480_v11  ;;  %v532_v8 = vadd.f32 %v528_v39, %v503_v52  ;;  %v531_v53 = vadd.f32 %v526_v35, %v502_v38  ;;  %v1483_v26 = vmul.f32 %v2997_v7, %v1480_v11 }
 0x17b   :  { %v1481_v46 = vmul.f32 %v3003_v13, %v1480_v11  ;;  %1439 = vrot.lane.b32.xlu1 %v1436_v14, %s1733_s24  ;;  %v1434_v1 = vsel %vm277_vm8, %v1432_v54, %v1433_v36  ;;  %v1464_v63 = vrot.slane %v1457_v61, 5  ;;  %v1461_v47 = vrot.slane %v1455_v2, 5  ;;  %v577_v37 = vpop.permute.xlu1 %576  ;;  %v575_v19 = vpop.permute.xlu0 %574 }
 0x17c   :  { %v1485_v21 = vadd.f32 %v1482_v28, %v1478_v33  ;;  %v552_v10 = vadd.f32 %v3052_v41, %v532_v8  ;;  %v551_v59 = vadd.f32 %v3054_v22, %v531_v53  ;;  %v1486_v24 = vadd.f32 %v1483_v26, %v1479_v56 }
 0x17d   :  { %1437 = vrot.lane.b32.xlu0 %v1434_v1, %s1733_s24  ;;  %v1484_v15 = vadd.f32 %v1481_v46, %v1477_v57  ;;  %v1465_v7 = vsel %vm303_vm9, %v1462_v32, %v1464_v63  ;;  %v1463_v0 = vsel %vm303_vm9, %v1461_v47, %v1462_v32 }
 0x17e   :  { %v1491_v13 = vrot.slane %v1485_v21, 6  ;;  %v1493_v18 = vrot.slane %v1486_v24, 6  ;;  %v581_v43 = vadd.f32 %v577_v37, %v552_v10  ;;  %v580_v27 = vadd.f32 %v575_v19, %v551_v59 }
 0x17f   :  { %1468 = vrot.lane.b32.xlu1 %v1465_v7, %s1733_s24  ;;  %v1490_v12 = vrot.slane %v1484_v15, 6  ;;  %v606_v41 = vpop.permute.xlu1 %605  ;;  %v604_v62 = vpop.permute.xlu0 %603 }
 0x180   :  { %v1494_v22 = vsel %vm329_vm10, %v1491_v13, %v1493_v18  ;;  %v610_v60 = vadd.f32 %v606_v41, %v581_v43  ;;  %v609_v3 = vadd.f32 %v604_v62, %v580_v27 }
 0x181   :  { %1466 = vrot.lane.b32.xlu0 %v1463_v0, %s1733_s24  ;;  %v1492_v31 = vsel %vm329_vm10, %v1490_v12, %v1491_v13 }
 0x183   :  { %1497 = vrot.lane.b32.xlu1 %v1494_v22, %s1733_s24  ;;  %v635_v23 = vpop.permute.xlu1 %634  ;;  %v633_v17 = vpop.permute.xlu0 %632 }
 0x184   :  { %v639_v44 = vadd.f32 %v635_v23, %v610_v60  ;;  %v638_v48 = vadd.f32 %v633_v17, %v609_v3 }
 0x185   :  { %1495 = vrot.lane.b32.xlu0 %v1492_v31, %s1733_s24 }
 0x187   :  { %v664_v55 = vpop.permute.xlu1 %663  ;;  %v662_v36 = vpop.permute.xlu0 %661 }
 0x188   :  { %v668_v5 = vadd.f32 %v664_v55, %v639_v44  ;;  %v667_v4 = vadd.f32 %v662_v36, %v638_v48 }
 0x18b   :  { %v693_v40 = vpop.permute.xlu1 %692  ;;  %v691_v25 = vpop.permute.xlu0 %690 }
 0x18c   :  { %v697_v16 = vadd.f32 %v693_v40, %v668_v5  ;;  %v696_v50 = vadd.f32 %v691_v25, %v667_v4 }
 0x18f   :  { %v722_v9 = vpop.permute.xlu1 %721  ;;  %v720_v42 = vpop.permute.xlu0 %719 }
 0x190   :  { %v726_v30 = vadd.f32 %v722_v9, %v697_v16  ;;  %v725_v58 = vadd.f32 %v720_v42, %v696_v50 }
 0x192   :  { %v746_v54 = vadd.f32 %v3077_v34, %v726_v30  ;;  %v745_v14 = vadd.f32 %v3079_v51, %v725_v58 }
 0x193   :  { %v771_v49 = vpop.permute.xlu1 %770  ;;  %v769_v61 = vpop.permute.xlu0 %768 }
 0x194   :  { %v775_v63 = vadd.f32 %v771_v49, %v746_v54  ;;  %v774_v47 = vadd.f32 %v769_v61, %v745_v14 }
 0x197   :  { %v800_v2 = vpop.permute.xlu1 %799  ;;  %v798_v52 = vpop.permute.xlu0 %797 }
 0x198   :  { %v804_v21 = vadd.f32 %v800_v2, %v775_v63  ;;  %v803_v10 = vadd.f32 %v798_v52, %v774_v47 }
 0x19b   :  { %v829_v38 = vpop.permute.xlu1 %828  ;;  %v827_v33 = vpop.permute.xlu0 %826 }
 0x19c   :  { %v833_v15 = vadd.f32 %v829_v38, %v804_v21  ;;  %v832_v37 = vadd.f32 %v827_v33, %v803_v10 }
 0x19f   :  { %v858_v11 = vpop.permute.xlu1 %857  ;;  %v856_v39 = vpop.permute.xlu0 %855 }
 0x1a0   :  { %v862_v19 = vadd.f32 %v858_v11, %v833_v15  ;;  %v861_v7 = vadd.f32 %v856_v39, %v832_v37 }
 0x1a3   :  { %v887_v35 = vpop.permute.xlu1 %886  ;;  %v885_v32 = vpop.permute.xlu0 %884 }
 0x1a4   :  { %v891_v12 = vadd.f32 %v887_v35, %v862_v19  ;;  %v890_v18 = vadd.f32 %v885_v32, %v861_v7 }
 0x1a7   :  { %v916_v56 = vpop.permute.xlu1 %915  ;;  %v914_v28 = vpop.permute.xlu0 %913 }
 0x1a8   :  { %v920_v41 = vadd.f32 %v916_v56, %v891_v12  ;;  %v919_v62 = vadd.f32 %v914_v28, %v890_v18 }
 0x1aa   :  { %v940_v23 = vadd.f32 %v3097_v29, %v920_v41  ;;  %v939_v17 = vadd.f32 %v3099_v45, %v919_v62 }
 0x1ab   :  { %v965_v57 = vpop.permute.xlu1 %964  ;;  %v963_v8 = vpop.permute.xlu0 %962 }
 0x1ac   :  { %v969_v55 = vadd.f32 %v965_v57, %v940_v23  ;;  %v968_v36 = vadd.f32 %v963_v8, %v939_v17 }
 0x1af   :  { %v994_v53 = vpop.permute.xlu1 %993  ;;  %v992_v26 = vpop.permute.xlu0 %991 }
 0x1b0   :  { %v998_v3 = vadd.f32 %v994_v53, %v969_v55  ;;  %v997_v48 = vadd.f32 %v992_v26, %v968_v36 }
 0x1b3   :  { %v1023_v46 = vpop.permute.xlu1 %1022 }
 0x1b4   :  { %v1021_v34 = vpop.permute.xlu0 %1020  ;;  %v1027_v40 = vadd.f32 %v1023_v46, %v998_v3 }
 0x1b5   :  { %v1026_v25 = vadd.f32 %v1021_v34, %v997_v48 }
 0x1b7   :  { %v1052_v1 = vpop.permute.xlu1 %1051 }
 0x1b8   :  { %v1050_v51 = vpop.permute.xlu0 %1049  ;;  %v1056_v4 = vadd.f32 %v1052_v1, %v1027_v40 }
 0x1b9   :  { %v1055_v50 = vadd.f32 %v1050_v51, %v1026_v25 }
 0x1bb   :  { %v1081_v59 = vpop.permute.xlu1 %1080 }
 0x1bc   :  { %v1079_v24 = vpop.permute.xlu0 %1078  ;;  %v1085_v9 = vadd.f32 %v1081_v59, %v1056_v4 }
 0x1bd   :  { %v1084_v42 = vadd.f32 %v1079_v24, %v1055_v50 }
 0x1bf   :  { %v1110_v13 = vpop.permute.xlu1 %1109 }
 0x1c0   :  { %v1108_v0 = vpop.permute.xlu0 %1107  ;;  %v1114_v29 = vadd.f32 %v1110_v13, %v1085_v9 }
 0x1c1   :  { %v1113_v45 = vadd.f32 %v1108_v0, %v1084_v42 }
 0x1c2   :  { %v1134_v14 = vadd.f32 %v3123_v6, %v1114_v29 }
 0x1c3   :  { %v1133_v61 = vadd.f32 %v3125_v20, %v1113_v45 }
 0x1c4   :  { %v1159_v22 = vpop.permute.xlu1 %1158 }
 0x1c5   :  { %v1157_v31 = vpop.permute.xlu0 %1156  ;;  %v1163_v52 = vadd.f32 %v1159_v22, %v1134_v14 }
 0x1c6   :  { %v1162_v33 = vadd.f32 %v1157_v31, %v1133_v61 }
 0x1c8   :  { %v1188_v43 = vpop.permute.xlu1 %1187 }
 0x1c9   :  { %v1186_v27 = vpop.permute.xlu0 %1185  ;;  %v1192_v11 = vadd.f32 %v1188_v43, %v1163_v52 }
 0x1ca   :  { %v1191_v39 = vadd.f32 %v1186_v27, %v1162_v33 }
 0x1cc   :  { %v1217_v60 = vpop.permute.xlu1 %1216 }
 0x1cd   :  { %v1215_v44 = vpop.permute.xlu0 %1214  ;;  %v1221_v32 = vadd.f32 %v1217_v60, %v1192_v11 }
 0x1ce   :  { %v1220_v28 = vadd.f32 %v1215_v44, %v1191_v39 }
 0x1d0   :  { %v1246_v5 = vpop.permute.xlu1 %1245 }
 0x1d1   :  { %v1244_v16 = vpop.permute.xlu0 %1243  ;;  %v1250_v57 = vadd.f32 %v1246_v5, %v1221_v32 }
 0x1d2   :  { %v1249_v8 = vadd.f32 %v1244_v16, %v1220_v28 }
 0x1d4   :  { %v1275_v30 = vpop.permute.xlu1 %1274 }
 0x1d5   :  { %v1273_v58 = vpop.permute.xlu0 %1272  ;;  %v1279_v26 = vadd.f32 %v1275_v30, %v1250_v57 }
 0x1d6   :  { %v1278_v34 = vadd.f32 %v1273_v58, %v1249_v8 }
 0x1d8   :  { %v1304_v54 = vpop.permute.xlu1 %1303 }
 0x1d9   :  { %v1302_v49 = vpop.permute.xlu0 %1301  ;;  %v1308_v6 = vadd.f32 %v1304_v54, %v1279_v26 }
 0x1da   :  { %v1307_v1 = vadd.f32 %v1302_v49, %v1278_v34 }
 0x1dc   :  { %v1324_v2 = vpop.permute.xlu1 %1323 }
 0x1dd   :  { %v1328_v20 = vadd.f32 %v1324_v2, %v1308_v6 }
 0x1df   :  { %v1322_v38 = vpop.permute.xlu0 %1321 }
 0x1e0   :  { %v1353_v35 = vpop.permute.xlu1 %1352  ;;  %v1327_v47 = vadd.f32 %v1322_v38, %v1307_v1 }
 0x1e1   :  { %v1357_v21 = vadd.f32 %v1353_v35, %v1328_v20 }
 0x1e3   :  { %v1351_v56 = vpop.permute.xlu0 %1350 }
 0x1e4   :  { %v1382_v53 = vpop.permute.xlu1 %1381  ;;  %v1356_v10 = vadd.f32 %v1351_v56, %v1327_v47 }
 0x1e5   :  { %v1386_v24 = vadd.f32 %v1382_v53, %v1357_v21 }
 0x1e7   :  { %v1380_v46 = vpop.permute.xlu0 %1379 }
 0x1e8   :  { %v1385_v37 = vadd.f32 %v1380_v46, %v1356_v10 }
 0x1e9   :  { %v1411_v51 = vpop.permute.xlu1 %1410 }
 0x1ea   :  { %v1415_v19 = vadd.f32 %v1411_v51, %v1386_v24 }
 0x1eb   :  { %v1409_v63 = vpop.permute.xlu0 %1408 }
 0x1ec   :  { %v1414_v7 = vadd.f32 %v1409_v63, %v1385_v37 }
 0x1ed   :  { %v1440_v59 = vpop.permute.xlu1 %1439 }
 0x1ee   :  { %v1444_v0 = vadd.f32 %v1440_v59, %v1415_v19 }
 0x1ef   :  { %v1438_v15 = vpop.permute.xlu0 %1437 }
 0x1f0   :  { %v1443_v18 = vadd.f32 %v1438_v15, %v1414_v7 }
 0x1f1   :  { %v1469_v13 = vpop.permute.xlu1 %1468 }
 0x1f2   :  { %v1473_v41 = vadd.f32 %v1469_v13, %v1444_v0 }
 0x1f3   :  { %v1467_v12 = vpop.permute.xlu0 %1466 }
 0x1f4   :  { %v1472_v62 = vadd.f32 %v1467_v12, %v1443_v18 }
 0x1f5   :  { %v1498_v22 = vpop.permute.xlu1 %1497 }
 0x1f6   :  { %v1502_v31 = vadd.f32 %v1498_v22, %v1473_v41 }
 0x1f7   :  { %v1496_v23 = vpop.permute.xlu0 %1495 }
 0x1f8   :  { %v1501_v17 = vadd.f32 %v1496_v23, %v1472_v62  ;;  %v1634_v43 = vmul.f32 -1.442695, %v1502_v31 }
 0x1fa   :  { %v1633_v27 = vmul.f32 -1.442695, %v1501_v17  ;;  %1649 = vpow2.f32 %v1634_v43 }
 0x1fc   :  { %1651 = vpow2.f32 %v1633_v27 }
 0x207   :  { %v1650_v55 = vpop.eup %1649 }
 0x208   :  { %v1510_v60 = vadd.f32 1.0, %v1650_v55 }
 0x209   :  { %v1652_v36 = vpop.eup %1651 }
 0x20a   :  { %v1509_v3 = vadd.f32 1.0, %v1652_v36  ;;  %1653 = vrcp.f32 %v1510_v60 }
 0x20c   :  { %1655 = vrcp.f32 %v1509_v3 }
 0x217   :  { %v1654_v44 = vpop.eup %1653 }
 0x218   :  { %1517 = vst.msk [vmem:[#allocation8 + $0x8] sm:$0xff] %vm1515_vm11, %v1654_v44 }
 0x219   :  { %v1656_v48 = vpop.eup %1655 }
 0x21a   :  { %1516 = vst.msk [vmem:[#allocation8] sm:$0xff] %vm1515_vm11, %v1656_v48 }
 0x21b   :  { %1706 = shalt.err (!%p1703_p0)
}
 0x21c   :  { %s3556_s28 = smov 8   ;;  %s3557_s3 = smov 128  }
 0x21d   :  { %s3558_s7 = sld [smem:[#allocation106_spill]] }
 0x223   :  { %1529 = dma.vmem_to_hbm [thread:$0]  %s1524_s20, 256, %s3558_s7, [#allocation5], %s3557_s3, %s3557_s3, %s3556_s28  }
 0x224   :  { %1719 = dma.done.wait [#allocation5], 256  }
 0x225   :  { %1720 = vsyncadd [#allocation5], 4294967040 }
 0x226   :  { %1533 = vsyncpa [#allocation4], 1 }
 0x227   :  { %1534 = vsyncpa [#allocation5], 1 }
 0x228   :  { %1535 = vsyncpa [#allocation6], 1 }

</bundles_post_ra>
